<compile_context>
chip_gen: v5e
topology: v5e:2x2
jax: 0.10.0
libtpu: 0.0.40
codegen_flags: <defaults>
</compile_context>

<pallas_src>
import jax
import jax.numpy as jnp
import numpy as np
from jax import lax
from jax.experimental import pallas as pl
from jax.experimental.pallas import tpu as pltpu


def bottleneck_kernel(x_ref, w1_ref, w2_ref, w3_ref, b1_ref, b2_ref, b3_ref,
                      o_ref, pad_ref):
    """One image per grid step; conv1/conv2/conv3 + folded BN + ReLU + residual.

    x_ref  : (1, H, W, Cin)  bf16, Cin = 4*planes (also the residual path)
    w1_ref : (Cin, P)        bf16, conv1 1x1 with BN1 scale folded in
    w2_ref : (9*P, P)        bf16, conv2 3x3 im2col weights with BN2 scale folded
    w3_ref : (P, C4)         bf16, conv3 1x1 with BN3 scale folded in
    b*_ref : (1, C)          f32 BN biases
    o_ref  : (1, H, W, C4)   f32
    pad_ref: (H+2, W+2, P)   bf16 VMEM halo buffer for the 3x3 conv (padding=1)
    """
    H = x_ref.shape[1]
    W = x_ref.shape[2]
    Cin = x_ref.shape[3]
    P = w1_ref.shape[1]
    C4 = w3_ref.shape[1]

    x = x_ref[0].reshape(H * W, Cin)                      # bf16 (HW, Cin)

    # conv1 (1x1, BN1 scale pre-folded) -> bias -> relu
    h1 = jnp.dot(x, w1_ref[...], preferred_element_type=jnp.float32)
    h1 = jnp.maximum(h1 + b1_ref[...], 0.0)

    # Stage h1 into the halo buffer. Only the 1-pixel border needs zeroing
    # (the interior is fully overwritten every step); cheap, and megacore-safe.
    pad_ref[0:1, :, :] = jnp.zeros((1, W + 2, P), jnp.bfloat16)
    pad_ref[H + 1:H + 2, :, :] = jnp.zeros((1, W + 2, P), jnp.bfloat16)
    pad_ref[1:H + 1, 0:1, :] = jnp.zeros((H, 1, P), jnp.bfloat16)
    pad_ref[1:H + 1, W + 1:W + 2, :] = jnp.zeros((H, 1, P), jnp.bfloat16)
    pad_ref[1:H + 1, 1:W + 1, :] = h1.astype(jnp.bfloat16).reshape(H, W, P)

    # conv2 (3x3, stride=1, pad=1, dilation=1) as ONE im2col matmul:
    # build (HW, 9P) from the nine shifted windows, single K=9P MXU push.
    cols = [pad_ref[ky:ky + H, kx:kx + W, :].reshape(H * W, P)
            for ky in range(3) for kx in range(3)]
    im2col = jnp.concatenate(cols, axis=-1)               # (HW, 9P) bf16
    h2 = jnp.dot(im2col, w2_ref[...], preferred_element_type=jnp.float32)
    h2 = jnp.maximum(h2 + b2_ref[...], 0.0)

    # conv3 (1x1, BN3 scale pre-folded) -> bias, residual add, relu
    h3 = jnp.dot(h2.astype(jnp.bfloat16), w3_ref[...],
                 preferred_element_type=jnp.float32)
    out = jnp.maximum(h3 + b3_ref[...] + x.astype(jnp.float32), 0.0)
    o_ref[0] = out.reshape(H, W, C4)


@jax.jit
def bottleneck_pallas(x_nhwc, w1, w2col, w3, b1, b2, b3):
    N, H, W, Cin = x_nhwc.shape
    P = w1.shape[1]
    C4 = w3.shape[1]
    return pl.pallas_call(
        bottleneck_kernel,
        out_shape=jax.ShapeDtypeStruct((N, H, W, C4), jnp.float32),
        grid_spec=pltpu.PrefetchScalarGridSpec(
            num_scalar_prefetch=0,
            grid=(N,),
            in_specs=[
                pl.BlockSpec((1, H, W, Cin), lambda n: (n, 0, 0, 0)),
                pl.BlockSpec(w1.shape, lambda n: (0, 0)),
                pl.BlockSpec(w2col.shape, lambda n: (0, 0)),
                pl.BlockSpec(w3.shape, lambda n: (0, 0)),
                pl.BlockSpec(b1.shape, lambda n: (0, 0)),
                pl.BlockSpec(b2.shape, lambda n: (0, 0)),
                pl.BlockSpec(b3.shape, lambda n: (0, 0)),
            ],
            out_specs=pl.BlockSpec((1, H, W, C4), lambda n: (n, 0, 0, 0)),
            scratch_shapes=[pltpu.VMEM((H + 2, W + 2, P), jnp.bfloat16)],
        ),
        compiler_params=pltpu.CompilerParams(
            dimension_semantics=("parallel",)),
    )(x_nhwc, w1, w2col, w3, b1, b2, b3)


def fold_bn(gamma, beta, mean, var, eps=1e-5):
    scale = gamma / jnp.sqrt(var + eps)
    bias = beta - mean * scale
    return scale.astype(jnp.float32), bias.astype(jnp.float32)


def prepare_params(w1_t, w2_t, w3_t, bn1, bn2, bn3):
    """Torch-layout conv weights (Cout,Cin,kH,kW) + BN params -> kernel operands.

    BN scales are folded into the (bf16) matmul weights; biases stay f32.
    """
    s1, b1 = fold_bn(*bn1)
    s2, b2 = fold_bn(*bn2)
    s3, b3 = fold_bn(*bn3)
    w1 = jnp.transpose(w1_t[:, :, 0, 0]) * s1[None, :]                 # (Cin, P)
    w2col = jnp.transpose(w2_t, (2, 3, 1, 0)).reshape(-1, w2_t.shape[0])
    w2col = w2col * s2[None, :]                                        # (9P, P)
    w3 = jnp.transpose(w3_t[:, :, 0, 0]) * s3[None, :]                 # (P, C4)
    return (w1.astype(jnp.bfloat16), w2col.astype(jnp.bfloat16),
            w3.astype(jnp.bfloat16),
            b1.reshape(1, -1), b2.reshape(1, -1), b3.reshape(1, -1))


def ref_bottleneck_nhwc(x, w1_t, w2_t, w3_t, bn1, bn2, bn3):
    """Pure-JAX f32 reference (NHWC), torch-layout weights, inference BN."""
    def bn(h, params):
        s, b = fold_bn(*params)
        return h * s + b

    h = jnp.einsum('nhwc,oc->nhwo', x, w1_t[:, :, 0, 0])
    h = jnp.maximum(bn(h, bn1), 0.0)
    w_hwio = jnp.transpose(w2_t, (2, 3, 1, 0))
    h = lax.conv_general_dilated(
        h, w_hwio, window_strides=(1, 1), padding=((1, 1), (1, 1)),
        dimension_numbers=('NHWC', 'HWIO', 'NHWC'))
    h = jnp.maximum(bn(h, bn2), 0.0)
    h = jnp.einsum('nhwc,oc->nhwo', h, w3_t[:, :, 0, 0])
    h = bn(h, bn3)
    return jnp.maximum(h + x, 0.0)


if __name__ == "__main__":
    # Small but lane/MXU friendly: planes=32 -> inplanes = C4 = 128 (lane-dense
    # residual/output), H=W=16 -> 256 rows per matmul, batch N=2 -> 2 parallel
    # grid steps.
    N, planes, H, W = 2, 32, 16, 16
    inplanes = planes * 4          # downsample=None => residual shape must match
    C4 = planes * 4

    key = jax.random.PRNGKey(0)
    kx, k1, k2, k3 = jax.random.split(key, 4)

    # Input in PyTorch NCHW convention, transposed to the kernel's NHWC layout.
    x_nchw = jax.random.normal(kx, (N, inplanes, H, W), dtype=jnp.float32)
    x_nhwc = jnp.transpose(x_nchw, (0, 2, 3, 1))

    # Conv weights in PyTorch layout (Cout, Cin, kH, kW), bias=False.
    w1_t = 0.1 * jax.random.normal(k1, (planes, inplanes, 1, 1), dtype=jnp.float32)
    w2_t = 0.1 * jax.random.normal(k2, (planes, planes, 3, 3), dtype=jnp.float32)
    w3_t = 0.1 * jax.random.normal(k3, (C4, planes, 1, 1), dtype=jnp.float32)

    # Deterministic BatchNorm parameters (affine=True).
    def bn_params(c, off):
        i = jnp.arange(c, dtype=jnp.float32)
        gamma = 1.0 + 0.01 * (i + off)
        beta = 0.05 * (i - off)
        mean = 0.1 * jnp.sin(i + off)
        var = 1.0 + 0.02 * i
        return gamma, beta, mean, var

    bn1 = bn_params(planes, 1.0)
    bn2 = bn_params(planes, 2.0)
    bn3 = bn_params(C4, 3.0)

    w1, w2col, w3, b1, b2, b3 = prepare_params(w1_t, w2_t, w3_t, bn1, bn2, bn3)

    x_bf16 = x_nhwc.astype(jnp.bfloat16)
    out_nhwc = bottleneck_pallas(x_bf16, w1, w2col, w3, b1, b2, b3)
    out_nhwc = jax.block_until_ready(out_nhwc)
    out_nchw = jnp.transpose(out_nhwc, (0, 3, 1, 2))

    # f32 reference on the same bf16-rounded inputs/weights (kernel matmuls are
    # bf16 x bf16 -> f32 accumulate, so tolerance is bf16-level).
    ref = ref_bottleneck_nhwc(
        x_bf16.astype(jnp.float32),
        w1_t.astype(jnp.bfloat16).astype(jnp.float32),
        w2_t.astype(jnp.bfloat16).astype(jnp.float32),
        w3_t.astype(jnp.bfloat16).astype(jnp.float32),
        bn1, bn2, bn3)
    np.testing.assert_allclose(np.asarray(out_nhwc), np.asarray(ref),
                               rtol=2e-2, atol=3e-2)
    assert out_nchw.shape == (N, C4, H, W)

    print("KERNEL_OK")
</pallas_src>

<mosaic_0001>
module attributes {stable_mosaic.version = 11 : i64} {
  func.func @bottleneck_kernel(%arg0: i32, %arg1: memref<1x16x16x128xbf16, #tpu.memory_space<vmem>>, %arg2: memref<128x32xbf16, #tpu.memory_space<vmem>>, %arg3: memref<288x32xbf16, #tpu.memory_space<vmem>>, %arg4: memref<32x128xbf16, #tpu.memory_space<vmem>>, %arg5: memref<1x32xf32, #tpu.memory_space<vmem>>, %arg6: memref<1x32xf32, #tpu.memory_space<vmem>>, %arg7: memref<1x128xf32, #tpu.memory_space<vmem>>, %arg8: memref<1x16x16x128xf32, #tpu.memory_space<vmem>>, %arg9: memref<18x18x32xbf16, #tpu.memory_space<vmem>>) attributes {dimension_semantics = [#tpu.dimension_semantics<parallel>], iteration_bounds = array<i64: 2>, scalar_prefetch = 0 : i64, scratch_operands = 1 : i64, tpu.core_type = #tpu.core_type<tc>, window_params = [{transform_indices = @transform_0, window_bounds = array<i64: 1, 16, 16, 128>}, {pipeline_mode = #tpu.pipeline_mode<synchronous>, transform_indices = @transform_1, window_bounds = array<i64: 128, 32>}, {pipeline_mode = #tpu.pipeline_mode<synchronous>, transform_indices = @transform_2, window_bounds = array<i64: 288, 32>}, {pipeline_mode = #tpu.pipeline_mode<synchronous>, transform_indices = @transform_3, window_bounds = array<i64: 32, 128>}, {pipeline_mode = #tpu.pipeline_mode<synchronous>, transform_indices = @transform_4, window_bounds = array<i64: 1, 32>}, {pipeline_mode = #tpu.pipeline_mode<synchronous>, transform_indices = @transform_5, window_bounds = array<i64: 1, 32>}, {pipeline_mode = #tpu.pipeline_mode<synchronous>, transform_indices = @transform_6, window_bounds = array<i64: 1, 128>}, {transform_indices = @transform_7, window_bounds = array<i64: 1, 16, 16, 128>}]} {
    %c0 = arith.constant 0 : index
    %c0_0 = arith.constant 0 : index
    %c0_1 = arith.constant 0 : index
    %c0_2 = arith.constant 0 : index
    %0 = vector.load %arg1[%c0, %c0_0, %c0_1, %c0_2] : memref<1x16x16x128xbf16, #tpu.memory_space<vmem>>, vector<1x16x16x128xbf16>
    %1 = vector.shape_cast %0 : vector<1x16x16x128xbf16> to vector<16x16x128xbf16>
    %2 = vector.shape_cast %1 : vector<16x16x128xbf16> to vector<256x128xbf16>
    %c0_3 = arith.constant 0 : index
    %c0_4 = arith.constant 0 : index
    %3 = vector.load %arg2[%c0_3, %c0_4] : memref<128x32xbf16, #tpu.memory_space<vmem>>, vector<128x32xbf16>
    %cst = arith.constant dense<0.000000e+00> : vector<256x32xf32>
    %4 = tpu.matmul %2, %3, %cst {dimension_numbers = #tpu.dot_dimension_numbers<[1], [0], [0], [1], [0, 0, 1, 1], [], []>} : vector<256x128xbf16>, vector<128x32xbf16>, vector<256x32xf32> -> vector<256x32xf32>
    %c0_5 = arith.constant 0 : index
    %c0_6 = arith.constant 0 : index
    %5 = vector.load %arg5[%c0_5, %c0_6] : memref<1x32xf32, #tpu.memory_space<vmem>>, vector<1x32xf32>
    %6 = vector.broadcast %5 : vector<1x32xf32> to vector<256x32xf32>
    %7 = arith.addf %4, %6 : vector<256x32xf32>
    %cst_7 = arith.constant 0.000000e+00 : f32
    %8 = vector.broadcast %cst_7 : f32 to vector<256x32xf32>
    %9 = arith.maximumf %7, %8 : vector<256x32xf32>
    %cst_8 = arith.constant 0.000000e+00 : bf16
    %10 = vector.broadcast %cst_8 : bf16 to vector<1x18x32xbf16>
    %c0_9 = arith.constant 0 : index
    %c0_10 = arith.constant 0 : index
    %c0_11 = arith.constant 0 : index
    %11 = vector.load %arg9[%c0_9, %c0_10, %c0_11] : memref<18x18x32xbf16, #tpu.memory_space<vmem>>, vector<1x18x32xbf16>
    tpu.vector_store %arg9[%c0_9, %c0_10, %c0_11], %10 {strides = array<i32>} : memref<18x18x32xbf16, #tpu.memory_space<vmem>>, vector<1x18x32xbf16>,
    %cst_12 = arith.constant 0.000000e+00 : bf16
    %12 = vector.broadcast %cst_12 : bf16 to vector<1x18x32xbf16>
    %c17 = arith.constant 17 : index
    %c0_13 = arith.constant 0 : index
    %c0_14 = arith.constant 0 : index
    %13 = vector.load %arg9[%c17, %c0_13, %c0_14] : memref<18x18x32xbf16, #tpu.memory_space<vmem>>, vector<1x18x32xbf16>
    tpu.vector_store %arg9[%c17, %c0_13, %c0_14], %12 {strides = array<i32>} : memref<18x18x32xbf16, #tpu.memory_space<vmem>>, vector<1x18x32xbf16>,
    %cst_15 = arith.constant 0.000000e+00 : bf16
    %14 = vector.broadcast %cst_15 : bf16 to vector<16x1x32xbf16>
    %c1 = arith.constant 1 : index
    %c0_16 = arith.constant 0 : index
    %c0_17 = arith.constant 0 : index
    %15 = vector.load %arg9[%c1, %c0_16, %c0_17] : memref<18x18x32xbf16, #tpu.memory_space<vmem>>, vector<16x1x32xbf16>
    tpu.vector_store %arg9[%c1, %c0_16, %c0_17], %14 {strides = array<i32>} : memref<18x18x32xbf16, #tpu.memory_space<vmem>>, vector<16x1x32xbf16>,
    %cst_18 = arith.constant 0.000000e+00 : bf16
    %16 = vector.broadcast %cst_18 : bf16 to vector<16x1x32xbf16>
    %c1_19 = arith.constant 1 : index
    %c17_20 = arith.constant 17 : index
    %c0_21 = arith.constant 0 : index
    %17 = vector.load %arg9[%c1_19, %c17_20, %c0_21] : memref<18x18x32xbf16, #tpu.memory_space<vmem>>, vector<16x1x32xbf16>
    tpu.vector_store %arg9[%c1_19, %c17_20, %c0_21], %16 {strides = array<i32>} : memref<18x18x32xbf16, #tpu.memory_space<vmem>>, vector<16x1x32xbf16>,
    %18 = arith.truncf %9 : vector<256x32xf32> to vector<256x32xbf16>
    %19 = vector.shape_cast %18 : vector<256x32xbf16> to vector<16x16x32xbf16>
    %c1_22 = arith.constant 1 : index
    %c1_23 = arith.constant 1 : index
    %c0_24 = arith.constant 0 : index
    %20 = vector.load %arg9[%c1_22, %c1_23, %c0_24] : memref<18x18x32xbf16, #tpu.memory_space<vmem>>, vector<16x16x32xbf16>
    tpu.vector_store %arg9[%c1_22, %c1_23, %c0_24], %19 {strides = array<i32>} : memref<18x18x32xbf16, #tpu.memory_space<vmem>>, vector<16x16x32xbf16>,
    %c0_25 = arith.constant 0 : index
    %c0_26 = arith.constant 0 : index
    %c0_27 = arith.constant 0 : index
    %21 = vector.load %arg9[%c0_25, %c0_26, %c0_27] : memref<18x18x32xbf16, #tpu.memory_space<vmem>>, vector<16x16x32xbf16>
    %22 = vector.shape_cast %21 : vector<16x16x32xbf16> to vector<256x32xbf16>
    %c0_28 = arith.constant 0 : index
    %c1_29 = arith.constant 1 : index
    %c0_30 = arith.constant 0 : index
    %23 = vector.load %arg9[%c0_28, %c1_29, %c0_30] : memref<18x18x32xbf16, #tpu.memory_space<vmem>>, vector<16x16x32xbf16>
    %24 = vector.shape_cast %23 : vector<16x16x32xbf16> to vector<256x32xbf16>
    %c0_31 = arith.constant 0 : index
    %c2 = arith.constant 2 : index
    %c0_32 = arith.constant 0 : index
    %25 = vector.load %arg9[%c0_31, %c2, %c0_32] : memref<18x18x32xbf16, #tpu.memory_space<vmem>>, vector<16x16x32xbf16>
    %26 = vector.shape_cast %25 : vector<16x16x32xbf16> to vector<256x32xbf16>
    %c1_33 = arith.constant 1 : index
    %c0_34 = arith.constant 0 : index
    %c0_35 = arith.constant 0 : index
    %27 = vector.load %arg9[%c1_33, %c0_34, %c0_35] : memref<18x18x32xbf16, #tpu.memory_space<vmem>>, vector<16x16x32xbf16>
    %28 = vector.shape_cast %27 : vector<16x16x32xbf16> to vector<256x32xbf16>
    %c1_36 = arith.constant 1 : index
    %c1_37 = arith.constant 1 : index
    %c0_38 = arith.constant 0 : index
    %29 = vector.load %arg9[%c1_36, %c1_37, %c0_38] : memref<18x18x32xbf16, #tpu.memory_space<vmem>>, vector<16x16x32xbf16>
    %30 = vector.shape_cast %29 : vector<16x16x32xbf16> to vector<256x32xbf16>
    %c1_39 = arith.constant 1 : index
    %c2_40 = arith.constant 2 : index
    %c0_41 = arith.constant 0 : index
    %31 = vector.load %arg9[%c1_39, %c2_40, %c0_41] : memref<18x18x32xbf16, #tpu.memory_space<vmem>>, vector<16x16x32xbf16>
    %32 = vector.shape_cast %31 : vector<16x16x32xbf16> to vector<256x32xbf16>
    %c2_42 = arith.constant 2 : index
    %c0_43 = arith.constant 0 : index
    %c0_44 = arith.constant 0 : index
    %33 = vector.load %arg9[%c2_42, %c0_43, %c0_44] : memref<18x18x32xbf16, #tpu.memory_space<vmem>>, vector<16x16x32xbf16>
    %34 = vector.shape_cast %33 : vector<16x16x32xbf16> to vector<256x32xbf16>
    %c2_45 = arith.constant 2 : index
    %c1_46 = arith.constant 1 : index
    %c0_47 = arith.constant 0 : index
    %35 = vector.load %arg9[%c2_45, %c1_46, %c0_47] : memref<18x18x32xbf16, #tpu.memory_space<vmem>>, vector<16x16x32xbf16>
    %36 = vector.shape_cast %35 : vector<16x16x32xbf16> to vector<256x32xbf16>
    %c2_48 = arith.constant 2 : index
    %c2_49 = arith.constant 2 : index
    %c0_50 = arith.constant 0 : index
    %37 = vector.load %arg9[%c2_48, %c2_49, %c0_50] : memref<18x18x32xbf16, #tpu.memory_space<vmem>>, vector<16x16x32xbf16>
    %38 = vector.shape_cast %37 : vector<16x16x32xbf16> to vector<256x32xbf16>
    %39 = tpu.concatenate %22, %24, %26, %28, %30, %32, %34, %36, %38 in 1 : vector<256x32xbf16>, vector<256x32xbf16>, vector<256x32xbf16>, vector<256x32xbf16>, vector<256x32xbf16>, vector<256x32xbf16>, vector<256x32xbf16>, vector<256x32xbf16>, vector<256x32xbf16> -> vector<256x288xbf16>
    %c0_51 = arith.constant 0 : index
    %c0_52 = arith.constant 0 : index
    %40 = vector.load %arg3[%c0_51, %c0_52] : memref<288x32xbf16, #tpu.memory_space<vmem>>, vector<288x32xbf16>
    %cst_53 = arith.constant dense<0.000000e+00> : vector<256x32xf32>
    %41 = tpu.matmul %39, %40, %cst_53 {dimension_numbers = #tpu.dot_dimension_numbers<[1], [0], [0], [1], [0, 0, 1, 1], [], []>} : vector<256x288xbf16>, vector<288x32xbf16>, vector<256x32xf32> -> vector<256x32xf32>
    %c0_54 = arith.constant 0 : index
    %c0_55 = arith.constant 0 : index
    %42 = vector.load %arg6[%c0_54, %c0_55] : memref<1x32xf32, #tpu.memory_space<vmem>>, vector<1x32xf32>
    %43 = vector.broadcast %42 : vector<1x32xf32> to vector<256x32xf32>
    %44 = arith.addf %41, %43 : vector<256x32xf32>
    %cst_56 = arith.constant 0.000000e+00 : f32
    %45 = vector.broadcast %cst_56 : f32 to vector<256x32xf32>
    %46 = arith.maximumf %44, %45 : vector<256x32xf32>
    %47 = arith.truncf %46 : vector<256x32xf32> to vector<256x32xbf16>
    %c0_57 = arith.constant 0 : index
    %c0_58 = arith.constant 0 : index
    %48 = vector.load %arg4[%c0_57, %c0_58] : memref<32x128xbf16, #tpu.memory_space<vmem>>, vector<32x128xbf16>
    %cst_59 = arith.constant dense<0.000000e+00> : vector<256x128xf32>
    %49 = tpu.matmul %47, %48, %cst_59 {dimension_numbers = #tpu.dot_dimension_numbers<[1], [0], [0], [1], [0, 0, 1, 1], [], []>} : vector<256x32xbf16>, vector<32x128xbf16>, vector<256x128xf32> -> vector<256x128xf32>
    %c0_60 = arith.constant 0 : index
    %c0_61 = arith.constant 0 : index
    %50 = vector.load %arg7[%c0_60, %c0_61] : memref<1x128xf32, #tpu.memory_space<vmem>>, vector<1x128xf32>
    %51 = vector.broadcast %50 : vector<1x128xf32> to vector<256x128xf32>
    %52 = arith.addf %49, %51 : vector<256x128xf32>
    %53 = arith.extf %2 : vector<256x128xbf16> to vector<256x128xf32>
    %54 = arith.addf %52, %53 : vector<256x128xf32>
    %cst_62 = arith.constant 0.000000e+00 : f32
    %55 = vector.broadcast %cst_62 : f32 to vector<256x128xf32>
    %56 = arith.maximumf %54, %55 : vector<256x128xf32>
    %57 = vector.shape_cast %56 : vector<256x128xf32> to vector<16x16x128xf32>
    %c0_63 = arith.constant 0 : index
    %c0_64 = arith.constant 0 : index
    %c0_65 = arith.constant 0 : index
    %c0_66 = arith.constant 0 : index
    %58 = vector.load %arg8[%c0_63, %c0_64, %c0_65, %c0_66] : memref<1x16x16x128xf32, #tpu.memory_space<vmem>>, vector<1x16x16x128xf32>
    %59 = vector.shape_cast %58 : vector<1x16x16x128xf32> to vector<16x16x128xf32>
    %60 = vector.shape_cast %57 : vector<16x16x128xf32> to vector<1x16x16x128xf32>
    tpu.vector_store %arg8[%c0_63, %c0_64, %c0_65, %c0_66], %60 {strides = array<i32>} : memref<1x16x16x128xf32, #tpu.memory_space<vmem>>, vector<1x16x16x128xf32>,
    return
  }
  func.func @transform_0(%arg0: i32) -> (i32, i32, i32, i32) {
    %c0_i32 = arith.constant 0 : i32
    %c0_i32_0 = arith.constant 0 : i32
    %c0_i32_1 = arith.constant 0 : i32
    %c0_i32_2 = arith.constant 0 : i32
    return %arg0, %c0_i32, %c0_i32_0, %c0_i32_1 : i32, i32, i32, i32
  }
  func.func @transform_1(%arg0: i32) -> (i32, i32) {
    %c0_i32 = arith.constant 0 : i32
    %c0_i32_0 = arith.constant 0 : i32
    %c0_i32_1 = arith.constant 0 : i32
    return %c0_i32, %c0_i32_0 : i32, i32
  }
  func.func @transform_2(%arg0: i32) -> (i32, i32) {
    %c0_i32 = arith.constant 0 : i32
    %c0_i32_0 = arith.constant 0 : i32
    %c0_i32_1 = arith.constant 0 : i32
    return %c0_i32, %c0_i32_0 : i32, i32
  }
  func.func @transform_3(%arg0: i32) -> (i32, i32) {
    %c0_i32 = arith.constant 0 : i32
    %c0_i32_0 = arith.constant 0 : i32
    %c0_i32_1 = arith.constant 0 : i32
    return %c0_i32, %c0_i32_0 : i32, i32
  }
  func.func @transform_4(%arg0: i32) -> (i32, i32) {
    %c0_i32 = arith.constant 0 : i32
    %c0_i32_0 = arith.constant 0 : i32
    %c0_i32_1 = arith.constant 0 : i32
    return %c0_i32, %c0_i32_0 : i32, i32
  }
  func.func @transform_5(%arg0: i32) -> (i32, i32) {
    %c0_i32 = arith.constant 0 : i32
    %c0_i32_0 = arith.constant 0 : i32
    %c0_i32_1 = arith.constant 0 : i32
    return %c0_i32, %c0_i32_0 : i32, i32
  }
  func.func @transform_6(%arg0: i32) -> (i32, i32) {
    %c0_i32 = arith.constant 0 : i32
    %c0_i32_0 = arith.constant 0 : i32
    %c0_i32_1 = arith.constant 0 : i32
    return %c0_i32, %c0_i32_0 : i32, i32
  }
  func.func @transform_7(%arg0: i32) -> (i32, i32, i32, i32) {
    %c0_i32 = arith.constant 0 : i32
    %c0_i32_0 = arith.constant 0 : i32
    %c0_i32_1 = arith.constant 0 : i32
    %c0_i32_2 = arith.constant 0 : i32
    return %arg0, %c0_i32, %c0_i32_0, %c0_i32_1 : i32, i32, i32, i32
  }
}

</mosaic_0001>

<bundles_post_ra>
// kernel: bottleneck_pallas.1
= control target key start
LH: loop header
LB: loop body
LE: loop exit
PB: predicated region body
PF: predicated region fallthrough
CT: control target
= control target key end

     0   :  { %12 = vsyncpa [#allocation4], 0  ;;  %s7697_s0 = inlined_call_operand.hbm [shape: bf16[2,16,16,128], index: 0, kind: input, shape index: {}]   ;;  %s7698_s1 = inlined_call_operand.vmem [shape: bf16[128,32], index: 1, kind: input, shape index: {}]   ;;  %s7699_s2 = inlined_call_operand.vmem [shape: bf16[288,32], index: 2, kind: input, shape index: {}]   ;;  %s7700_s3 = inlined_call_operand.vmem [shape: bf16[32,128], index: 3, kind: input, shape index: {}]   ;;  %s7701_s4 = inlined_call_operand.vmem [shape: f32[1,32], index: 4, kind: input, shape index: {}]   ;;  %s7702_s5 = inlined_call_operand.vmem [shape: f32[1,32], index: 5, kind: input, shape index: {}]   ;;  %s7703_s6 = inlined_call_operand.vmem [shape: f32[1,128], index: 6, kind: input, shape index: {}]   ;;  %s7704_s7 = inlined_call_operand.hbm [shape: f32[2,16,16,128], index: 7, kind: output, shape index: {}]  }
   0x1   :  { %14 = vsyncpa [#allocation4 + $0x1], 0 }
   0x2   :  { %15 = vsyncpa [#allocation5], 0 }
   0x3   :  { %17 = vsyncpa [#allocation5 + $0x1], 0  ;;  %s5653_s24 = smov 0   ;;  %s5655_s25 = smov 0  }
   0x4   :  { %s5657_s26 = smov 0   ;;  %s5659_s27 = smov 0  }
   0x5 LB: > { %s5674_s28 = sadd.s32 4294967295, %s5603_s27   ;;  %s4843_s29 = sadd.s32 4294967294, %s5603_s27   ;;  %s5603_s27 = sphi %s5659_s27, %s7728_s27   ;;  %s5599_s26 = sphi %s5657_s26, %s7727_s26   ;;  %s5595_s25 = sphi %s5655_s25, %s7726_s25   ;;  %s5591_s24 = sphi %s5653_s24, %s7725_s24  }
   0x6   : > { %s5678_s30 = sadd.s32 1, %s5603_s27   ;;  %s30_s8 = sadd.s32 1, %s5599_s26 }
   0x7   : > { %s27_s9 = ssub.s32 %s5603_s27, %s5678_s30  ;;  %p37_p0 = scmp.ne.s32.totalorder %s5599_s26, %s5595_s25 }
   0x8   : > { %p28_p1 = scmp.eq.s32.totalorder %s27_s9, 0  ;;  %p38_p2 = scmp.eq.s32.totalorder %s5603_s27, 0 }
   0x9   : > { %p43_p3 = scmp.ne.s32.totalorder %s5595_s25, %s5591_s24  ;;  %p44_p4 = scmp.eq.s32.totalorder %s5674_s28, 0 }
   0xa   : > { %s5690_s10 = scalar_select %p28_p1, %s5599_s26, %s30_s8  }
   0xb   : > { %p5692_p5 = por %p38_p2, %p37_p0  ;;  %p5696_p6 = por %p44_p4, %p43_p3 }
   0xc   : > { %7705 = sst [smem:[#allocation9_spill]] %s5690_s10  ;;  %p193_p7 = scmp.eq.s32.totalorder %s5674_s28, 1 }
   0xd   : > { %p199_p8 = scmp.eq.s32.totalorder %s4843_s29, 1  ;;  %p5429_p10 = scmp.lt.s32.totalorder %s5603_s27, 2 }
   0xe   : > { %p5703_p11 = por %p193_p7, %p37_p0  ;;  %s237_s15 = sand.u32 1, %s5599_s26  }
   0xf   : > { %p5707_p12 = por %p199_p8, %p43_p3  ;;  %s5305_s16 = sshll.u32 %s5603_s27, 7 }
  0x10   : > { %s4846_s17 = sshll.u32 %s237_s15, 7  ;;  %s246_s20 = scalar_lea.hbm %s7697_s0, %s5305_s16 }
  0x11   : > { %s247_s21 = sshll.u32 %s246_s20, 4  ;;  %s241_s22 = scalar_lea.vmem [#allocation3], %s4846_s17  ;;  %s248_s21 = int_to_ptr.hbm [resolvable:$true] %s247_s21 }
  0x12   : > { %s249_s23 = sshll.u32 %s241_s22, 4  ;;  %p5718_p13 = pnand %p5429_p10, %p5692_p5  ;;  %s250_s23 = int_to_ptr.vmem [resolvable:$true] %s249_s23 }
  0x13   : > { %p4849_p0 = scmp.ge.s32.totalorder %s5603_s27, 1  ;;  %p257_p1 = scmp.lt.s32.totalorder %s5603_s27, 3 }
  0x14   : > { %s238_s8 = scalar_lea.sflag [#allocation4], %s237_s15  ;;  %s5507_s9 = sshra.s32 %s248_s21, 4  ;;  %s5508_s9 = int_to_ptr.hbm [resolvable:$true] %s5507_s9 }
  0x15   : > { %s5509_s10 = scalar_lea.hbm %s5508_s9, 128  ;;  %p5511_p3 = pneg %p5718_p13 }
  0x16   : > { %p5510_p2 = scmp.ne.s32.totalorder %s5508_s9, %s5509_s10  ;;  %s5514_s11 = scalar_lea.hbm %s7697_s0, 256 }
  0x17   : > { %p5515_p5 = scmp.lt.s32.totalorder %s5508_s9, %s7697_s0  ;;  %p5516_p8 = scmp.lt.s32.totalorder %s5514_s11, %s5509_s10 }
  0x18   : > { %p5512_p4 = pnand %p5511_p3, %p5510_p2 }
  0x19   : > { %p5517_p10 = por %p5516_p8, %p5515_p5 }
  0x1a   : > { %p5513_p7 = pneg %p5512_p4 }
  0x1c   : > { %p5518_p9 = pnand %p5517_p10, %p5513_p7 }
  0x1e   : > { %5521 = shalt.err (!%p5518_p9)
}
  0x1f   : > { %s5605_s15 = smov 64   ;;  %s5606_s20 = smov 4  }
  0x20   : > { %5424 = dma.hbm_to_vmem [thread:$0]  (!%p5718_p13), %s248_s21, 2048, %s250_s23, %s238_s8, %s5605_s15, %s5605_s15, %s5606_s20  }
  0x21   : > { %p258_p2 = pnand %p4849_p0, %p257_p1 }
  0x22   : > { %s5739_s22 = sand.u32 (!%p258_p2), 1, %s5595_s25  }
  0x23   : > { %261 = sbr.rel (%p258_p2) target bundleno = 1038 (0x40e), region = 48  ;;  %s4850_s10 = sshll.u32 (!%p258_p2), %s5739_s22, 7 }
  0x24   : > { %s264_s9 = scalar_lea.sflag (!%p258_p2), [#allocation4], %s5739_s22  ;;  %s5743_s16 = scalar_lea.vmem (!%p258_p2), [#allocation3], %s4850_s10 }
  0x28   : > { %5582 = dma.done.wait (%p5696_p6), %s264_s9, 2048  }
  0x29   : > { %5584 = vsyncadd (%p5696_p6), %s264_s9, 4294965248  ;;  %v5329_v0 = vld [vmem:[%s7698_s1 + $0x38] sm:$0xff]  ;;  %v5328_v1 = vld [vmem:[%s7698_s1 + $0x30] sm:$0xff]  ;;  %vm620_vm0 = vcmask 253952   ;;  %vm628_vm1 = vsmask.f32 256 }
  0x2a   : > { %496 = vmatpush.bf16.msra.mxu0 %v5329_v0  ;;  %5399 = vmatpush.bf16.msra.mxu1 %v5329_v0  ;;  %v5327_v2 = vld [vmem:[%s7698_s1 + $0x28] sm:$0xff]  ;;  %v5326_v3 = vld [vmem:[%s7698_s1 + $0x20] sm:$0xff]  ;;  %v5325_v4 = vld [vmem:[%s7698_s1 + $0x18] sm:$0xff]  ;;  %vm617_vm3 = vcmask 257024   ;;  %v5607_v18 = vmov 0   ;;  %vm1695_vm6 = vcmask 1042432  }
  0x2b   : > { %5400 = vmatpush.bf16.msra.mxu2 %v5329_v0  ;;  %v5324_v5 = vld [vmem:[%s7698_s1 + $0x10] sm:$0xff]  ;;  %v5323_v6 = vld [vmem:[%s7698_s1 + $0x8] sm:$0xff]  ;;  %v5322_v7 = vld [vmem:[%s7698_s1] sm:$0xff]  ;;  %618 = vst.msk [vmem:[#allocation2] sm:$0xf] %vm617_vm3, %v5607_v18  ;;  %vm1696_vm7 = vcmask 1046532  }
  0x2c   : > { %v5306_v8 = vld [vmem:[%s5743_s16] sm:$0xff]  ;;  %v5307_v9 = vld [vmem:[%s5743_s16 + $0x8] sm:$0xff]  ;;  %v5308_v10 = vld [vmem:[%s5743_s16 + $0x10] sm:$0xff]  ;;  %619 = vst.msk [vmem:[#allocation2 + $0x4] sm:$0xf] %vm617_vm3, %v5607_v18  ;;  %s5608_s8 = smov 64  }
  0x2d   : > { %v5309_v11 = vld [vmem:[%s5743_s16 + $0x18] sm:$0xff]  ;;  %v5310_v12 = vld [vmem:[%s5743_s16 + $0x20] sm:$0xff]  ;;  %v5311_v13 = vld [vmem:[%s5743_s16 + $0x28] sm:$0xff]  ;;  %vm678_vm4 = vsmask.f32 7938  ;;  %s5609_s20 = smov 96  }
  0x2e   : > { %497 = vmatpush.bf16.msra.mxu0 %v5328_v1  ;;  %5401 = vmatpush.bf16.msra.mxu1 %v5328_v1  ;;  %v5312_v14 = vld [vmem:[%s5743_s16 + $0x30] sm:$0xff]  ;;  %vm5782_vm2 = vmand %vm620_vm0, %vm628_vm1  ;;  %621 = vst.msk [vmem:[#allocation2 + $0x8] sm:$0x1] %vm620_vm0, %v5607_v18  ;;  %v680_v19 = vld [vmem:[#allocation2 + $0x14] sm:$0x1]  ;;  %s5610_s10 = smov 32  }
  0x2f   : > { %5402 = vmatpush.bf16.msra.mxu2 %v5328_v1  ;;  %v630_v16 = vld [vmem:[#allocation2 + $0xc] sm:$0x1]  ;;  %623 = vst.msk [vmem:[#allocation2 + $0xcc] sm:$0xf] %vm617_vm3, %v5607_v18  ;;  %vm5795_vm5 = vmand %vm620_vm0, %vm678_vm4  ;;  %v5313_v22 = vld [vmem:[%s5743_s16 + $0x38] sm:$0xff]  ;;  %vm3699_vm15 = vcmask 261120  }
  0x30   : > { %v631_v17 = vsel %vm5782_vm2, 0, %v630_v16  ;;  %624 = vst.msk [vmem:[#allocation2 + $0xd0] sm:$0xf] %vm617_vm3, %v5607_v18  ;;  %v681_v21 = vsel %vm5795_vm5, 0, %v680_v19  ;;  %vm5809_vm8 = vmor %vm1695_vm6, %vm1696_vm7  ;;  %v633_v32 = vld [vmem:[#allocation2 + $0x18] sm:$0x1] }
  0x31   : > { %632 = vst [vmem:[#allocation2 + $0xc] sm:$0x1] %v631_v17  ;;  %v634_v35 = vsel %vm5782_vm2, 0, %v633_v32  ;;  %v5316_v38 = vld [vmem:[%s5743_s16 + $0x50] sm:$0xff]  ;;  %v683_v39 = vld [vmem:[#allocation2 + $0x20] sm:$0x1]  ;;  %vm5838_vm9 = vmand %vm617_vm3, %vm678_vm4 }
  0x32   : > { %498 = vmatpush.bf16.msra.mxu0 %v5327_v2  ;;  %5403 = vmatpush.bf16.msra.mxu1 %v5327_v2  ;;  %625 = vst.msk [vmem:[#allocation2 + $0xd4] sm:$0x1] %vm620_vm0, %v5607_v18  ;;  %v1631_v25 = vld [vmem:[#allocation2] sm:$0xe]  ;;  %v5824_v40 = vld [vmem:[%s7701_s4] ss:$0 sm:$0xff] }
  0x33   : > { %5404 = vmatpush.bf16.msra.mxu2 %v5327_v2  ;;  %682 = vst [vmem:[#allocation2 + $0x14] sm:$0x1] %v681_v21  ;;  %v5803_v23 = vld [vmem:[#allocation2 + $0x4] sm:$0xf]  ;;  %v4948_v27 = vrot.slane %v1631_v25, 9  ;;  %v684_v41 = vsel %vm5795_vm5, 0, %v683_v39 }
  0x34   : > { %v1700_v26 = vrot.slane %v5803_v23, 5  ;;  %635 = vst [vmem:[#allocation2 + $0x18] sm:$0x1] %v634_v35  ;;  %v5314_v42 = vld [vmem:[%s5743_s16 + $0x40] sm:$0xff]  ;;  %v5395_v48 = vld [vmem:[%s7699_s2 + $0x88] sm:$0xff]  ;;  %v5317_v59 = vld [vmem:[%s5743_s16 + $0x58] sm:$0xff] }
  0x35   : > { %v5805_v24 = vld [vmem:[#allocation2 + $0x8] sm:$0x1]  ;;  %685 = vst [vmem:[#allocation2 + $0x20] sm:$0x1] %v684_v41  ;;  %v636_v49 = vld [vmem:[#allocation2 + $0x24] sm:$0x1]  ;;  %5415 = vmatpush.bf16.msra.mxu3 %v5395_v48 }
  0x36   : > { %499 = vmatpush.bf16.msra.mxu0 %v5326_v3  ;;  %5405 = vmatpush.bf16.msra.mxu1 %v5326_v3  ;;  %v1703_v28 = vrot.slane %v5805_v24, 5  ;;  %v1702_v30 = vrot.slane %v1700_v26, 4  ;;  %v1701_v31 = vsel %vm5809_vm8, %v4948_v27, %v1700_v26  ;;  %v637_v51 = vsel %vm5782_vm2, 0, %v636_v49  ;;  %v686_v62 = vld [vmem:[#allocation2 + $0x2c] sm:$0x1]  ;;  %v5315_v0 = vld [vmem:[%s5743_s16 + $0x48] sm:$0xff] }
  0x37   : > { %5406 = vmatpush.bf16.msra.mxu2 %v5326_v3  ;;  %v3171_v34 = vunpack.c.l.b16 %v1701_v31  ;;  %638 = vst [vmem:[#allocation2 + $0x24] sm:$0x1] %v637_v51  ;;  %vm760_vm10 = vsmask.f32 4368  ;;  %v687_v1 = vsel %vm5795_vm5, 0, %v686_v62  ;;  %v5318_v18 = vld [vmem:[%s5743_s16 + $0x60] sm:$0xff] }
  0x38   : > { %v1704_v33 = vsel %vm5809_vm8, %v1702_v30, %v1703_v28  ;;  %v1084_v56 = vld [vmem:[#allocation2 + $0xc] sm:$0xf]  ;;  %688 = vst [vmem:[#allocation2 + $0x2c] sm:$0x1] %v687_v1  ;;  %vm5850_vm11 = vmor %vm628_vm1, %vm760_vm10  ;;  %v639_v26 = vld [vmem:[#allocation2 + $0x30] sm:$0x1] }
  0x39   : > { %v3172_v36 = vunpack.c.l.b16 %v1704_v33  ;;  %v640_v31 = vsel %vm5782_vm2, 0, %v639_v26  ;;  %v1261_v39 = vshrl.u32 %v5803_v23, 16  ;;  %vm1244_vm12 = vsmask.f32 3328  ;;  %v689_v51 = vld [vmem:[#allocation2 + $0x38] sm:$0x1] }
  0x3a   : > { %500 = vmatpush.bf16.msra.mxu0 %v5325_v4  ;;  %5407 = vmatpush.bf16.msra.mxu1 %v5325_v4  ;;  %641 = vst [vmem:[#allocation2 + $0x30] sm:$0x1] %v640_v31  ;;  %vm1245_vm13 = vsmask.f32 7440  ;;  %v642_v31 = vld [vmem:[#allocation2 + $0x3c] sm:$0x1] }
  0x3b   : > { %5408 = vmatpush.bf16.msra.mxu2 %v5325_v4  ;;  %v3203_v37 = vpack.c.b16 %v3172_v36, %v3171_v34  ;;  %v1091_v32 = vld [vmem:[#allocation2 + $0x18] sm:$0xf]  ;;  %vm5899_vm14 = vmor %vm1244_vm12, %vm1245_vm13  ;;  %vm3748_vm0 = vcmask 523264   ;;  %vm3781_vm1 = vcmask 785408   ;;  %s4851_s29 = sshll.u32 %s5739_s22, 8  ;;  %s5398_s18 = sshll.u32 %s5674_s28, 8 }
  0x3c   : > { %v1095_v62 = vld [vmem:[#allocation2 + $0x20] sm:$0x1]  ;;  %s7547_s17 = scalar_lea.vmem [#allocation6], %s4851_s29  ;;  %s4766_s9 = scalar_lea.hbm %s7704_s7, %s5398_s18 }
  0x3d   : > { %3219 = vrot.lane.b32.xlu2 %v3203_v37, %s5608_s8  ;;  %s4769_s21 = sshll.u32 %s4766_s9, 4  ;;  %s5557_s29 = scalar_lea.hbm %s7704_s7, 512  ;;  %s4770_s21 = int_to_ptr.hbm [resolvable:$true] %s4769_s21 }
  0x3e   : > { %501 = vmatpush.bf16.msra.mxu0 %v5324_v5  ;;  %5409 = vmatpush.bf16.msra.mxu1 %v5324_v5  ;;  %s5551_s28 = sshra.s32 %s4770_s21, 4  ;;  %s5552_s28 = int_to_ptr.hbm [resolvable:$true] %s5551_s28 }
  0x3f   : > { %5410 = vmatpush.bf16.msra.mxu2 %v5324_v5  ;;  %s5553_s23 = scalar_lea.hbm %s5552_s28, 256  ;;  %p5558_p0 = scmp.lt.s32.totalorder %s5552_s28, %s7704_s7 }
  0x40   : > { %p5554_p6 = scmp.ne.s32.totalorder %s5552_s28, %s5553_s23  ;;  %p5559_p1 = scmp.lt.s32.totalorder %s5557_s29, %s5553_s23 }
  0x42   : > { %502 = vmatpush.bf16.msra.mxu0 %v5323_v6  ;;  %5411 = vmatpush.bf16.msra.mxu1 %v5323_v6  ;;  %p5555_p9 = pnand %p5554_p6, %p5703_p11  ;;  %p5560_p3 = por %p5559_p1, %p5558_p0 }
  0x43   : > { %5412 = vmatpush.bf16.msra.mxu2 %v5323_v6 }
  0x44   : > { %p5556_p13 = pneg %p5555_p9 }
  0x46   : > { %503 = vmatpush.bf16.msra.mxu0 %v5322_v7  ;;  %5413 = vmatpush.bf16.msra.mxu1 %v5322_v7  ;;  %p5561_p4 = pnand %p5560_p3, %p5556_p13 }
  0x47   : > { %5414 = vmatpush.bf16.msra.mxu2 %v5322_v7  ;;  %v1088_v7 = vld [vmem:[#allocation2 + $0x14] sm:$0x1] }
  0x49   : > { %504 = vmatmul.bf16.vlgmr.msra.gmra.mxu0 %v5306_v8  ;;  %554 = vmatmul.bf16.vlgmr.msra.gmra.mxu1 %v5316_v38 }
  0x4a   : > { %4338 = vmatpush.bf16.msrb.mxu0 %v5395_v48  ;;  %564 = vmatmul.bf16.vlgmr.msra.gmra.mxu2 %v5318_v18  ;;  %v1196_v18 = vld [vmem:[#allocation2] sm:$0xf] }
  0x59   : > { %509 = vmatmul.bf16.gmra.mxu0 %v5307_v9  ;;  %559 = vmatmul.bf16.gmra.mxu1 %v5317_v59 }
  0x69   : > { %514 = vmatmul.bf16.gmra.mxu0 %v5308_v10 }
  0x79   : > { %519 = vmatmul.bf16.gmra.mxu0 %v5309_v11 }
  0x89   : > { %524 = vmatmul.bf16.gmra.mxu0 %v5310_v12  ;;  %v5394_v12 = vld [vmem:[%s7699_s2 + $0x80] sm:$0xff] }
  0x8a   : > { %4339 = vmatpush.bf16.msrb.mxu0 %v5394_v12  ;;  %5416 = vmatpush.bf16.msra.mxu3 %v5394_v12 }
  0x99   : > { %529 = vmatmul.bf16.gmra.mxu0 %v5311_v13 }
  0xa9   : > { %534 = vmatmul.bf16.gmra.mxu0 %v5312_v14 }
  0xb9   : > { %539 = vmatmul.bf16.gmra.mxu0 %v5313_v22 }
  0xc6   : > { %v505_v43 = vpop.f32.mrf.mxu0 }
  0xc7   : > { %v506_v44 = vadd.f32 %v5824_v40, %v505_v43 }
  0xc9   : > { %v585_v45 = vmax.f32 %v506_v44, 0.0  ;;  %544 = vmatmul.bf16.gmra.mxu0 %v5314_v42 }
  0xcb   : > { %v728_v46 = vpack.c.bf16 %v585_v45, %v585_v45  ;;  %v1267_v45 = vshll.u32 %v5805_v24, 16 }
  0xcd   : > { %v763_v47 = vshrl.u32 %v728_v46, 16  ;;  %v766_v53 = vshll.u32 %v728_v46, 16 }
  0xce   : > { %v507_v50 = vpop.f32.mrf.mxu0 }
  0xcf   : > { %v765_v52 = vrot.slane %v763_v47, 7  ;;  %v508_v54 = vadd.f32 %v5824_v40, %v507_v50 }
  0xd1   : > { %v768_v57 = vor.u32 %v766_v53, %v765_v52  ;;  %v586_v58 = vmax.f32 %v508_v54, 0.0  ;;  %v769_v8 = vrot.slane %v765_v52, 4  ;;  %v690_v54 = vsel %vm5795_vm5, 0, %v689_v51 }
  0xd2   : > { %691 = vst [vmem:[#allocation2 + $0x38] sm:$0x1] %v690_v54  ;;  %v1251_v51 = vshll.u32 %v1196_v18, 16 }
  0xd3   : > { %v1085_v60 = vsel %vm5838_vm9, %v768_v57, %v1084_v56  ;;  %v729_v61 = vpack.c.bf16 %v586_v58, %v586_v58 }
  0xd4   : > { %1086 = vst [vmem:[#allocation2 + $0xc] sm:$0xf] %v1085_v60 }
  0xd5   : > { %v771_v63 = vshrl.u32 %v729_v61, 16  ;;  %v774_v4 = vshll.u32 %v729_v61, 16 }
  0xd6   : > { %v510_v2 = vpop.f32.mrf.mxu0 }
  0xd7   : > { %v773_v3 = vrot.slane %v771_v63, 7  ;;  %v511_v5 = vadd.f32 %v5824_v40, %v510_v2 }
  0xd9   : > { %v776_v9 = vor.u32 %v774_v4, %v773_v3  ;;  %v778_v10 = vrot.slane %v773_v3, 4  ;;  %v587_v11 = vmax.f32 %v511_v5, 0.0  ;;  %549 = vmatmul.bf16.gmra.mxu0 %v5315_v0 }
  0xdb   : > { %v777_v13 = vsel %vm5850_vm11, %v769_v8, %v776_v9  ;;  %v1089_v14 = vsel %vm5782_vm2, %v778_v10, %v1088_v7  ;;  %v730_v16 = vpack.c.bf16 %v587_v11, %v587_v11  ;;  %v1198_v17 = vld [vmem:[#allocation2 + $0xc] sm:$0xf] }
  0xdc   : > { %1087 = vst.msk [vmem:[#allocation2 + $0x10] sm:$0xf] %vm617_vm3, %v777_v13  ;;  %v1272_v19 = vshrl.u32 %v1198_v17, 16  ;;  %v1275_v21 = vshll.u32 %v1198_v17, 16  ;;  %v2242_v37 = vld [vmem:[#allocation2 + $0xc] sm:$0xe] }
  0xdd   : > { %1090 = vst [vmem:[#allocation2 + $0x14] sm:$0x1] %v1089_v14  ;;  %v780_v22 = vshrl.u32 %v730_v16, 16  ;;  %v783_v28 = vshll.u32 %v730_v16, 16  ;;  %v4964_v46 = vrot.slane %v2242_v37, 9  ;;  %v643_v37 = vsel %vm5782_vm2, 0, %v642_v31 }
  0xde   : > { %v512_v25 = vpop.f32.mrf.mxu0  ;;  %v1274_v33 = vrot.slane %v1272_v19, 4  ;;  %v1277_v34 = vrot.slane %v1275_v21, 5  ;;  %v5894_v19 = vld [vmem:[#allocation2 + $0xc] sm:$0xe]  ;;  %644 = vst [vmem:[#allocation2 + $0x3c] sm:$0x1] %v643_v37 }
  0xdf   : > { %v782_v27 = vrot.slane %v780_v22, 7  ;;  %v513_v30 = vadd.f32 %v5824_v40, %v512_v25 }
  0xe0   : > { %v1278_v47 = vor.u32 %v1277_v34, %v1274_v33 }
  0xe1   : > { %v785_v35 = vor.u32 %v783_v28, %v782_v27  ;;  %v588_v36 = vmax.f32 %v513_v30, 0.0  ;;  %v786_v52 = vrot.slane %v782_v27, 4 }
  0xe2   : > { %v5884_v1 = vrot.slane %v1278_v47, 4  ;;  %v4949_v47 = vrot.slane %v5894_v19, 9 }
  0xe3   : > { %v1092_v38 = vsel %vm5838_vm9, %v785_v35, %v1091_v32  ;;  %v731_v41 = vpack.c.bf16 %v588_v36, %v588_v36  ;;  %v5346_v42 = vld [vmem:[#allocation2 + $0xc] sm:$0xff] }
  0xe4   : > { %v5869_v43 = vld [vmem:[#allocation2 + $0x10] sm:$0xf]  ;;  %1093 = vst [vmem:[#allocation2 + $0x18] sm:$0xf] %v1092_v38  ;;  %3315 = vrot.lane.b32.xlu2 %v5346_v42, %s5609_s20  ;;  %v1842_v49 = vld [vmem:[#allocation2 + $0x14] sm:$0x1] }
  0xe5   : > { %v5871_v44 = vld [vmem:[#allocation2 + $0x10] sm:$0xf]  ;;  %v788_v48 = vshrl.u32 %v731_v41, 16  ;;  %v2308_v50 = vrot.slane %v5869_v43, 5  ;;  %v791_v58 = vshll.u32 %v731_v41, 16  ;;  %v2311_v0 = vrot.slane %v1842_v49, 5 }
  0xe6   : > { %v515_v53 = vpop.f32.mrf.mxu0  ;;  %v1281_v56 = vshll.u32 %v5871_v44, 16  ;;  %v5882_v61 = vld [vmem:[#allocation2 + $0x14] sm:$0x1]  ;;  %v1285_v2 = vshrl.u32 %v5871_v44, 16  ;;  %v1248_v38 = vshrl.u32 %v1196_v18, 16 }
  0xe7   : > { %v790_v57 = vrot.slane %v788_v48, 7  ;;  %v516_v59 = vadd.f32 %v5824_v40, %v515_v53  ;;  %v2309_v60 = vsel %vm5809_vm8, %v4964_v46, %v2308_v50  ;;  %v2310_v63 = vrot.slane %v2308_v50, 4  ;;  %v1098_v48 = vld [vmem:[#allocation2 + $0x24] sm:$0xf] }
  0xe8   : > { %v1283_v7 = vrot.slane %v1281_v56, 5  ;;  %v3395_v9 = vunpack.c.l.b16 %v2309_v60  ;;  %v1287_v10 = vrot.slane %v1285_v2, 4  ;;  %v1291_v11 = vshll.u32 %v5882_v61, 16 }
  0xe9   : > { %v793_v3 = vor.u32 %v791_v58, %v790_v57  ;;  %v795_v4 = vrot.slane %v790_v57, 4  ;;  %v589_v5 = vmax.f32 %v516_v59, 0.0  ;;  %v2312_v8 = vsel %vm5809_vm8, %v2310_v63, %v2311_v0  ;;  %v5319_v63 = vld [vmem:[%s5743_s16 + $0x68] sm:$0xff] }
  0xea   : > { %v3396_v16 = vunpack.c.l.b16 %v2312_v8  ;;  %v1288_v32 = vor.u32 %v1287_v10, %v1283_v7  ;;  %v1284_v46 = vsel %vm5899_vm14, %v5884_v1, %v1283_v7  ;;  %v1293_v59 = vrot.slane %v1291_v11, 5  ;;  %569 = vmatmul.bf16.gmra.mxu2 %v5319_v63 }
  0xeb   : > { %v794_v12 = vsel %vm5850_vm11, %v786_v52, %v793_v3  ;;  %v1096_v13 = vsel %vm5782_vm2, %v795_v4, %v1095_v62  ;;  %v732_v14 = vpack.c.bf16 %v589_v5, %v589_v5  ;;  %v2419_v17 = vld [vmem:[#allocation2 + $0x18] sm:$0xf]  ;;  %v1257_v52 = vshll.u32 %v5803_v23, 16 }
  0xec   : > { %1094 = vst.msk [vmem:[#allocation2 + $0x1c] sm:$0xf] %vm617_vm3, %v794_v12  ;;  %v2851_v21 = vld [vmem:[#allocation2 + $0x18] sm:$0xe]  ;;  %v2468_v25 = vshrl.u32 %v2419_v17, 16  ;;  %v2471_v26 = vshll.u32 %v2419_v17, 16  ;;  %v3427_v30 = vpack.c.b16 %v3396_v16, %v3395_v9  ;;  %v5923_v10 = vunpack.c.l.b16 %v1284_v46 }
  0xed   : > { %1097 = vst [vmem:[#allocation2 + $0x20] sm:$0x1] %v1096_v13  ;;  %v797_v27 = vshrl.u32 %v732_v14, 16  ;;  %v800_v28 = vshll.u32 %v732_v14, 16  ;;  %v2243_v34 = vld [vmem:[#allocation2 + $0x18] sm:$0xe] }
  0xee   : > { %v517_v33 = vpop.f32.mrf.mxu0  ;;  %v2470_v35 = vrot.slane %v2468_v25, 4  ;;  %v2473_v36 = vrot.slane %v2471_v26, 5  ;;  %3443 = vrot.lane.b32.xlu0 %v3427_v30, %s5610_s10  ;;  %v1289_v50 = vrot.slane %v1288_v32, 4  ;;  %v4980_v56 = vrot.slane %v2851_v21, 9 }
  0xef   : > { %v5905_v41 = vrot.slane %v797_v27, 7  ;;  %v518_v42 = vadd.f32 %v5824_v40, %v517_v33  ;;  %v4965_v57 = vrot.slane %v2243_v34, 9  ;;  %v1250_v60 = vrot.slane %v1248_v38, 4  ;;  %v1102_v33 = vld [vmem:[#allocation2 + $0x2c] sm:$0x1] }
  0xf0   : > { %v2474_v49 = vor.u32 %v2473_v36, %v2470_v35  ;;  %v1253_v62 = vrot.slane %v1251_v51, 5  ;;  %v1294_v9 = vsel %vm5899_vm14, %v1289_v50, %v1293_v59  ;;  %v5925_v11 = vrot.slane %v1257_v52, 5 }
  0xf1   : > { %v802_v53 = vor.u32 %v800_v28, %v5905_v41  ;;  %v590_v54 = vmax.f32 %v518_v42, 0.0  ;;  %v803_v58 = vrot.slane %v5905_v41, 4  ;;  %v1263_v17 = vrot.slane %v1261_v39, 4 }
  0xf2   : > { %v5919_v5 = vrot.slane %v2474_v49, 4  ;;  %v1254_v27 = vor.u32 %v1253_v62, %v1250_v60  ;;  %v5944_v59 = vunpack.c.l.b16 %v1294_v9  ;;  %v692_v60 = vld [vmem:[#allocation2 + $0x44] sm:$0x1] }
  0xf3   : > { %v1099_v0 = vsel %vm5838_vm9, %v802_v53, %v1098_v48  ;;  %v733_v1 = vpack.c.bf16 %v590_v54, %v590_v54  ;;  %v5362_v2 = vld [vmem:[#allocation2 + $0x18] sm:$0xff]  ;;  %v693_v24 = vsel %vm5795_vm5, 0, %v692_v60 }
  0xf4   : > { %v2420_v3 = vld [vmem:[#allocation2 + $0x1c] sm:$0xf]  ;;  %1100 = vst [vmem:[#allocation2 + $0x24] sm:$0xf] %v1099_v0  ;;  %v2451_v7 = vld [vmem:[#allocation2 + $0x20] sm:$0x1] }
  0xf5   : > { %v1813_v4 = vld [vmem:[#allocation2 + $0x1c] sm:$0xf]  ;;  %v2917_v8 = vrot.slane %v2420_v3, 5  ;;  %v805_v12 = vshrl.u32 %v733_v1, 16  ;;  %v808_v13 = vshll.u32 %v733_v1, 16  ;;  %v2920_v26 = vrot.slane %v2451_v7, 5 }
  0xf6   : > { %v1843_v14 = vld [vmem:[#allocation2 + $0x20] sm:$0x1]  ;;  %v2315_v16 = vrot.slane %v1813_v4, 5  ;;  %v520_v18 = vpop.f32.mrf.mxu0  ;;  %3539 = vrot.lane.b32.xlu0 %v5362_v2, %s5608_s8  ;;  %v2477_v35 = vshll.u32 %v2420_v3, 16  ;;  %v2481_v48 = vshrl.u32 %v2420_v3, 16  ;;  %v2487_v49 = vshll.u32 %v2451_v7, 16 }
  0xf7   : > { %v2918_v21 = vsel %vm5809_vm8, %v4980_v56, %v2917_v8  ;;  %v2919_v25 = vrot.slane %v2917_v8, 4  ;;  %v807_v28 = vrot.slane %v805_v12, 7  ;;  %v521_v30 = vadd.f32 %v5824_v40, %v520_v18  ;;  %694 = vst [vmem:[#allocation2 + $0x44] sm:$0x1] %v693_v24  ;;  %v645_v24 = vld [vmem:[#allocation2 + $0x48] sm:$0x1] }
  0xf8   : > { %v3651_v31 = vunpack.c.l.b16 %v2918_v21  ;;  %v2318_v32 = vrot.slane %v1843_v14, 5  ;;  %v2316_v23 = vsel %vm5809_vm8, %v4965_v57, %v2315_v16  ;;  %v2317_v39 = vrot.slane %v2315_v16, 4  ;;  %v1105_v16 = vld [vmem:[#allocation2 + $0x30] sm:$0xf] }
  0xf9   : > { %v2921_v34 = vsel %vm5809_vm8, %v2919_v25, %v2920_v26  ;;  %v810_v36 = vor.u32 %v808_v13, %v807_v28  ;;  %v812_v37 = vrot.slane %v807_v28, 4  ;;  %v591_v38 = vmax.f32 %v521_v30, 0.0 }
  0xfa   : > { %v3652_v41 = vunpack.c.l.b16 %v2921_v34  ;;  %v2319_v42 = vsel %vm5809_vm8, %v2317_v39, %v2318_v32  ;;  %v2479_v46 = vrot.slane %v2477_v35, 5  ;;  %v3397_v54 = vunpack.c.l.b16 %v2316_v23 }
  0xfb   : > { %v811_v50 = vsel %vm5850_vm11, %v803_v58, %v810_v36  ;;  %v1103_v51 = vsel %vm5782_vm2, %v812_v37, %v1102_v33  ;;  %v734_v52 = vpack.c.bf16 %v591_v38, %v591_v38  ;;  %v3398_v56 = vunpack.c.l.b16 %v2319_v42  ;;  %v2852_v8 = vld [vmem:[#allocation2 + $0x24] sm:$0xe] }
  0xfc   : > { %v3683_v53 = vpack.c.b16 %v3652_v41, %v3651_v31  ;;  %1101 = vst.msk [vmem:[#allocation2 + $0x28] sm:$0xf] %vm617_vm3, %v811_v50  ;;  %v2483_v57 = vrot.slane %v2481_v48, 4  ;;  %v2480_v58 = vsel %vm5899_vm14, %v5919_v5, %v2479_v46  ;;  %v1255_v0 = vrot.slane %v1254_v27, 4  ;;  %v2421_v5 = vld [vmem:[#allocation2 + $0x24] sm:$0xf] }
  0xfd   : > { %1104 = vst [vmem:[#allocation2 + $0x2c] sm:$0x1] %v1103_v51  ;;  %v814_v62 = vshrl.u32 %v734_v52, 16  ;;  %v817_v63 = vshll.u32 %v734_v52, 16  ;;  %v3428_v2 = vpack.c.b16 %v3398_v56, %v3397_v54  ;;  %v1264_v4 = vor.u32 %v1263_v17, %v5925_v11  ;;  %v2244_v36 = vld [vmem:[#allocation2 + $0x24] sm:$0xe] }
  0xfe   : > { %5260 = vmatmul.msk.bf16.vlgmr.msrb.gmra.mxu0 %vm3699_vm15, %v3683_v53  ;;  %v522_v1 = vpop.f32.mrf.mxu0  ;;  %v2484_v3 = vor.u32 %v2483_v57, %v2479_v46  ;;  %v1269_v7 = vrot.slane %v1267_v45, 5  ;;  %v2489_v13 = vrot.slane %v2487_v49, 5  ;;  %v1260_v14 = vsel %vm5899_vm14, %v1255_v0, %v5925_v11  ;;  %v5320_v52 = vld [vmem:[%s5743_s16 + $0x70] sm:$0xff] }
  0xff   : > { %v5953_v9 = vrot.slane %v814_v62, 7  ;;  %v523_v12 = vadd.f32 %v5824_v40, %v522_v1  ;;  %3445 = vrot.lane.b32.xlu0 %v3428_v2, %s5610_s10  ;;  %v3571_v21 = vunpack.c.l.b16 %v2480_v58  ;;  %v1265_v17 = vrot.slane %v1264_v4, 4  ;;  %574 = vmatmul.bf16.gmra.mxu2 %v5320_v52  ;;  %v1109_v58 = vld [vmem:[#allocation2 + $0x38] sm:$0x1] }
 0x100   : > { %v2485_v18 = vrot.slane %v2484_v3, 4  ;;  %v5963_v26 = vunpack.c.l.b16 %v1260_v14  ;;  %v4981_v27 = vrot.slane %v2852_v8, 9  ;;  %v2492_v31 = vshrl.u32 %v2421_v5, 16 }
 0x101   : > { %v819_v45 = vor.u32 %v817_v63, %v5953_v9  ;;  %v592_v25 = vmax.f32 %v523_v12, 0.0  ;;  %v820_v28 = vrot.slane %v5953_v9, 4  ;;  %v1270_v30 = vsel %vm5899_vm14, %v1265_v17, %v1269_v7 }
 0x102   : > { %v2490_v11 = vsel %vm5899_vm14, %v2485_v18, %v2489_v13  ;;  %v5972_v23 = vunpack.c.l.b16 %v1270_v30  ;;  %v3124_v37 = vpack.c.b16 %v5944_v59, %v5923_v10  ;;  %v2495_v42 = vshll.u32 %v2421_v5, 16 }
 0x103   : > { %v1106_v32 = vsel %vm5838_vm9, %v819_v45, %v1105_v16  ;;  %v735_v33 = vpack.c.bf16 %v592_v25, %v592_v25  ;;  %v3572_v34 = vunpack.c.l.b16 %v2490_v11  ;;  %v5974_v39 = vld [vmem:[#allocation2 + $0x28] sm:$0xf]  ;;  %v4966_v57 = vrot.slane %v2244_v36, 9  ;;  %v1200_v45 = vld [vmem:[#allocation2 + $0x18] sm:$0xf] }
 0x104   : > { %v1815_v35 = vld [vmem:[#allocation2 + $0x28] sm:$0xf]  ;;  %1107 = vst [vmem:[#allocation2 + $0x30] sm:$0xf] %v1106_v32  ;;  %v5978_v38 = vld [vmem:[#allocation2 + $0x2c] sm:$0x1]  ;;  %v3123_v50 = vpack.c.b16 %v5972_v23, %v5963_v26 }
 0x105   : > { %v2924_v41 = vrot.slane %v5974_v39, 5  ;;  %v822_v46 = vshrl.u32 %v735_v33, 16  ;;  %v825_v48 = vshll.u32 %v735_v33, 16  ;;  %v3603_v49 = vpack.c.b16 %v3572_v34, %v3571_v21  ;;  %v1844_v51 = vld [vmem:[#allocation2 + $0x2c] sm:$0x1] }
 0x106   : > { %v525_v53 = vpop.f32.mrf.mxu0  ;;  %v2927_v10 = vrot.slane %v5978_v38, 5  ;;  %v2322_v63 = vrot.slane %v1815_v35, 5  ;;  %v2325_v1 = vrot.slane %v1844_v51, 5  ;;  %v2494_v2 = vrot.slane %v2492_v31, 4  ;;  %v6009_v36 = vld [vmem:[#allocation2 + $0x1c] sm:$0xf] }
 0x107   : > { %v2925_v54 = vsel %vm5809_vm8, %v4981_v27, %v2924_v41  ;;  %v2926_v56 = vrot.slane %v2924_v41, 4  ;;  %v824_v59 = vrot.slane %v822_v46, 7  ;;  %3619 = vrot.lane.b32.xlu1 %v3603_v49, %s5609_s20  ;;  %v526_v60 = vadd.f32 %v5824_v40, %v525_v53  ;;  %3141 = vrot.lane.b32.xlu0 %v3124_v37, %s5610_s10  ;;  %v1112_v49 = vld [vmem:[#allocation2 + $0x3c] sm:$0xf] }
 0x108   : > { %v3653_v62 = vunpack.c.l.b16 %v2925_v54  ;;  %v2497_v3 = vrot.slane %v2495_v42, 5  ;;  %v2323_v12 = vsel %vm5809_vm8, %v4966_v57, %v2322_v63  ;;  %v2324_v13 = vrot.slane %v2322_v63, 4 }
 0x109   : > { %v2928_v0 = vsel %vm5809_vm8, %v2926_v56, %v2927_v10  ;;  %v827_v4 = vor.u32 %v825_v48, %v824_v59  ;;  %v829_v7 = vrot.slane %v824_v59, 4  ;;  %v593_v8 = vmax.f32 %v526_v60, 0.0  ;;  %v6015_v48 = vld [vmem:[#allocation2 + $0x20] sm:$0x1] }
 0x10a   : > { %v3654_v9 = vunpack.c.l.b16 %v2928_v0  ;;  %v2498_v14 = vor.u32 %v2497_v3, %v2494_v2  ;;  %v2501_v5 = vshll.u32 %v5974_v39, 16  ;;  %v2326_v25 = vsel %vm5809_vm8, %v2324_v13, %v2325_v1 }
 0x10b   : > { %v828_v16 = vsel %vm5850_vm11, %v820_v28, %v827_v4  ;;  %v1110_v18 = vsel %vm5782_vm2, %v829_v7, %v1109_v58  ;;  %v736_v21 = vpack.c.bf16 %v593_v8, %v593_v8  ;;  %v3399_v26 = vunpack.c.l.b16 %v2323_v12  ;;  %v5363_v12 = vld [vmem:[#allocation2 + $0x24] sm:$0xff] }
 0x10c   : > { %v3684_v17 = vpack.c.b16 %v3654_v9, %v3653_v62  ;;  %1108 = vst.msk [vmem:[#allocation2 + $0x34] sm:$0xf] %vm617_vm3, %v828_v16  ;;  %v2499_v27 = vrot.slane %v2498_v14, 4  ;;  %v2503_v11 = vrot.slane %v2501_v5, 5  ;;  %v3400_v28 = vunpack.c.l.b16 %v2326_v25  ;;  %v2853_v5 = vld [vmem:[#allocation2 + $0x30] sm:$0xe] }
 0x10d   : > { %1111 = vst [vmem:[#allocation2 + $0x38] sm:$0x1] %v1110_v18  ;;  %v831_v30 = vshrl.u32 %v736_v21, 16  ;;  %v834_v31 = vshll.u32 %v736_v21, 16  ;;  %v2505_v32 = vshrl.u32 %v5974_v39, 16  ;;  %v2511_v23 = vshll.u32 %v5978_v38, 16 }
 0x10e   : > { %5261 = vmatmul.msk.bf16.gmra.mxu0 %vm3699_vm15, %v3684_v17  ;;  %v527_v33 = vpop.f32.mrf.mxu0  ;;  %v2504_v34 = vsel %vm5899_vm14, %v2499_v27, %v2503_v11  ;;  %v646_v35 = vsel %vm5782_vm2, 0, %v645_v24  ;;  %v1296_v37 = vshrl.u32 %v1200_v45, 16  ;;  %v3429_v46 = vpack.c.b16 %v3400_v28, %v3399_v26 }
 0x10f   : > { %v6011_v41 = vrot.slane %v831_v30, 7  ;;  %3139 = vrot.lane.b32.xlu1 %v3123_v50, %s5610_s10  ;;  %v528_v42 = vadd.f32 %v5824_v40, %v527_v33  ;;  %v2507_v39 = vrot.slane %v2505_v32, 4  ;;  %647 = vst [vmem:[#allocation2 + $0x48] sm:$0x1] %v646_v35  ;;  %v2513_v51 = vrot.slane %v2511_v23, 5 }
 0x110   : > { %v3573_v38 = vunpack.c.l.b16 %v2504_v34  ;;  %v1298_v52 = vrot.slane %v1296_v37, 4  ;;  %v1299_v53 = vshll.u32 %v1200_v45, 16  ;;  %3447 = vrot.lane.b32.xlu0 %v3429_v46, %s5610_s10  ;;  %v1305_v59 = vshll.u32 %v6009_v36, 16  ;;  %v695_v35 = vld [vmem:[#allocation2 + $0x50] sm:$0x1] }
 0x111   : > { %v836_v54 = vor.u32 %v834_v31, %v6011_v41  ;;  %v837_v56 = vrot.slane %v6011_v41, 4  ;;  %v594_v10 = vmax.f32 %v528_v42, 0.0  ;;  %v2508_v50 = vor.u32 %v2507_v39, %v2503_v11  ;;  %v5321_v37 = vld [vmem:[%s5743_s16 + $0x78] sm:$0xff] }
 0x112   : > { %v1301_v57 = vrot.slane %v1299_v53, 5  ;;  %v1309_v60 = vshrl.u32 %v6009_v36, 16  ;;  %v1315_v62 = vshll.u32 %v6015_v48, 16  ;;  %v1707_v1 = vrot.slane %v5871_v44, 5  ;;  %v2423_v53 = vld [vmem:[#allocation2 + $0x30] sm:$0xf]  ;;  %579 = vmatmul.bf16.gmra.mxu2 %v5321_v37 }
 0x113   : > { %v1113_v63 = vsel %vm5838_vm9, %v836_v54, %v1112_v49  ;;  %v737_v58 = vpack.c.bf16 %v594_v10, %v594_v10  ;;  %v2509_v0 = vrot.slane %v2508_v50, 4  ;;  %v1307_v3 = vrot.slane %v1305_v59, 5  ;;  %v6035_v27 = vld [vmem:[#allocation2 + $0x34] sm:$0xf] }
 0x114   : > { %1114 = vst [vmem:[#allocation2 + $0x3c] sm:$0xf] %v1113_v63  ;;  %v1302_v2 = vor.u32 %v1301_v57, %v1298_v52  ;;  %v1311_v4 = vrot.slane %v1309_v60, 4  ;;  %v1317_v7 = vrot.slane %v1315_v62, 5  ;;  %v1708_v14 = vsel %vm5809_vm8, %v4949_v47, %v1707_v1  ;;  %v6037_v19 = vld [vmem:[#allocation2 + $0x38] sm:$0x1] }
 0x115   : > { %v839_v8 = vshrl.u32 %v737_v58, 16  ;;  %v842_v9 = vshll.u32 %v737_v58, 16  ;;  %v2514_v13 = vsel %vm5899_vm14, %v2509_v0, %v2513_v51  ;;  %v1709_v17 = vrot.slane %v1707_v1, 4  ;;  %v1116_v47 = vld [vmem:[#allocation2 + $0x44] sm:$0x1] }
 0x116   : > { %v3574_v16 = vunpack.c.l.b16 %v2514_v13  ;;  %v530_v18 = vpop.f32.mrf.mxu0  ;;  %v1303_v44 = vrot.slane %v1302_v2, 4  ;;  %v1312_v21 = vor.u32 %v1311_v4, %v1307_v3  ;;  %v1710_v25 = vrot.slane %v5882_v61, 5  ;;  %v2245_v52 = vld [vmem:[#allocation2 + $0x30] sm:$0xe]  ;;  %v1817_v59 = vld [vmem:[#allocation2 + $0x34] sm:$0xf] }
 0x117   : > { %v841_v24 = vrot.slane %v839_v8, 7  ;;  %3541 = vrot.lane.b32.xlu1 %v5363_v12, %s5608_s8  ;;  %v531_v45 = vadd.f32 %v5824_v40, %v530_v18  ;;  %v3173_v26 = vunpack.c.l.b16 %v1708_v14  ;;  %v4982_v28 = vrot.slane %v2853_v5, 9  ;;  %v1845_v58 = vld [vmem:[#allocation2 + $0x38] sm:$0x1]  ;;  %v1119_v12 = vld [vmem:[#allocation2 + $0x48] sm:$0xf] }
 0x118   : > { %v3604_v11 = vpack.c.b16 %v3574_v16, %v3573_v38  ;;  %v1308_v30 = vsel %vm5899_vm14, %v1303_v44, %v1307_v3  ;;  %v1313_v31 = vrot.slane %v1312_v21, 4  ;;  %v1711_v41 = vsel %vm5809_vm8, %v1709_v17, %v1710_v25  ;;  %v5347_v4 = vld [vmem:[#allocation2 + $0x18] sm:$0xff] }
 0x119   : > { %v844_v32 = vor.u32 %v842_v9, %v841_v24  ;;  %v846_v33 = vrot.slane %v841_v24, 4  ;;  %v595_v34 = vmax.f32 %v531_v45, 0.0  ;;  %v3095_v23 = vunpack.c.l.b16 %v1308_v30 }
 0x11a   : > { %3621 = vrot.lane.b32.xlu2 %v3604_v11, %s5609_s20  ;;  %v1318_v61 = vsel %vm5899_vm14, %v1313_v31, %v1317_v7  ;;  %v2931_v42 = vrot.slane %v6035_v27, 5  ;;  %v2934_v46 = vrot.slane %v6037_v19, 5  ;;  %v3174_v54 = vunpack.c.l.b16 %v1711_v41 }
 0x11b   : > { %v845_v39 = vsel %vm5850_vm11, %v837_v56, %v844_v32  ;;  %v1117_v49 = vsel %vm5782_vm2, %v846_v33, %v1116_v47  ;;  %v738_v51 = vpack.c.bf16 %v595_v34, %v595_v34  ;;  %v3096_v38 = vunpack.c.l.b16 %v1318_v61 }
 0x11c   : > { %1115 = vst.msk [vmem:[#allocation2 + $0x40] sm:$0xf] %vm617_vm3, %v845_v39  ;;  %v2932_v10 = vsel %vm5809_vm8, %v4982_v28, %v2931_v42  ;;  %v2933_v50 = vrot.slane %v2931_v42, 4  ;;  %v696_v57 = vsel %vm5795_vm5, 0, %v695_v35  ;;  %v3204_v0 = vpack.c.b16 %v3174_v54, %v3173_v26  ;;  %v648_v28 = vld [vmem:[#allocation2 + $0x54] sm:$0x1] }
 0x11d   : > { %1118 = vst [vmem:[#allocation2 + $0x44] sm:$0x1] %v1117_v49  ;;  %v848_v56 = vshrl.u32 %v738_v51, 16  ;;  %v851_v60 = vshll.u32 %v738_v51, 16  ;;  %v3125_v62 = vpack.c.b16 %v3096_v38, %v3095_v23  ;;  %v3655_v63 = vunpack.c.l.b16 %v2932_v10  ;;  %v1202_v35 = vld [vmem:[#allocation2 + $0x24] sm:$0xf] }
 0x11e   : > { %v2935_v1 = vsel %vm5809_vm8, %v2933_v50, %v2934_v46  ;;  %v532_v2 = vpop.f32.mrf.mxu0  ;;  %697 = vst [vmem:[#allocation2 + $0x50] sm:$0x1] %v696_v57  ;;  %v4967_v9 = vrot.slane %v2245_v52, 9  ;;  %v2329_v13 = vrot.slane %v1817_v59, 5  ;;  %v2332_v14 = vrot.slane %v1845_v58, 5  ;;  %v5364_v38 = vld [vmem:[#allocation2 + $0x30] sm:$0xff] }
 0x11f   : > { %v6060_v3 = vrot.slane %v848_v56, 7  ;;  %3143 = vrot.lane.b32.xlu0 %v3125_v62, %s5610_s10  ;;  %v3656_v7 = vunpack.c.l.b16 %v2935_v1  ;;  %v533_v8 = vadd.f32 %v5824_v40, %v532_v2  ;;  %3221 = vrot.lane.b32.xlu1 %v3204_v0, %s5608_s8  ;;  %v2516_v5 = vshrl.u32 %v2423_v53, 16  ;;  %v6078_v46 = vld [vmem:[#allocation2 + $0x28] sm:$0xf]  ;;  %v6088_v1 = vld [vmem:[#allocation2 + $0x2c] sm:$0x1] }
 0x120   : > { %v2519_v16 = vshll.u32 %v2423_v53, 16  ;;  %v2330_v24 = vsel %vm5809_vm8, %v4967_v9, %v2329_v13  ;;  %v2331_v45 = vrot.slane %v2329_v13, 4  ;;  %v2525_v31 = vshll.u32 %v6035_v27, 16 }
 0x121   : > { %v853_v18 = vor.u32 %v851_v60, %v6060_v3  ;;  %v854_v44 = vrot.slane %v6060_v3, 4  ;;  %v3685_v21 = vpack.c.b16 %v3656_v7, %v3655_v63  ;;  %v596_v17 = vmax.f32 %v533_v8, 0.0 }
 0x122   : > { %3317 = vrot.lane.b32.xlu2 %v5347_v4, %s5609_s20  ;;  %v2518_v25 = vrot.slane %v2516_v5, 4  ;;  %v2521_v26 = vrot.slane %v2519_v16, 5  ;;  %v3401_v30 = vunpack.c.l.b16 %v2330_v24  ;;  %v2333_v32 = vsel %vm5809_vm8, %v2331_v45, %v2332_v14  ;;  %v2854_v14 = vld [vmem:[#allocation2 + $0x3c] sm:$0xe] }
 0x123   : > { %v1120_v47 = vsel %vm5838_vm9, %v853_v18, %v1119_v12  ;;  %5262 = vmatmul.msk.bf16.gmra.mxu0 %vm3699_vm15, %v3685_v21  ;;  %v739_v11 = vpack.c.bf16 %v596_v17, %v596_v17  ;;  %v2529_v34 = vshrl.u32 %v6035_v27, 16  ;;  %v2535_v23 = vshll.u32 %v6037_v19, 16  ;;  %v6099_v17 = vld [vmem:[#allocation2 + $0x40] sm:$0xf] }
 0x124   : > { %1121 = vst [vmem:[#allocation2 + $0x48] sm:$0xf] %v1120_v47  ;;  %v2522_v33 = vor.u32 %v2521_v26, %v2518_v25  ;;  %v3402_v41 = vunpack.c.l.b16 %v2333_v32  ;;  %v2527_v42 = vrot.slane %v2525_v31, 5  ;;  %v649_v53 = vsel %vm5782_vm2, 0, %v648_v28 }
 0x125   : > { %v856_v37 = vshrl.u32 %v739_v11, 16  ;;  %v859_v61 = vshll.u32 %v739_v11, 16  ;;  %v2531_v49 = vrot.slane %v2529_v34, 4  ;;  %v2537_v51 = vrot.slane %v2535_v23, 5  ;;  %650 = vst [vmem:[#allocation2 + $0x54] sm:$0x1] %v649_v53 }
 0x126   : > { %v2523_v39 = vrot.slane %v2522_v33, 4  ;;  %v535_v52 = vpop.f32.mrf.mxu0  ;;  %v3430_v10 = vpack.c.b16 %v3402_v41, %v3401_v30  ;;  %v1320_v19 = vshrl.u32 %v1202_v35, 16  ;;  %v1123_v50 = vld [vmem:[#allocation2 + $0x50] sm:$0x1]  ;;  %v1323_v56 = vshll.u32 %v1202_v35, 16  ;;  %v5393_v34 = vld [vmem:[%s7699_s2 + $0x78] sm:$0xff] }
 0x127   : > { %v858_v54 = vrot.slane %v856_v37, 7  ;;  %v536_v27 = vadd.f32 %v5824_v40, %v535_v52  ;;  %v2532_v59 = vor.u32 %v2531_v49, %v2527_v42  ;;  %3543 = vrot.lane.b32.xlu1 %v5364_v38, %s5608_s8  ;;  %v1329_v60 = vshll.u32 %v6078_v46, 16  ;;  %v1633_v40 = vld [vmem:[#allocation2 + $0x18] sm:$0xe]  ;;  %v698_v38 = vld [vmem:[#allocation2 + $0x5c] sm:$0x1]  ;;  %4243 = vmatpush.bf16.msrb.mxu2 %v5393_v34 }
 0x128   : > { %v2528_v57 = vsel %vm5899_vm14, %v2523_v39, %v2527_v42  ;;  %3449 = vrot.lane.b32.xlu0 %v3430_v10, %s5610_s10  ;;  %v1322_v3 = vrot.slane %v1320_v19, 4  ;;  %v1325_v4 = vrot.slane %v1323_v56, 5  ;;  %v1333_v13 = vshrl.u32 %v6078_v46, 16  ;;  %v1819_v56 = vld [vmem:[#allocation2 + $0x40] sm:$0xf] }
 0x129   : > { %v861_v62 = vor.u32 %v859_v61, %v858_v54  ;;  %v863_v63 = vrot.slane %v858_v54, 4  ;;  %v3575_v58 = vunpack.c.l.b16 %v2528_v57  ;;  %v597_v0 = vmax.f32 %v536_v27, 0.0  ;;  %v2246_v27 = vld [vmem:[#allocation2 + $0x3c] sm:$0xe] }
 0x12a   : > { %v2533_v2 = vrot.slane %v2532_v59, 4  ;;  %v1331_v7 = vrot.slane %v1329_v60, 5  ;;  %v1326_v16 = vor.u32 %v1325_v4, %v1322_v3  ;;  %v1339_v18 = vshll.u32 %v6088_v1, 16  ;;  %v1846_v60 = vld [vmem:[#allocation2 + $0x44] sm:$0x1] }
 0x12b   : > { %v862_v8 = vsel %vm5850_vm11, %v854_v44, %v861_v62  ;;  %v1124_v9 = vsel %vm5782_vm2, %v863_v63, %v1123_v50  ;;  %v740_v12 = vpack.c.bf16 %v597_v0, %v597_v0  ;;  %v4950_v21 = vrot.slane %v1633_v40, 9 }
 0x12c   : > { %1122 = vst.msk [vmem:[#allocation2 + $0x4c] sm:$0xf] %vm617_vm3, %v862_v8  ;;  %v2538_v5 = vsel %vm5899_vm14, %v2533_v2, %v2537_v51  ;;  %v1335_v25 = vrot.slane %v1333_v13, 4  ;;  %v1327_v26 = vrot.slane %v1326_v16, 4  ;;  %v1341_v47 = vrot.slane %v1339_v18, 5 }
 0x12d   : > { %1125 = vst [vmem:[#allocation2 + $0x50] sm:$0x1] %v1124_v9  ;;  %v3576_v44 = vunpack.c.l.b16 %v2538_v5  ;;  %v865_v24 = vshrl.u32 %v740_v12, 16  ;;  %v868_v45 = vshll.u32 %v740_v12, 16  ;;  %v1714_v11 = vrot.slane %v6009_v36, 5  ;;  %v5348_v5 = vld [vmem:[#allocation2 + $0x24] sm:$0xff] }
 0x12e   : > { %v1717_v30 = vrot.slane %v6015_v48, 5  ;;  %v1336_v32 = vor.u32 %v1335_v25, %v1331_v7  ;;  %v4983_v33 = vrot.slane %v2854_v14, 9  ;;  %v1126_v23 = vld [vmem:[#allocation2 + $0x54] sm:$0xf]  ;;  %v1332_v35 = vsel %vm5899_vm14, %v1327_v26, %v1331_v7  ;;  %v6112_v36 = vld [vmem:[#allocation2 + $0x44] sm:$0x1]  ;;  %v537_v51 = vpop.f32.mrf.mxu0 }
 0x12f   : > { %v3605_v31 = vpack.c.b16 %v3576_v44, %v3575_v58  ;;  %v6103_v28 = vrot.slane %v865_v24, 7  ;;  %v1715_v37 = vsel %vm5809_vm8, %v4950_v21, %v1714_v11  ;;  %v1716_v61 = vrot.slane %v1714_v11, 4  ;;  %v6130_v58 = vld [vmem:[%s7701_s4] ss:$0 sm:$0xff]  ;;  %v2425_v2 = vld [vmem:[#allocation2 + $0x3c] sm:$0xf] }
 0x130   : > { %v2938_v48 = vrot.slane %v6099_v17, 5  ;;  %v1868_v41 = vshll.u32 %v5869_v43, 16  ;;  %v1337_v39 = vrot.slane %v1336_v32, 4  ;;  %v3097_v49 = vunpack.c.l.b16 %v1332_v35  ;;  %v1204_v35 = vld [vmem:[#allocation2 + $0x30] sm:$0xf] }
 0x131   : > { %3623 = vrot.lane.b32.xlu2 %v3605_v31, %s5609_s20  ;;  %v870_v42 = vor.u32 %v868_v45, %v6103_v28  ;;  %v1718_v52 = vsel %vm5809_vm8, %v1716_v61, %v1717_v30  ;;  %v3175_v53 = vunpack.c.l.b16 %v1715_v37  ;;  %v2941_v59 = vrot.slane %v6112_v36, 5 }
 0x132   : > { %v2939_v54 = vsel %vm5809_vm8, %v4983_v33, %v2938_v48  ;;  %v2940_v10 = vrot.slane %v2938_v48, 4  ;;  %v1342_v50 = vsel %vm5899_vm14, %v1337_v39, %v1341_v47  ;;  %v3176_v57 = vunpack.c.l.b16 %v1718_v52 }
 0x133   : > { %v1127_v19 = vsel %vm5838_vm9, %v870_v42, %v1126_v23  ;;  %v3098_v62 = vunpack.c.l.b16 %v1342_v50  ;;  %v3657_v63 = vunpack.c.l.b16 %v2939_v54  ;;  %v538_v0 = vadd.f32 %v6130_v58, %v537_v51 }
 0x134   : > { %1128 = vst [vmem:[#allocation2 + $0x54] sm:$0xf] %v1127_v19  ;;  %v699_v40 = vsel %vm5795_vm5, 0, %v698_v38  ;;  %v1872_v3 = vshrl.u32 %v5869_v43, 16  ;;  %v871_v4 = vrot.slane %v6103_v28, 4  ;;  %v3205_v7 = vpack.c.b16 %v3176_v57, %v3175_v53  ;;  %v5392_v53 = vld [vmem:[%s7699_s2 + $0x70] sm:$0xff] }
 0x135   : > { %v2942_v8 = vsel %vm5809_vm8, %v2940_v10, %v2941_v59  ;;  %700 = vst [vmem:[#allocation2 + $0x5c] sm:$0x1] %v699_v40  ;;  %v3126_v9 = vpack.c.b16 %v3098_v62, %v3097_v49  ;;  %v598_v13 = vmax.f32 %v538_v0, 0.0  ;;  %v4968_v14 = vrot.slane %v2246_v27, 9  ;;  %v651_v28 = vld [vmem:[#allocation2 + $0x60] sm:$0x1]  ;;  %4244 = vmatpush.bf16.msrb.mxu2 %v5392_v53 }
 0x136   : > { %v3658_v12 = vunpack.c.l.b16 %v2942_v8  ;;  %3223 = vrot.lane.b32.xlu1 %v3205_v7, %s5608_s8  ;;  %v2336_v16 = vrot.slane %v1819_v56, 5  ;;  %v2339_v18 = vrot.slane %v1846_v60, 5  ;;  %v2540_v21 = vshrl.u32 %v2425_v2, 16  ;;  %v540_v42 = vpop.f32.mrf.mxu0  ;;  %v5365_v19 = vld [vmem:[#allocation2 + $0x3c] sm:$0xff]  ;;  %v6156_v60 = vld [vmem:[#allocation2 + $0x34] sm:$0xf] }
 0x137   : > { %v2543_v44 = vshll.u32 %v2425_v2, 16  ;;  %3145 = vrot.lane.b32.xlu0 %v3126_v9, %s5610_s10  ;;  %v741_v45 = vpack.c.bf16 %v598_v13, %v598_v13  ;;  %v2549_v25 = vshll.u32 %v6099_v17, 16  ;;  %v2553_v26 = vshrl.u32 %v6099_v17, 16  ;;  %v6161_v0 = vld [vmem:[#allocation2 + $0x38] sm:$0x1] }
 0x138   : > { %v3686_v24 = vpack.c.b16 %v3658_v12, %v3657_v63  ;;  %v2337_v47 = vsel %vm5809_vm8, %v4968_v14, %v2336_v16  ;;  %v2338_v11 = vrot.slane %v2336_v16, 4  ;;  %v2542_v30 = vrot.slane %v2540_v21, 4  ;;  %v1634_v13 = vld [vmem:[#allocation2 + $0x24] sm:$0xe]  ;;  %v2855_v14 = vld [vmem:[#allocation2 + $0x48] sm:$0xe] }
 0x139   : > { %3319 = vrot.lane.b32.xlu2 %v5348_v5, %s5609_s20  ;;  %v2545_v31 = vrot.slane %v2543_v44, 5  ;;  %v873_v32 = vshrl.u32 %v741_v45, 16  ;;  %v876_v33 = vshll.u32 %v741_v45, 16  ;;  %v3403_v34 = vunpack.c.l.b16 %v2337_v47 }
 0x13a   : > { %5263 = vmatmul.msk.bf16.gmra.mxu0 %vm3699_vm15, %v3686_v24  ;;  %v2551_v23 = vrot.slane %v2549_v25, 5  ;;  %v2340_v37 = vsel %vm5809_vm8, %v2338_v11, %v2339_v18  ;;  %v2555_v61 = vrot.slane %v2553_v26, 4  ;;  %v2559_v48 = vshll.u32 %v6112_v36, 16 }
 0x13b   : > { %v2546_v17 = vor.u32 %v2545_v31, %v2542_v30  ;;  %v875_v39 = vrot.slane %v873_v32, 7  ;;  %v3404_v51 = vunpack.c.l.b16 %v2340_v37  ;;  %v541_v38 = vadd.f32 %v6130_v58, %v540_v42  ;;  %v6174_v30 = vld [vmem:[#allocation2 + $0x4c] sm:$0xf]  ;;  %v6185_v42 = vld [vmem:[#allocation2 + $0x14] sm:$0x1] }
 0x13c   : > { %v1130_v49 = vld [vmem:[#allocation2 + $0x5c] sm:$0x1]  ;;  %v652_v52 = vsel %vm5782_vm2, 0, %v651_v28  ;;  %v2556_v10 = vor.u32 %v2555_v61, %v2551_v23  ;;  %v2561_v27 = vrot.slane %v2559_v48, 5  ;;  %v1344_v50 = vshrl.u32 %v1204_v35, 16  ;;  %v5391_v48 = vld [vmem:[%s7699_s2 + $0x68] sm:$0xff] }
 0x13d   : > { %v2547_v54 = vrot.slane %v2546_v17, 4  ;;  %653 = vst [vmem:[#allocation2 + $0x60] sm:$0x1] %v652_v52  ;;  %v878_v36 = vor.u32 %v876_v33, %v875_v39  ;;  %v880_v57 = vrot.slane %v875_v39, 4  ;;  %v3431_v59 = vpack.c.b16 %v3404_v51, %v3403_v34  ;;  %v6179_v34 = vld [vmem:[#allocation2 + $0x50] sm:$0x1]  ;;  %4245 = vmatpush.bf16.msrb.mxu2 %v5391_v48 }
 0x13e   : > { %v599_v56 = vmax.f32 %v541_v38, 0.0  ;;  %v2557_v63 = vrot.slane %v2556_v10, 4  ;;  %3545 = vrot.lane.b32.xlu1 %v5365_v19, %s5608_s8  ;;  %v1346_v40 = vrot.slane %v1344_v50, 4  ;;  %v1347_v2 = vshll.u32 %v1204_v35, 16  ;;  %v701_v10 = vld [vmem:[#allocation2 + $0x68] sm:$0x1] }
 0x13f   : > { %v2552_v62 = vsel %vm5899_vm14, %v2547_v54, %v2551_v23  ;;  %v879_v7 = vsel %vm5850_vm11, %v871_v4, %v878_v36  ;;  %v1131_v8 = vsel %vm5782_vm2, %v880_v57, %v1130_v49  ;;  %3451 = vrot.lane.b32.xlu0 %v3431_v59, %s5610_s10  ;;  %v1353_v18 = vshll.u32 %v6156_v60, 16  ;;  %v542_v54 = vpop.f32.mrf.mxu0  ;;  %v1821_v57 = vld [vmem:[#allocation2 + $0x4c] sm:$0xf] }
 0x140   : > { %v3577_v9 = vunpack.c.l.b16 %v2552_v62  ;;  %v742_v12 = vpack.c.bf16 %v599_v56, %v599_v56  ;;  %1129 = vst.msk [vmem:[#allocation2 + $0x58] sm:$0xf] %vm617_vm3, %v879_v7  ;;  %v2562_v5 = vsel %vm5899_vm14, %v2557_v63, %v2561_v27  ;;  %v1349_v16 = vrot.slane %v1347_v2, 5 }
 0x141   : > { %v1357_v21 = vshrl.u32 %v6156_v60, 16  ;;  %1132 = vst [vmem:[#allocation2 + $0x5c] sm:$0x1] %v1131_v8  ;;  %v3578_v4 = vunpack.c.l.b16 %v2562_v5  ;;  %v1363_v45 = vshll.u32 %v6161_v0, 16  ;;  %v1355_v26 = vrot.slane %v1353_v18, 5 }
 0x142   : > { %v882_v44 = vshrl.u32 %v742_v12, 16  ;;  %v885_v24 = vshll.u32 %v742_v12, 16  ;;  %v1350_v25 = vor.u32 %v1349_v16, %v1346_v40  ;;  %v4951_v11 = vrot.slane %v1634_v13, 9  ;;  %v2247_v40 = vld [vmem:[#allocation2 + $0x48] sm:$0xe] }
 0x143   : > { %v1359_v47 = vrot.slane %v1357_v21, 4  ;;  %v3606_v31 = vpack.c.b16 %v3578_v4, %v3577_v9  ;;  %v1365_v32 = vrot.slane %v1363_v45, 5  ;;  %v1721_v33 = vrot.slane %v6078_v46, 5  ;;  %v1847_v12 = vld [vmem:[#allocation2 + $0x50] sm:$0x1] }
 0x144   : > { %v6176_v28 = vrot.slane %v882_v44, 7  ;;  %v1133_v23 = vld [vmem:[#allocation2 + $0x60] sm:$0xf]  ;;  %v1351_v35 = vrot.slane %v1350_v25, 4  ;;  %v1724_v17 = vrot.slane %v6088_v1, 5  ;;  %v4984_v61 = vrot.slane %v2855_v14, 9 }
 0x145   : > { %v1360_v37 = vor.u32 %v1359_v47, %v1355_v26  ;;  %v1878_v39 = vshll.u32 %v6185_v42, 16  ;;  %3625 = vrot.lane.b32.xlu2 %v3606_v31, %s5609_s20  ;;  %v1722_v49 = vsel %vm5809_vm8, %v4951_v11, %v1721_v33  ;;  %v1723_v51 = vrot.slane %v1721_v33, 4  ;;  %v2427_v13 = vld [vmem:[#allocation2 + $0x48] sm:$0xf]  ;;  %v5349_v4 = vld [vmem:[#allocation2 + $0x30] sm:$0xff] }
 0x146   : > { %v887_v46 = vor.u32 %v885_v24, %v6176_v28  ;;  %v1356_v1 = vsel %vm5899_vm14, %v1351_v35, %v1355_v26  ;;  %v3177_v52 = vunpack.c.l.b16 %v1722_v49  ;;  %v2945_v53 = vrot.slane %v6174_v30, 5 }
 0x147   : > { %v1361_v38 = vrot.slane %v1360_v37, 4  ;;  %v3099_v19 = vunpack.c.l.b16 %v1356_v1  ;;  %v1725_v50 = vsel %vm5809_vm8, %v1723_v51, %v1724_v17  ;;  %v2948_v36 = vrot.slane %v6179_v34, 5  ;;  %v654_v17 = vld [vmem:[#allocation2 + $0x6c] sm:$0x1]  ;;  %v1206_v51 = vld [vmem:[#allocation2 + $0x3c] sm:$0xf] }
 0x148   : > { %v1134_v27 = vsel %vm5838_vm9, %v887_v46, %v1133_v23  ;;  %v3178_v56 = vunpack.c.l.b16 %v1725_v50  ;;  %v2946_v62 = vsel %vm5809_vm8, %v4984_v61, %v2945_v53  ;;  %v2947_v63 = vrot.slane %v2945_v53, 4  ;;  %v545_v53 = vpop.f32.mrf.mxu0 }
 0x149   : > { %1135 = vst [vmem:[#allocation2 + $0x60] sm:$0xf] %v1134_v27  ;;  %v1366_v59 = vsel %vm5899_vm14, %v1361_v38, %v1365_v32  ;;  %v3659_v7 = vunpack.c.l.b16 %v2946_v62  ;;  %v543_v8 = vadd.f32 %v6130_v58, %v542_v54  ;;  %v702_v9 = vsel %vm5795_vm5, 0, %v701_v10  ;;  %v5366_v62 = vld [vmem:[#allocation2 + $0x48] sm:$0xff] }
 0x14a   : > { %v3100_v2 = vunpack.c.l.b16 %v1366_v59  ;;  %v6209_v14 = vrot.slane %v1872_v3, 4  ;;  %v888_v5 = vrot.slane %v6176_v28, 4  ;;  %v3206_v16 = vpack.c.b16 %v3178_v56, %v3177_v52  ;;  %703 = vst [vmem:[#allocation2 + $0x68] sm:$0x1] %v702_v9 }
 0x14b   : > { %v2949_v18 = vsel %vm5809_vm8, %v2947_v63, %v2948_v36  ;;  %v600_v24 = vmax.f32 %v543_v8, 0.0  ;;  %v4969_v45 = vrot.slane %v2247_v40, 9  ;;  %v2343_v25 = vrot.slane %v1821_v57, 5  ;;  %v5390_v36 = vld [vmem:[%s7699_s2 + $0x60] sm:$0xff] }
 0x14c   : > { %v3127_v21 = vpack.c.b16 %v3100_v2, %v3099_v19  ;;  %v3660_v44 = vunpack.c.l.b16 %v2949_v18  ;;  %3225 = vrot.lane.b32.xlu1 %v3206_v16, %s5608_s8  ;;  %v2346_v26 = vrot.slane %v1847_v12, 5  ;;  %v2564_v47 = vshrl.u32 %v2427_v13, 16  ;;  %v6231_v8 = vld [vmem:[#allocation2 + $0x40] sm:$0xf]  ;;  %4246 = vmatpush.bf16.msrb.mxu2 %v5390_v36 }
 0x14d   : > { %v2567_v11 = vshll.u32 %v2427_v13, 16  ;;  %3321 = vrot.lane.b32.xlu2 %v5349_v4, %s5609_s20  ;;  %v743_v31 = vpack.c.bf16 %v600_v24, %v600_v24  ;;  %v2573_v28 = vshll.u32 %v6174_v30, 16  ;;  %v2577_v32 = vshrl.u32 %v6174_v30, 16  ;;  %v6236_v13 = vld [vmem:[#allocation2 + $0x44] sm:$0x1] }
 0x14e   : > { %3147 = vrot.lane.b32.xlu0 %v3127_v21, %s5610_s10  ;;  %v3687_v3 = vpack.c.b16 %v3660_v44, %v3659_v7  ;;  %v2344_v33 = vsel %vm5809_vm8, %v4969_v45, %v2343_v25  ;;  %v2345_v23 = vrot.slane %v2343_v25, 4  ;;  %v2566_v35 = vrot.slane %v2564_v47, 4  ;;  %v1635_v45 = vld [vmem:[#allocation2 + $0x30] sm:$0xe]  ;;  %v2856_v25 = vld [vmem:[#allocation2 + $0x54] sm:$0xe] }
 0x14f   : > { %v2569_v37 = vrot.slane %v2567_v11, 5  ;;  %v890_v61 = vshrl.u32 %v743_v31, 16  ;;  %v893_v48 = vshll.u32 %v743_v31, 16  ;;  %v3405_v46 = vunpack.c.l.b16 %v2344_v33 }
 0x150   : > { %5264 = vmatmul.msk.bf16.gmra.mxu0 %vm3699_vm15, %v3687_v3  ;;  %v2575_v49 = vrot.slane %v2573_v28, 5  ;;  %v2347_v1 = vsel %vm5809_vm8, %v2345_v23, %v2346_v26  ;;  %v2579_v52 = vrot.slane %v2577_v32, 4  ;;  %v2583_v30 = vshll.u32 %v6179_v34, 16 }
 0x151   : > { %v2570_v38 = vor.u32 %v2569_v37, %v2566_v35  ;;  %v892_v54 = vrot.slane %v890_v61, 7  ;;  %v1137_v10 = vld [vmem:[#allocation2 + $0x68] sm:$0x1]  ;;  %v3406_v27 = vunpack.c.l.b16 %v2347_v1  ;;  %v546_v19 = vadd.f32 %v6130_v58, %v545_v53 }
 0x152   : > { %v655_v50 = vsel %vm5782_vm2, 0, %v654_v17  ;;  %v2580_v59 = vor.u32 %v2579_v52, %v2575_v49  ;;  %v2585_v56 = vrot.slane %v2583_v30, 5  ;;  %v1368_v63 = vshrl.u32 %v1206_v51, 16  ;;  %v6249_v17 = vld [vmem:[#allocation2 + $0x58] sm:$0xf] }
 0x153   : > { %v2571_v57 = vrot.slane %v2570_v38, 4  ;;  %656 = vst [vmem:[#allocation2 + $0x6c] sm:$0x1] %v655_v50  ;;  %v895_v34 = vor.u32 %v893_v48, %v892_v54  ;;  %v897_v40 = vrot.slane %v892_v54, 4  ;;  %v3432_v2 = vpack.c.b16 %v3406_v27, %v3405_v46  ;;  %v5389_v54 = vld [vmem:[%s7699_s2 + $0x58] sm:$0xff] }
 0x154   : > { %v601_v7 = vmax.f32 %v546_v19, 0.0  ;;  %v2581_v12 = vrot.slane %v2580_v59, 4  ;;  %3547 = vrot.lane.b32.xlu1 %v5366_v62, %s5608_s8  ;;  %v1370_v16 = vrot.slane %v1368_v63, 4  ;;  %v1371_v18 = vshll.u32 %v1206_v51, 16  ;;  %v6254_v51 = vld [vmem:[#allocation2 + $0x5c] sm:$0x1]  ;;  %v547_v59 = vpop.f32.mrf.mxu0  ;;  %4247 = vmatpush.bf16.msrb.mxu2 %v5389_v54 }
 0x155   : > { %v2576_v9 = vsel %vm5899_vm14, %v2571_v57, %v2575_v49  ;;  %v896_v21 = vsel %vm5850_vm11, %v888_v5, %v895_v34  ;;  %v1138_v4 = vsel %vm5782_vm2, %v897_v40, %v1137_v10  ;;  %v1377_v11 = vshll.u32 %v6231_v8, 16  ;;  %v1823_v34 = vld [vmem:[#allocation2 + $0x58] sm:$0xf] }
 0x156   : > { %3453 = vrot.lane.b32.xlu0 %v3432_v2, %s5610_s10  ;;  %v3579_v44 = vunpack.c.l.b16 %v2576_v9  ;;  %v744_v24 = vpack.c.bf16 %v601_v7, %v601_v7  ;;  %1136 = vst.msk [vmem:[#allocation2 + $0x64] sm:$0xf] %vm617_vm3, %v896_v21  ;;  %v2586_v26 = vsel %vm5899_vm14, %v2581_v12, %v2585_v56  ;;  %v1373_v47 = vrot.slane %v1371_v18, 5  ;;  %v704_v56 = vld [vmem:[#allocation2 + $0x74] sm:$0x1]  ;;  %v5385_v54 = vld [vmem:[%s7699_s2 + $0x38] sm:$0xff] }
 0x157   : > { %v1381_v3 = vshrl.u32 %v6231_v8, 16  ;;  %1139 = vst [vmem:[#allocation2 + $0x68] sm:$0x1] %v1138_v4  ;;  %v3580_v5 = vunpack.c.l.b16 %v2586_v26  ;;  %v1387_v32 = vshll.u32 %v6236_v13, 16  ;;  %v1379_v23 = vrot.slane %v1377_v11, 5  ;;  %4154 = vmatpush.bf16.msrb.mxu1 %v5385_v54 }
 0x158   : > { %v899_v31 = vshrl.u32 %v744_v24, 16  ;;  %v902_v28 = vshll.u32 %v744_v24, 16  ;;  %v1374_v33 = vor.u32 %v1373_v47, %v1370_v16  ;;  %v4952_v37 = vrot.slane %v1635_v45, 9  ;;  %v2248_v12 = vld [vmem:[#allocation2 + $0x54] sm:$0xe] }
 0x159   : > { %v1383_v35 = vrot.slane %v1381_v3, 4  ;;  %v3607_v61 = vpack.c.b16 %v3580_v5, %v3579_v44  ;;  %v1389_v46 = vrot.slane %v1387_v32, 5  ;;  %v1728_v49 = vrot.slane %v6156_v60, 5  ;;  %v1848_v44 = vld [vmem:[#allocation2 + $0x5c] sm:$0x1] }
 0x15a   : > { %v6251_v48 = vrot.slane %v899_v31, 7  ;;  %v1140_v1 = vld [vmem:[#allocation2 + $0x6c] sm:$0xf]  ;;  %v1375_v38 = vrot.slane %v1374_v33, 4  ;;  %v1731_v30 = vrot.slane %v6161_v0, 5  ;;  %v4985_v53 = vrot.slane %v2856_v25, 9 }
 0x15b   : > { %v1384_v52 = vor.u32 %v1383_v35, %v1379_v23  ;;  %v6262_v10 = vrot.slane %v1878_v39, 5  ;;  %3627 = vrot.lane.b32.xlu2 %v3607_v61, %s5609_s20  ;;  %v1729_v27 = vsel %vm5809_vm8, %v4952_v37, %v1728_v49  ;;  %v1730_v19 = vrot.slane %v1728_v49, 4  ;;  %v2429_v24 = vld [vmem:[#allocation2 + $0x54] sm:$0xf]  ;;  %v6283_v45 = vld [vmem:[#allocation2 + $0x1c] sm:$0xf] }
 0x15c   : > { %v904_v60 = vor.u32 %v902_v28, %v6251_v48  ;;  %v1380_v0 = vsel %vm5899_vm14, %v1375_v38, %v1379_v23  ;;  %v3179_v36 = vunpack.c.l.b16 %v1729_v27  ;;  %v2952_v57 = vrot.slane %v6249_v17, 5  ;;  %v5350_v5 = vld [vmem:[#allocation2 + $0x3c] sm:$0xff] }
 0x15d   : > { %v1385_v50 = vrot.slane %v1384_v52, 4  ;;  %v3101_v39 = vunpack.c.l.b16 %v1380_v0  ;;  %v1732_v62 = vsel %vm5809_vm8, %v1730_v19, %v1731_v30  ;;  %v2955_v63 = vrot.slane %v6254_v51, 5 }
 0x15e   : > { %v1141_v42 = vsel %vm5838_vm9, %v904_v60, %v1140_v1  ;;  %v3180_v2 = vunpack.c.l.b16 %v1732_v62  ;;  %v2953_v7 = vsel %vm5809_vm8, %v4985_v53, %v2952_v57  ;;  %v2954_v9 = vrot.slane %v2952_v57, 4  ;;  %v657_v53 = vld [vmem:[#allocation2 + $0x78] sm:$0x1] }
 0x15f   : > { %1142 = vst [vmem:[#allocation2 + $0x6c] sm:$0xf] %v1141_v42  ;;  %v1390_v40 = vsel %vm5899_vm14, %v1385_v50, %v1389_v46  ;;  %v3661_v18 = vunpack.c.l.b16 %v2953_v7  ;;  %v548_v21 = vadd.f32 %v6130_v58, %v547_v59  ;;  %v705_v4 = vsel %vm5795_vm5, 0, %v704_v56  ;;  %v1208_v50 = vld [vmem:[#allocation2 + $0x48] sm:$0xf]  ;;  %v550_v56 = vpop.f32.mrf.mxu0 }
 0x160   : > { %v3102_v16 = vunpack.c.l.b16 %v1390_v40  ;;  %v1896_v25 = vshrl.u32 %v6283_v45, 16  ;;  %v905_v26 = vrot.slane %v6251_v48, 4  ;;  %v3207_v47 = vpack.c.b16 %v3180_v2, %v3179_v36  ;;  %706 = vst [vmem:[#allocation2 + $0x74] sm:$0x1] %v705_v4  ;;  %v6306_v4 = vld [vmem:[#allocation2 + $0x4c] sm:$0xf] }
 0x161   : > { %v2956_v11 = vsel %vm5809_vm8, %v2954_v9, %v2955_v63  ;;  %v602_v28 = vmax.f32 %v548_v21, 0.0  ;;  %v4970_v32 = vrot.slane %v2248_v12, 9  ;;  %v2350_v33 = vrot.slane %v1823_v34, 5  ;;  %v5367_v9 = vld [vmem:[#allocation2 + $0x54] sm:$0xff] }
 0x162   : > { %v3128_v3 = vpack.c.b16 %v3102_v16, %v3101_v39  ;;  %v3662_v31 = vunpack.c.l.b16 %v2956_v11  ;;  %3227 = vrot.lane.b32.xlu1 %v3207_v47, %s5608_s8  ;;  %v2353_v23 = vrot.slane %v1848_v44, 5  ;;  %v2588_v35 = vshrl.u32 %v2429_v24, 16  ;;  %v6311_v47 = vld [vmem:[#allocation2 + $0x50] sm:$0x1] }
 0x163   : > { %v2591_v37 = vshll.u32 %v2429_v24, 16  ;;  %3323 = vrot.lane.b32.xlu2 %v5350_v5, %s5609_s20  ;;  %v745_v48 = vpack.c.bf16 %v602_v28, %v602_v28  ;;  %v2597_v46 = vshll.u32 %v6249_v17, 16  ;;  %v2601_v49 = vshrl.u32 %v6249_v17, 16 }
 0x164   : > { %3149 = vrot.lane.b32.xlu0 %v3128_v3, %s5610_s10  ;;  %v3688_v61 = vpack.c.b16 %v3662_v31, %v3661_v18  ;;  %v2351_v1 = vsel %vm5809_vm8, %v4970_v32, %v2350_v33  ;;  %v2352_v38 = vrot.slane %v2350_v33, 4  ;;  %v2590_v52 = vrot.slane %v2588_v35, 4  ;;  %v1636_v33 = vld [vmem:[#allocation2 + $0x3c] sm:$0xe] }
 0x165   : > { %v2593_v30 = vrot.slane %v2591_v37, 5  ;;  %v907_v60 = vshrl.u32 %v745_v48, 16  ;;  %v910_v27 = vshll.u32 %v745_v48, 16  ;;  %v3407_v19 = vunpack.c.l.b16 %v2351_v1 }
 0x166   : > { %5265 = vmatmul.msk.bf16.gmra.mxu0 %vm3699_vm15, %v3688_v61  ;;  %v2599_v0 = vrot.slane %v2597_v46, 5  ;;  %v2354_v17 = vsel %vm5809_vm8, %v2352_v38, %v2353_v23  ;;  %v2603_v57 = vrot.slane %v2601_v49, 4  ;;  %v2607_v59 = vshll.u32 %v6254_v51, 16  ;;  %v2857_v23 = vld [vmem:[#allocation2 + $0x60] sm:$0xe] }
 0x167   : > { %v2594_v36 = vor.u32 %v2593_v30, %v2590_v52  ;;  %v909_v42 = vrot.slane %v907_v60, 7  ;;  %v1144_v39 = vld [vmem:[#allocation2 + $0x74] sm:$0x1]  ;;  %v3408_v62 = vunpack.c.l.b16 %v2354_v17  ;;  %v551_v63 = vadd.f32 %v6130_v58, %v550_v56  ;;  %v6324_v38 = vld [vmem:[#allocation2 + $0x64] sm:$0xf] }
 0x168   : > { %v658_v34 = vsel %vm5782_vm2, 0, %v657_v53  ;;  %v2604_v2 = vor.u32 %v2603_v57, %v2599_v0  ;;  %v2609_v7 = vrot.slane %v2607_v59, 5  ;;  %v1392_v12 = vshrl.u32 %v1208_v50, 16  ;;  %v6326_v60 = vld [vmem:[#allocation2 + $0x68] sm:$0x1] }
 0x169   : > { %v2595_v40 = vrot.slane %v2594_v36, 4  ;;  %659 = vst [vmem:[#allocation2 + $0x78] sm:$0x1] %v658_v34  ;;  %v912_v16 = vor.u32 %v910_v27, %v909_v42  ;;  %v914_v18 = vrot.slane %v909_v42, 4  ;;  %v3433_v21 = vpack.c.b16 %v3408_v62, %v3407_v19  ;;  %v5384_v42 = vld [vmem:[%s7699_s2 + $0x30] sm:$0xff] }
 0x16a   : > { %v603_v51 = vmax.f32 %v551_v63, 0.0  ;;  %v2605_v24 = vrot.slane %v2604_v2, 4  ;;  %3549 = vrot.lane.b32.xlu1 %v5367_v9, %s5608_s8  ;;  %v1394_v11 = vrot.slane %v1392_v12, 4  ;;  %v1395_v3 = vshll.u32 %v1208_v50, 16  ;;  %v6338_v62 = vld [vmem:[#allocation2 + $0x20] sm:$0x1]  ;;  %v552_v12 = vpop.f32.mrf.mxu0  ;;  %4155 = vmatpush.bf16.msrb.mxu1 %v5384_v42 }
 0x16b   : > { %v2600_v44 = vsel %vm5899_vm14, %v2595_v40, %v2599_v0  ;;  %v913_v5 = vsel %vm5850_vm11, %v905_v26, %v912_v16  ;;  %v1145_v31 = vsel %vm5782_vm2, %v914_v18, %v1144_v39  ;;  %v1401_v61 = vshll.u32 %v6306_v4, 16  ;;  %v5388_v39 = vld [vmem:[%s7699_s2 + $0x50] sm:$0xff]  ;;  %v707_v16 = vld [vmem:[#allocation2 + $0x80] sm:$0x1] }
 0x16c   : > { %3455 = vrot.lane.b32.xlu0 %v3433_v21, %s5610_s10  ;;  %v3581_v28 = vunpack.c.l.b16 %v2600_v44  ;;  %v746_v32 = vpack.c.bf16 %v603_v51, %v603_v51  ;;  %1143 = vst.msk [vmem:[#allocation2 + $0x70] sm:$0xf] %vm617_vm3, %v913_v5  ;;  %v2610_v35 = vsel %vm5899_vm14, %v2605_v24, %v2609_v7  ;;  %v1397_v37 = vrot.slane %v1395_v3, 5  ;;  %4248 = vmatpush.bf16.msrb.mxu2 %v5388_v39  ;;  %v660_v24 = vld [vmem:[#allocation2 + $0x84] sm:$0x1] }
 0x16d   : > { %v1405_v48 = vshrl.u32 %v6306_v4, 16  ;;  %1146 = vst [vmem:[#allocation2 + $0x74] sm:$0x1] %v1145_v31  ;;  %v3582_v26 = vunpack.c.l.b16 %v2610_v35  ;;  %v1411_v1 = vshll.u32 %v6311_v47, 16  ;;  %v1403_v30 = vrot.slane %v1401_v61, 5  ;;  %v555_v35 = vpop.f32.mrf.mxu1 }
 0x16e   : > { %v916_v46 = vshrl.u32 %v746_v32, 16  ;;  %v919_v49 = vshll.u32 %v746_v32, 16  ;;  %v1398_v52 = vor.u32 %v1397_v37, %v1394_v11  ;;  %v4953_v54 = vrot.slane %v1636_v33, 9  ;;  %v1825_v37 = vld [vmem:[#allocation2 + $0x64] sm:$0xf] }
 0x16f   : > { %v1407_v53 = vrot.slane %v1405_v48, 4  ;;  %v3608_v27 = vpack.c.b16 %v3582_v26, %v3581_v28  ;;  %v1413_v50 = vrot.slane %v1411_v1, 5  ;;  %v1735_v17 = vrot.slane %v6231_v8, 5  ;;  %v2249_v61 = vld [vmem:[#allocation2 + $0x60] sm:$0xe]  ;;  %v5383_v48 = vld [vmem:[%s7699_s2 + $0x28] sm:$0xff] }
 0x170   : > { %v6328_v19 = vrot.slane %v916_v46, 7  ;;  %v1147_v0 = vld [vmem:[#allocation2 + $0x78] sm:$0xf]  ;;  %v1399_v36 = vrot.slane %v1398_v52, 4  ;;  %v1738_v59 = vrot.slane %v6236_v13, 5  ;;  %v4986_v56 = vrot.slane %v2857_v23, 9  ;;  %4156 = vmatpush.bf16.msrb.mxu1 %v5383_v48 }
 0x171   : > { %v1408_v57 = vor.u32 %v1407_v53, %v1403_v30  ;;  %v1902_v63 = vshll.u32 %v6338_v62, 16  ;;  %3629 = vrot.lane.b32.xlu2 %v3608_v27, %s5609_s20  ;;  %v1736_v13 = vsel %vm5809_vm8, %v4953_v54, %v1735_v17  ;;  %v1737_v34 = vrot.slane %v1735_v17, 4  ;;  %v1849_v52 = vld [vmem:[#allocation2 + $0x68] sm:$0x1] }
 0x172   : > { %v921_v8 = vor.u32 %v919_v49, %v6328_v19  ;;  %v1404_v40 = vsel %vm5899_vm14, %v1399_v36, %v1403_v30  ;;  %v3181_v7 = vunpack.c.l.b16 %v1736_v13  ;;  %v2959_v9 = vrot.slane %v6324_v38, 5  ;;  %v5351_v53 = vld [vmem:[#allocation2 + $0x48] sm:$0xff] }
 0x173   : > { %v1409_v2 = vrot.slane %v1408_v57, 4  ;;  %v3103_v21 = vunpack.c.l.b16 %v1404_v40  ;;  %v1739_v51 = vsel %vm5809_vm8, %v1737_v34, %v1738_v59  ;;  %v2962_v44 = vrot.slane %v6326_v60, 5  ;;  %v5382_v59 = vld [vmem:[%s7699_s2 + $0x20] sm:$0xff] }
 0x174   : > { %v1148_v18 = vsel %vm5838_vm9, %v921_v8, %v1147_v0  ;;  %v3182_v3 = vunpack.c.l.b16 %v1739_v51  ;;  %v2960_v5 = vsel %vm5809_vm8, %v4986_v56, %v2959_v9  ;;  %v2961_v31 = vrot.slane %v2959_v9, 4  ;;  %v1810_v0 = vld [vmem:[#allocation2 + $0xc] sm:$0xf]  ;;  %4157 = vmatpush.bf16.msrb.mxu1 %v5382_v59 }
 0x175   : > { %1149 = vst [vmem:[#allocation2 + $0x78] sm:$0xf] %v1148_v18  ;;  %v1414_v11 = vsel %vm5899_vm14, %v1409_v2, %v1413_v50  ;;  %v3663_v32 = vunpack.c.l.b16 %v2960_v5  ;;  %v553_v33 = vadd.f32 %v6130_v58, %v552_v12  ;;  %v708_v23 = vsel %vm5795_vm5, 0, %v707_v16  ;;  %v5387_v56 = vld [vmem:[%s7699_s2 + $0x48] sm:$0xff]  ;;  %v2431_v18 = vld [vmem:[#allocation2 + $0x60] sm:$0xf] }
 0x176   : > { %v3104_v28 = vunpack.c.l.b16 %v1414_v11  ;;  %v3208_v26 = vpack.c.b16 %v3182_v3, %v3181_v7  ;;  %v2963_v46 = vsel %vm5809_vm8, %v2961_v31, %v2962_v44  ;;  %709 = vst [vmem:[#allocation2 + $0x80] sm:$0x1] %v708_v23  ;;  %v556_v49 = vadd.f32 %v6130_v58, %v555_v35  ;;  %4249 = vmatpush.bf16.msrb.mxu2 %v5387_v56  ;;  %v5368_v5 = vld [vmem:[#allocation2 + $0x60] sm:$0xff] }
 0x177   : > { %v661_v1 = vsel %vm5782_vm2, 0, %v660_v24  ;;  %v3664_v54 = vunpack.c.l.b16 %v2963_v46  ;;  %v604_v27 = vmax.f32 %v553_v33, 0.0  ;;  %v922_v50 = vrot.slane %v6328_v19, 4  ;;  %v6398_v46 = vld [vmem:[#allocation2 + $0x28] sm:$0xf] }
 0x178   : > { %v3129_v30 = vpack.c.b16 %v3104_v28, %v3103_v21  ;;  %662 = vst [vmem:[#allocation2 + $0x84] sm:$0x1] %v661_v1  ;;  %3229 = vrot.lane.b32.xlu1 %v3208_v26, %s5608_s8  ;;  %v605_v17 = vmax.f32 %v556_v49, 0.0  ;;  %v4971_v36 = vrot.slane %v2249_v61, 9  ;;  %v2357_v57 = vrot.slane %v1825_v37, 5  ;;  %v5381_v26 = vld [vmem:[%s7699_s2 + $0x18] sm:$0xff] }
 0x179   : > { %3325 = vrot.lane.b32.xlu2 %v5351_v53, %s5609_s20  ;;  %v3689_v42 = vpack.c.b16 %v3664_v54, %v3663_v32  ;;  %v747_v39 = vpack.c.bf16 %v604_v27, %v604_v27  ;;  %v2360_v19 = vrot.slane %v1849_v52, 5  ;;  %v6380_v8 = vrot.slane %v1868_v41, 5  ;;  %v710_v53 = vld [vmem:[#allocation2 + $0x8c] sm:$0x1]  ;;  %4158 = vmatpush.bf16.msrb.mxu1 %v5381_v26 }
 0x17a   : > { %3151 = vrot.lane.b32.xlu0 %v3129_v30, %s5610_s10  ;;  %v748_v13 = vpack.c.bf16 %v605_v17, %v605_v17  ;;  %v2358_v34 = vsel %vm5809_vm8, %v4971_v36, %v2357_v57  ;;  %v2359_v40 = vrot.slane %v2357_v57, 4  ;;  %v1859_v2 = vshrl.u32 %v1810_v0, 16  ;;  %v1210_v17 = vld [vmem:[#allocation2 + $0x54] sm:$0xf] }
 0x17b   : > { %5266 = vmatmul.msk.bf16.gmra.mxu0 %vm3699_vm15, %v3689_v42  ;;  %v924_v7 = vshrl.u32 %v747_v39, 16  ;;  %v927_v9 = vshll.u32 %v747_v39, 16  ;;  %v3409_v12 = vunpack.c.l.b16 %v2358_v34  ;;  %v1875_v16 = vor.u32 %v6209_v14, %v6380_v8  ;;  %v557_v42 = vpop.f32.mrf.mxu1 }
 0x17c   : > { %v933_v43 = vshrl.u32 %v748_v13, 16  ;;  %v936_v41 = vshll.u32 %v748_v13, 16  ;;  %v2361_v21 = vsel %vm5809_vm8, %v2359_v40, %v2360_v19  ;;  %v1861_v51 = vrot.slane %v1859_v2, 4 }
 0x17d   : > { %v926_v44 = vrot.slane %v924_v7, 7  ;;  %v3410_v24 = vunpack.c.l.b16 %v2361_v21  ;;  %v1876_v11 = vrot.slane %v1875_v16, 4  ;;  %v1862_v3 = vshll.u32 %v1810_v0, 16  ;;  %v1151_v31 = vld [vmem:[#allocation2 + $0x80] sm:$0x1] }
 0x17e   : > { %v6389_v28 = vrot.slane %v933_v43, 7  ;;  %v2612_v32 = vshrl.u32 %v2431_v18, 16  ;;  %v2615_v33 = vshll.u32 %v2431_v18, 16  ;;  %v2621_v14 = vshll.u32 %v6324_v38, 16 }
 0x17f   : > { %v929_v23 = vor.u32 %v927_v9, %v926_v44  ;;  %v931_v35 = vrot.slane %v926_v44, 4  ;;  %v1154_v37 = vld [vmem:[#allocation2 + $0x84] sm:$0xf]  ;;  %v3434_v61 = vpack.c.b16 %v3410_v24, %v3409_v12  ;;  %v1881_v48 = vsel %vm5899_vm14, %v1876_v11, %v6262_v10 }
 0x180   : > { %v1920_v49 = vshrl.u32 %v6398_v46, 16  ;;  %v938_v1 = vor.u32 %v936_v41, %v6389_v28  ;;  %v6402_v52 = vunpack.c.l.b16 %v1881_v48  ;;  %v1864_v30 = vrot.slane %v1862_v3, 5  ;;  %3551 = vrot.lane.b32.xlu1 %v5368_v5, %s5608_s8  ;;  %v6440_v48 = vld [vmem:[#allocation2 + $0x2c] sm:$0x1] }
 0x181   : > { %v930_v54 = vsel %vm5850_vm11, %v922_v50, %v929_v23  ;;  %v1152_v10 = vsel %vm5782_vm2, %v931_v35, %v1151_v31  ;;  %v2614_v27 = vrot.slane %v2612_v32, 4  ;;  %v2617_v0 = vrot.slane %v2615_v33, 5  ;;  %v6414_v50 = vld [vmem:[#allocation2 + $0x58] sm:$0xf]  ;;  %v1637_v33 = vld [vmem:[#allocation2 + $0x48] sm:$0xe] }
 0x182   : > { %3457 = vrot.lane.b32.xlu0 %v3434_v61, %s5610_s10  ;;  %1150 = vst.msk [vmem:[#allocation2 + $0x7c] sm:$0xf] %vm617_vm3, %v930_v54  ;;  %v1155_v36 = vsel %vm5838_vm9, %v938_v1, %v1154_v37  ;;  %v1865_v57 = vor.u32 %v1864_v30, %v1861_v51  ;;  %v2623_v59 = vrot.slane %v2621_v14, 5  ;;  %v2625_v56 = vshrl.u32 %v6324_v38, 16  ;;  %v5386_v37 = vld [vmem:[%s7699_s2 + $0x40] sm:$0xff]  ;;  %v5380_v61 = vld [vmem:[%s7699_s2 + $0x10] sm:$0xff] }
 0x183   : > { %1153 = vst [vmem:[#allocation2 + $0x80] sm:$0x1] %v1152_v10  ;;  %v2618_v39 = vor.u32 %v2617_v0, %v2614_v27  ;;  %v2631_v19 = vshll.u32 %v6326_v60, 16  ;;  %v558_v13 = vadd.f32 %v6130_v58, %v557_v42  ;;  %v711_v34 = vsel %vm5795_vm5, 0, %v710_v53  ;;  %v6424_v58 = vld [vmem:[#allocation2 + $0x5c] sm:$0x1]  ;;  %4250 = vmatpush.bf16.msrb.mxu2 %v5386_v37  ;;  %4159 = vmatpush.bf16.msrb.mxu1 %v5380_v61 }
 0x184   : > { %1156 = vst [vmem:[#allocation2 + $0x84] sm:$0xf] %v1155_v36  ;;  %v1866_v40 = vrot.slane %v1865_v57, 4  ;;  %v2627_v2 = vrot.slane %v2625_v56, 4  ;;  %v1416_v7 = vshrl.u32 %v1210_v17, 16  ;;  %v1419_v9 = vshll.u32 %v1210_v17, 16 }
 0x185   : > { %v2619_v12 = vrot.slane %v2618_v39, 4  ;;  %v2633_v16 = vrot.slane %v2631_v19, 5  ;;  %v606_v38 = vmax.f32 %v558_v13, 0.0  ;;  %712 = vst [vmem:[#allocation2 + $0x8c] sm:$0x1] %v711_v34  ;;  %v1425_v18 = vshll.u32 %v6414_v50, 16 }
 0x186   : > { %v1871_v60 = vsel %vm5899_vm14, %v1866_v40, %v6380_v8  ;;  %v2628_v43 = vor.u32 %v2627_v2, %v2623_v59  ;;  %v1418_v41 = vrot.slane %v1416_v7, 4  ;;  %v1421_v21 = vrot.slane %v1419_v9, 5  ;;  %v6446_v0 = vld [vmem:[#allocation2 + $0x70] sm:$0xf]  ;;  %v2858_v17 = vld [vmem:[#allocation2 + $0x6c] sm:$0xe] }
 0x187   : > { %v6426_v51 = vunpack.c.l.b16 %v1871_v60  ;;  %v2624_v44 = vsel %vm5899_vm14, %v2619_v12, %v2623_v59  ;;  %v749_v24 = vpack.c.bf16 %v606_v38, %v606_v38  ;;  %v1427_v11 = vrot.slane %v1425_v18, 5  ;;  %v6450_v39 = vld [vmem:[#allocation2 + $0x74] sm:$0x1]  ;;  %v560_v60 = vpop.f32.mrf.mxu1 }
 0x188   : > { %v2629_v3 = vrot.slane %v2628_v43, 4  ;;  %v3583_v5 = vunpack.c.l.b16 %v2624_v44  ;;  %v1422_v31 = vor.u32 %v1421_v21, %v1418_v41  ;;  %v1429_v32 = vshrl.u32 %v6414_v50, 16  ;;  %v663_v43 = vld [vmem:[#allocation2 + $0x90] sm:$0x1]  ;;  %v6461_v41 = vpop.permute.xlu0 %3443  ;;  %v6471_v44 = vld [vmem:[%s7701_s4] ss:$0 sm:$0xff] }
 0x189   : > { %v3379_v8 = vpack.c.b16 %v6402_v52, %v6426_v51  ;;  %v941_v14 = vshrl.u32 %v749_v24, 16  ;;  %v944_v23 = vshll.u32 %v749_v24, 16  ;;  %v1435_v35 = vshll.u32 %v6424_v58, 16 }
 0x18a   : > { %v1926_v26 = vshll.u32 %v6440_v48, 16  ;;  %v2634_v1 = vsel %vm5899_vm14, %v2629_v3, %v2633_v16  ;;  %v1423_v30 = vrot.slane %v1422_v31, 4  ;;  %v1431_v53 = vrot.slane %v1429_v32, 4 }
 0x18b   : > { %v939_v54 = vrot.slane %v6389_v28, 4  ;;  %v3584_v10 = vunpack.c.l.b16 %v2634_v1  ;;  %v943_v27 = vrot.slane %v941_v14, 7  ;;  %v1437_v56 = vrot.slane %v1435_v35, 5  ;;  %v5379_v14 = vld [vmem:[%s7699_s2 + $0x8] sm:$0xff]  ;;  %v1827_v1 = vld [vmem:[#allocation2 + $0x70] sm:$0xf] }
 0x18c   : > { %v1158_v36 = vld [vmem:[#allocation2 + $0x8c] sm:$0x1]  ;;  %v1428_v57 = vsel %vm5899_vm14, %v1423_v30, %v1427_v11  ;;  %v1432_v59 = vor.u32 %v1431_v53, %v1427_v11  ;;  %v4954_v42 = vrot.slane %v1637_v33, 9  ;;  %v1742_v2 = vrot.slane %v6306_v4, 5  ;;  %v1812_v11 = vld [vmem:[#allocation2 + $0x18] sm:$0xf]  ;;  %4160 = vmatpush.bf16.msrb.mxu1 %v5379_v14 }
 0x18d   : > { %v3609_v19 = vpack.c.b16 %v3584_v10, %v3583_v5  ;;  %v946_v13 = vor.u32 %v944_v23, %v943_v27  ;;  %v948_v34 = vrot.slane %v943_v27, 4  ;;  %v3105_v28 = vunpack.c.l.b16 %v1428_v57  ;;  %v2250_v33 = vld [vmem:[#allocation2 + $0x6c] sm:$0xe]  ;;  %v1850_v30 = vld [vmem:[#allocation2 + $0x74] sm:$0x1] }
 0x18e   : > { %v1433_v40 = vrot.slane %v1432_v59, 4  ;;  %v1745_v7 = vrot.slane %v6311_v47, 5  ;;  %v4987_v9 = vrot.slane %v2858_v17, 9  ;;  %v2966_v38 = vrot.slane %v6446_v0, 5  ;;  %v6483_v53 = vld [vmem:[#allocation2 + $0x34] sm:$0xf] }
 0x18f   : > { %3631 = vrot.lane.b32.xlu2 %v3609_v19, %s5609_s20  ;;  %v947_v12 = vsel %vm5850_vm11, %v939_v54, %v946_v13  ;;  %v1159_v16 = vsel %vm5782_vm2, %v948_v34, %v1158_v36  ;;  %v2969_v18 = vrot.slane %v6450_v39, 5  ;;  %v1743_v47 = vsel %vm5809_vm8, %v4954_v42, %v1742_v2  ;;  %v6488_v36 = vld [vmem:[#allocation2 + $0x38] sm:$0x1]  ;;  %v5378_v19 = vld [vmem:[%s7699_s2] sm:$0xff] }
 0x190   : > { %1157 = vst.msk [vmem:[#allocation2 + $0x88] sm:$0xf] %vm617_vm3, %v947_v12  ;;  %v1438_v4 = vsel %vm5899_vm14, %v1433_v40, %v1437_v56  ;;  %v1744_v21 = vrot.slane %v1742_v2, 4  ;;  %v561_v24 = vadd.f32 %v6471_v44, %v560_v60  ;;  %v3183_v5 = vunpack.c.l.b16 %v1743_v47  ;;  %v5352_v13 = vld [vmem:[#allocation2 + $0x54] sm:$0xff]  ;;  %v6500_v47 = vld [vmem:[#allocation2 + $0x40] sm:$0xf]  ;;  %4161 = vmatpush.bf16.msrb.mxu1 %v5378_v19  ;;  %v3540_v14 = vpop.permute.xlu0 %3539 }
 0x191   : > { %1160 = vst [vmem:[#allocation2 + $0x8c] sm:$0x1] %v1159_v16  ;;  %v3106_v3 = vunpack.c.l.b16 %v1438_v4  ;;  %v2967_v31 = vsel %vm5809_vm8, %v4987_v9, %v2966_v38  ;;  %v2968_v32 = vrot.slane %v2966_v38, 4  ;;  %v664_v61 = vsel %vm5782_vm2, 0, %v663_v43  ;;  %v2433_v38 = vld [vmem:[#allocation2 + $0x6c] sm:$0xf] }
 0x192   : > { %v1746_v23 = vsel %vm5809_vm8, %v1744_v21, %v1745_v7  ;;  %v3665_v35 = vunpack.c.l.b16 %v2967_v31  ;;  %v607_v37 = vmax.f32 %v561_v24, 0.0  ;;  %v1944_v54 = vshrl.u32 %v6483_v53, 16  ;;  %665 = vst [vmem:[#allocation2 + $0x90] sm:$0x1] %v664_v61 }
 0x193   : > { %v3130_v10 = vpack.c.b16 %v3106_v3, %v3105_v28  ;;  %v3184_v27 = vunpack.c.l.b16 %v1746_v23  ;;  %v2970_v17 = vsel %vm5809_vm8, %v2968_v32, %v2969_v18  ;;  %v1950_v57 = vshll.u32 %v6488_v36, 16  ;;  %v1216_v36 = vld [vmem:[#allocation2 + $0x78] sm:$0xf] }
 0x194   : > { %v3666_v59 = vunpack.c.l.b16 %v2970_v17  ;;  %v750_v56 = vpack.c.bf16 %v607_v37, %v607_v37  ;;  %v4972_v42 = vrot.slane %v2250_v33, 9  ;;  %v2364_v28 = vrot.slane %v1827_v1, 5 }
 0x195   : > { %3153 = vrot.lane.b32.xlu0 %v3130_v10, %s5610_s10  ;;  %v3209_v34 = vpack.c.b16 %v3184_v27, %v3183_v5  ;;  %v2367_v40 = vrot.slane %v1850_v30, 5  ;;  %v1883_v2 = vshrl.u32 %v1812_v11, 16  ;;  %v1886_v16 = vshll.u32 %v1812_v11, 16  ;;  %v6506_v5 = vld [vmem:[#allocation2 + $0x44] sm:$0x1] }
 0x196   : > { %v3690_v7 = vpack.c.b16 %v3666_v59, %v3665_v35  ;;  %v950_v9 = vshrl.u32 %v750_v56, 16  ;;  %v953_v12 = vshll.u32 %v750_v56, 16  ;;  %v2365_v18 = vsel %vm5809_vm8, %v4972_v42, %v2364_v28  ;;  %v562_v59 = vpop.f32.mrf.mxu1 }
 0x197   : > { %3327 = vrot.lane.b32.xlu2 %v5352_v13, %s5609_s20  ;;  %3231 = vrot.lane.b32.xlu1 %v3209_v34, %s5608_s8  ;;  %v2366_v60 = vrot.slane %v2364_v28, 4  ;;  %v1885_v43 = vrot.slane %v1883_v2, 4  ;;  %v1892_v4 = vshll.u32 %v6283_v45, 16  ;;  %v1968_v21 = vshrl.u32 %v6500_v47, 16  ;;  %v3620_v2 = vpop.permute.xlu1 %3619 }
 0x198   : > { %5267 = vmatmul.msk.bf16.gmra.mxu0 %vm3699_vm15, %v3690_v7  ;;  %v6504_v24 = vrot.slane %v950_v9, 7  ;;  %v3411_v11 = vunpack.c.l.b16 %v2365_v18  ;;  %v1888_v3 = vrot.slane %v1886_v16, 5  ;;  %v1974_v31 = vshll.u32 %v6506_v5, 16  ;;  %v1212_v7 = vld [vmem:[#allocation2 + $0x60] sm:$0xf] }
 0x199   : > { %v2368_v32 = vsel %vm5809_vm8, %v2366_v60, %v2367_v40  ;;  %v2636_v33 = vshrl.u32 %v2433_v38, 16  ;;  %v1161_v35 = vld [vmem:[#allocation2 + $0x90] sm:$0xf]  ;;  %v6512_v61 = vrot.slane %v1892_v4, 5  ;;  %v1898_v1 = vrot.slane %v1896_v25, 4 }
 0x19a   : > { %v955_v23 = vor.u32 %v953_v12, %v6504_v24  ;;  %v3412_v37 = vunpack.c.l.b16 %v2368_v32  ;;  %v1889_v30 = vor.u32 %v1888_v3, %v1885_v43  ;;  %v2639_v27 = vshll.u32 %v2433_v38, 16  ;;  %v5369_v40 = vld [vmem:[#allocation2 + $0x6c] sm:$0xff]  ;;  %v6536_v16 = vld [vmem:[#allocation2 + $0x64] sm:$0xf] }
 0x19b   : > { %v2638_v10 = vrot.slane %v2636_v33, 4  ;;  %v2645_v17 = vshll.u32 %v6446_v0, 16  ;;  %v3832_v56 = vsel %vm3699_vm15, %v3379_v8, %v6461_v41  ;;  %v2649_v13 = vshrl.u32 %v6446_v0, 16  ;;  %v713_v41 = vld [vmem:[#allocation2 + $0x98] sm:$0x1] }
 0x19c   : > { %v1162_v42 = vsel %vm5838_vm9, %v955_v23, %v1161_v35  ;;  %v3435_v19 = vpack.c.b16 %v3412_v37, %v3411_v11  ;;  %v3879_v45 = vsel %vm3748_vm0, %v3832_v56, %v3540_v14  ;;  %v2641_v25 = vrot.slane %v2639_v27, 5  ;;  %v6546_v23 = vld [vmem:[#allocation2 + $0x68] sm:$0x1] }
 0x19d   : > { %1163 = vst [vmem:[#allocation2 + $0x90] sm:$0xf] %v1162_v42  ;;  %v2647_v34 = vrot.slane %v2645_v17, 5  ;;  %v2655_v28 = vshll.u32 %v6450_v39, 16  ;;  %v1899_v52 = vor.u32 %v1898_v1, %v6512_v61  ;;  %v2651_v51 = vrot.slane %v2649_v13, 4 }
 0x19e   : > { %3459 = vrot.lane.b32.xlu0 %v3435_v19, %s5610_s10  ;;  %v563_v8 = vadd.f32 %v6471_v44, %v562_v59  ;;  %v956_v0 = vrot.slane %v6504_v24, 4  ;;  %v1890_v9 = vrot.slane %v1889_v30, 4  ;;  %v6533_v12 = vrot.slane %v1902_v63, 5  ;;  %v1638_v59 = vld [vmem:[#allocation2 + $0x54] sm:$0xe] }
 0x19f   : > { %v2642_v39 = vor.u32 %v2641_v25, %v2638_v10  ;;  %3553 = vrot.lane.b32.xlu1 %v5369_v40, %s5608_s8  ;;  %v2652_v38 = vor.u32 %v2651_v51, %v2647_v34  ;;  %v2657_v18 = vrot.slane %v2655_v28, 5  ;;  %v3911_v60 = vsel %vm3781_vm1, %v3879_v45, %v3620_v2  ;;  %v6554_v45 = vpop.permute.xlu2 %3219 }
 0x1a0   : > { %v608_v43 = vmax.f32 %v563_v8, 0.0  ;;  %4251 = vmatmul.bf16.vlgmr.msrb.gmra.mxu2 %v3911_v60  ;;  %v714_v24 = vsel %vm5795_vm5, 0, %v713_v41  ;;  %v1440_v11 = vshrl.u32 %v1212_v7, 16  ;;  %v1443_v3 = vshll.u32 %v1212_v7, 16  ;;  %v5330_v8 = vld [vmem:[#allocation2] sm:$0xff] }
 0x1a1   : > { %v2643_v4 = vrot.slane %v2642_v39, 4  ;;  %v6541_v62 = vrot.slane %v1899_v52, 4  ;;  %v2653_v63 = vrot.slane %v2652_v38, 4  ;;  %715 = vst [vmem:[#allocation2 + $0x98] sm:$0x1] %v714_v24  ;;  %v1449_v33 = vshll.u32 %v6536_v16, 16 }
 0x1a2   : > { %v751_v32 = vpack.c.bf16 %v608_v43, %v608_v43  ;;  %v1442_v35 = vrot.slane %v1440_v11, 4  ;;  %v1445_v37 = vrot.slane %v1443_v3, 5  ;;  %v1453_v1 = vshrl.u32 %v6536_v16, 16  ;;  %v6562_v38 = vld [vmem:[#allocation2 + $0x7c] sm:$0xf] }
 0x1a3   : > { %v2648_v14 = vsel %vm5899_vm14, %v2643_v4, %v2647_v34  ;;  %v1895_v30 = vsel %vm5899_vm14, %v1890_v9, %v6512_v61  ;;  %v2658_v10 = vsel %vm5899_vm14, %v2653_v63, %v2657_v18  ;;  %v1451_v13 = vrot.slane %v1449_v33, 5  ;;  %v2859_v18 = vld [vmem:[#allocation2 + $0x78] sm:$0xe]  ;;  %v6570_v24 = vld [vmem:[#allocation2 + $0x80] sm:$0x1] }
 0x1a4   : > { %v3585_v27 = vunpack.c.l.b16 %v2648_v14  ;;  %v958_v17 = vshrl.u32 %v751_v32, 16  ;;  %v3586_v56 = vunpack.c.l.b16 %v2658_v10  ;;  %v961_v42 = vshll.u32 %v751_v32, 16  ;;  %v3140_v32 = vpop.permute.xlu1 %3139  ;;  %v666_v33 = vld [vmem:[#allocation2 + $0x9c] sm:$0x1]  ;;  %v6578_v14 = vpop.permute.xlu0 %3445 }
 0x1a5   : > { %v1446_v19 = vor.u32 %v1445_v37, %v1442_v35  ;;  %v1905_v25 = vsel %vm5899_vm14, %v6541_v62, %v6533_v12  ;;  %v1455_v28 = vrot.slane %v1453_v1, 4  ;;  %v1459_v61 = vshll.u32 %v6546_v23, 16 }
 0x1a6   : > { %v960_v34 = vrot.slane %v958_v17, 7  ;;  %v3610_v40 = vpack.c.b16 %v3586_v56, %v3585_v27  ;;  %v4955_v52 = vrot.slane %v1638_v59, 9  ;;  %v1749_v51 = vrot.slane %v6414_v50, 5  ;;  %v565_v17 = vpop.f32.mrf.mxu2  ;;  %v2251_v59 = vld [vmem:[#allocation2 + $0x78] sm:$0xe] }
 0x1a7   : > { %v1447_v2 = vrot.slane %v1446_v19, 4  ;;  %v1456_v9 = vor.u32 %v1455_v28, %v1451_v13  ;;  %v1461_v39 = vrot.slane %v1459_v61, 5  ;;  %v1752_v50 = vrot.slane %v6424_v58, 5  ;;  %v1851_v28 = vld [vmem:[#allocation2 + $0x80] sm:$0x1] }
 0x1a8   : > { %v963_v41 = vor.u32 %v961_v42, %v960_v34  ;;  %v965_v7 = vrot.slane %v960_v34, 4  ;;  %3633 = vrot.lane.b32.xlu2 %v3610_v40, %s5609_s20  ;;  %v1165_v12 = vld [vmem:[#allocation2 + $0x98] sm:$0x1]  ;;  %v1750_v43 = vsel %vm5809_vm8, %v4955_v52, %v1749_v51  ;;  %v1751_v4 = vrot.slane %v1749_v51, 4  ;;  %v1829_v34 = vld [vmem:[#allocation2 + $0x7c] sm:$0xf] }
 0x1a9   : > { %v1452_v60 = vsel %vm5899_vm14, %v1447_v2, %v1451_v13  ;;  %v6572_v11 = vunpack.c.l.b16 %v1895_v30  ;;  %v1457_v63 = vrot.slane %v1456_v9, 4  ;;  %v3185_v37 = vunpack.c.l.b16 %v1750_v43  ;;  %v1814_v51 = vld [vmem:[#allocation2 + $0x24] sm:$0xf] }
 0x1aa   : > { %v964_v3 = vsel %vm5850_vm11, %v956_v0, %v963_v41  ;;  %v1166_v62 = vsel %vm5782_vm2, %v965_v7, %v1165_v12  ;;  %v3107_v35 = vunpack.c.l.b16 %v1452_v60  ;;  %v1753_v58 = vsel %vm5809_vm8, %v1751_v4, %v1752_v50  ;;  %v5353_v7 = vld [vmem:[#allocation2 + $0x60] sm:$0xff] }
 0x1ab   : > { %1164 = vst.msk [vmem:[#allocation2 + $0x94] sm:$0xf] %vm617_vm3, %v964_v3  ;;  %v4988_v1 = vrot.slane %v2859_v18, 9  ;;  %v1462_v0 = vsel %vm5899_vm14, %v1457_v63, %v1461_v39  ;;  %v3186_v30 = vunpack.c.l.b16 %v1753_v58  ;;  %v2973_v10 = vrot.slane %v6562_v38, 5  ;;  %v3316_v18 = vpop.permute.xlu2 %3315 }
 0x1ac   : > { %1167 = vst [vmem:[#allocation2 + $0x98] sm:$0x1] %v1166_v62  ;;  %v2976_v27 = vrot.slane %v6570_v24, 5  ;;  %v3108_v56 = vunpack.c.l.b16 %v1462_v0  ;;  %v3702_v42 = vsel %vm3699_vm15, %v5330_v8, %v3140_v32  ;;  %v566_v19 = vadd.f32 %v6471_v44, %v565_v17  ;;  %v2435_v0 = vld [vmem:[#allocation2 + $0x78] sm:$0xf] }
 0x1ad   : > { %v667_v13 = vsel %vm5782_vm2, 0, %v666_v33  ;;  %v3350_v61 = vunpack.c.l.b16 %v1905_v25  ;;  %v3210_v40 = vpack.c.b16 %v3186_v30, %v3185_v37  ;;  %v2974_v2 = vsel %vm5809_vm8, %v4988_v1, %v2973_v10  ;;  %v6604_v30 = vld [vmem:[#allocation2 + $0x4c] sm:$0xf] }
 0x1ae   : > { %v2975_v52 = vrot.slane %v2973_v10, 4  ;;  %668 = vst [vmem:[#allocation2 + $0x9c] sm:$0x1] %v667_v13  ;;  %v3131_v41 = vpack.c.b16 %v3108_v56, %v3107_v35  ;;  %v3667_v9 = vunpack.c.l.b16 %v2974_v2  ;;  %v609_v39 = vmax.f32 %v566_v19, 0.0  ;;  %v3142_v19 = vpop.permute.xlu0 %3141 }
 0x1af   : > { %v4973_v8 = vrot.slane %v2251_v59, 9  ;;  %3233 = vrot.lane.b32.xlu1 %v3210_v40, %s5608_s8  ;;  %v2371_v60 = vrot.slane %v1829_v34, 5  ;;  %v2374_v25 = vrot.slane %v1851_v28, 5  ;;  %v3750_v43 = vsel %vm3748_vm0, %v3702_v42, %v6554_v45  ;;  %v5331_v42 = vld [vmem:[#allocation2 + $0xc] sm:$0xff]  ;;  %v5370_v40 = vld [vmem:[#allocation2 + $0x78] sm:$0xff] }
 0x1b0   : > { %v2977_v12 = vsel %vm5809_vm8, %v2975_v52, %v2976_v27  ;;  %3155 = vrot.lane.b32.xlu0 %v3131_v41, %s5610_s10  ;;  %3329 = vrot.lane.b32.xlu2 %v5353_v7, %s5609_s20  ;;  %v752_v50 = vpack.c.bf16 %v609_v39, %v609_v39  ;;  %v3783_v3 = vsel %vm3781_vm1, %v3750_v43, %v3316_v18  ;;  %v1907_v62 = vshrl.u32 %v1814_v51, 16  ;;  %v3542_v18 = vpop.permute.xlu1 %3541 }
 0x1b1   : > { %v3668_v4 = vunpack.c.l.b16 %v2977_v12  ;;  %v2372_v63 = vsel %vm5809_vm8, %v4973_v8, %v2371_v60  ;;  %v2373_v32 = vrot.slane %v2371_v60, 4  ;;  %4162 = vmatmul.bf16.vlgmr.msrb.gmra.mxu1 %v3783_v3  ;;  %v1910_v33 = vshll.u32 %v1814_v51, 16  ;;  %v567_v12 = vpop.f32.mrf.mxu2 }
 0x1b2   : > { %v1916_v35 = vshll.u32 %v6398_v46, 16  ;;  %v967_v37 = vshrl.u32 %v752_v50, 16  ;;  %v970_v45 = vshll.u32 %v752_v50, 16  ;;  %v3413_v1 = vunpack.c.l.b16 %v2372_v63 }
 0x1b3   : > { %v3691_v58 = vpack.c.b16 %v3668_v4, %v3667_v9  ;;  %v1992_v10 = vshrl.u32 %v6604_v30, 16  ;;  %v2375_v27 = vsel %vm5809_vm8, %v2373_v32, %v2374_v25  ;;  %v1909_v17 = vrot.slane %v1907_v62, 4  ;;  %v6618_v9 = vld [vmem:[#allocation2 + $0x50] sm:$0x1]  ;;  %v716_v62 = vld [vmem:[#allocation2 + $0xa4] sm:$0x1] }
 0x1b4   : > { %v1912_v59 = vrot.slane %v1910_v33, 5  ;;  %v3380_v56 = vpack.c.b16 %v3350_v61, %v6572_v11  ;;  %v6611_v13 = vrot.slane %v967_v37, 7  ;;  %v3414_v34 = vunpack.c.l.b16 %v2375_v27 }
 0x1b5   : > { %5268 = vmatmul.msk.bf16.gmra.mxu0 %vm3699_vm15, %v3691_v58  ;;  %v6613_v28 = vrot.slane %v1916_v35, 5  ;;  %v1168_v2 = vld [vmem:[#allocation2 + $0x9c] sm:$0xf]  ;;  %v1922_v52 = vrot.slane %v1920_v49, 4  ;;  %v2660_v51 = vshrl.u32 %v2435_v0, 16  ;;  %v2663_v41 = vshll.u32 %v2435_v0, 16 }
 0x1b6   : > { %v2669_v7 = vshll.u32 %v6562_v38, 16  ;;  %v1998_v11 = vshll.u32 %v6618_v9, 16  ;;  %v972_v61 = vor.u32 %v970_v45, %v6611_v13  ;;  %v3436_v39 = vpack.c.b16 %v3414_v34, %v3413_v1  ;;  %v1214_v35 = vld [vmem:[#allocation2 + $0x6c] sm:$0xf]  ;;  %v6641_v1 = vld [vmem:[#allocation2 + $0x70] sm:$0xf] }
 0x1b7   : > { %v1913_v8 = vor.u32 %v1912_v59, %v1909_v17  ;;  %v3835_v60 = vsel %vm3699_vm15, %v3380_v56, %v6578_v14  ;;  %v6625_v46 = vsel %vm3699_vm15, %v5331_v42, %v3142_v19  ;;  %v2662_v49 = vrot.slane %v2660_v51, 4  ;;  %3555 = vrot.lane.b32.xlu1 %v5370_v40, %s5608_s8  ;;  %v6648_v40 = vld [vmem:[#allocation2 + $0x74] sm:$0x1] }
 0x1b8   : > { %v2665_v25 = vrot.slane %v2663_v41, 5  ;;  %v1169_v43 = vsel %vm5838_vm9, %v972_v61, %v1168_v2  ;;  %3461 = vrot.lane.b32.xlu0 %v3436_v39, %s5610_s10  ;;  %v2671_v4 = vrot.slane %v2669_v7, 5  ;;  %v2673_v50 = vshrl.u32 %v6562_v38, 16  ;;  %v1639_v61 = vld [vmem:[#allocation2 + $0x60] sm:$0xe] }
 0x1b9   : > { %v2679_v3 = vshll.u32 %v6570_v24, 16  ;;  %1170 = vst [vmem:[#allocation2 + $0x9c] sm:$0xf] %v1169_v43  ;;  %v1923_v14 = vor.u32 %v1922_v52, %v6613_v28  ;;  %v3881_v32 = vsel %vm3748_vm0, %v3835_v60, %v3542_v18  ;;  %v568_v33 = vadd.f32 %v6471_v44, %v567_v12  ;;  %v3622_v24 = vpop.permute.xlu2 %3621 }
 0x1ba   : > { %v2666_v63 = vor.u32 %v2665_v25, %v2662_v49  ;;  %v973_v58 = vrot.slane %v6611_v13, 4  ;;  %v1914_v37 = vrot.slane %v1913_v8, 4  ;;  %v6639_v45 = vrot.slane %v1926_v26, 5 }
 0x1bb   : > { %v2675_v38 = vrot.slane %v2673_v50, 4  ;;  %v2681_v27 = vrot.slane %v2679_v3, 5  ;;  %v610_v17 = vmax.f32 %v568_v33, 0.0  ;;  %v717_v59 = vsel %vm5795_vm5, 0, %v716_v62 }
 0x1bc   : > { %v2667_v0 = vrot.slane %v2666_v63, 4  ;;  %718 = vst [vmem:[#allocation2 + $0xa4] sm:$0x1] %v717_v59  ;;  %v3914_v42 = vsel %vm3781_vm1, %v3881_v32, %v3622_v24  ;;  %v1464_v19 = vshrl.u32 %v1214_v35, 16  ;;  %v1467_v13 = vshll.u32 %v1214_v35, 16 }
 0x1bd   : > { %v2676_v56 = vor.u32 %v2675_v38, %v2671_v4  ;;  %v1924_v34 = vrot.slane %v1923_v14, 4  ;;  %v753_v26 = vpack.c.bf16 %v610_v17, %v610_v17  ;;  %4256 = vmatmul.bf16.gmra.mxu2 %v3914_v42  ;;  %v1473_v2 = vshll.u32 %v6641_v1, 16  ;;  %v6669_v42 = vld [vmem:[#allocation2 + $0x8c] sm:$0x1] }
 0x1be   : > { %v2672_v48 = vsel %vm5899_vm14, %v2667_v0, %v2671_v4  ;;  %v1919_v52 = vsel %vm5899_vm14, %v1914_v37, %v6613_v28  ;;  %v1466_v41 = vrot.slane %v1464_v19, 4  ;;  %v1469_v7 = vrot.slane %v1467_v13, 5  ;;  %v2860_v0 = vld [vmem:[#allocation2 + $0x84] sm:$0xe] }
 0x1bf   : > { %v2677_v51 = vrot.slane %v2676_v56, 4  ;;  %v3587_v39 = vunpack.c.l.b16 %v2672_v48  ;;  %v975_v8 = vshrl.u32 %v753_v26, 16  ;;  %v978_v18 = vshll.u32 %v753_v26, 16  ;;  %v6667_v56 = vld [vmem:[#allocation2 + $0x88] sm:$0xf] }
 0x1c0   : > { %v1475_v12 = vrot.slane %v1473_v2, 5  ;;  %v1470_v49 = vor.u32 %v1469_v7, %v1466_v41  ;;  %v1477_v25 = vshrl.u32 %v6641_v1, 16  ;;  %v1483_v43 = vshll.u32 %v6648_v40, 16  ;;  %v669_v48 = vld [vmem:[#allocation2 + $0xa8] sm:$0x1]  ;;  %v570_v41 = vpop.f32.mrf.mxu2 }
 0x1c1   : > { %v2682_v60 = vsel %vm5899_vm14, %v2677_v51, %v2681_v27  ;;  %v1929_v28 = vsel %vm5899_vm14, %v1924_v34, %v6639_v45  ;;  %v977_v50 = vrot.slane %v975_v8, 7  ;;  %v4956_v3 = vrot.slane %v1639_v61, 9  ;;  %v3222_v34 = vpop.permute.xlu1 %3221  ;;  %v1831_v7 = vld [vmem:[#allocation2 + $0x88] sm:$0xf]  ;;  %v6681_v61 = vpop.permute.xlu0 %3447 }
 0x1c2   : > { %v3588_v4 = vunpack.c.l.b16 %v2682_v60  ;;  %v1471_v62 = vrot.slane %v1470_v49, 4  ;;  %v1479_v14 = vrot.slane %v1477_v25, 4  ;;  %v1485_v63 = vrot.slane %v1483_v43, 5 }
 0x1c3   : > { %v1756_v32 = vrot.slane %v6536_v16, 5  ;;  %v980_v35 = vor.u32 %v978_v18, %v977_v50  ;;  %v982_v37 = vrot.slane %v977_v50, 4  ;;  %v1172_v38 = vld [vmem:[#allocation2 + $0xa4] sm:$0x1]  ;;  %v1759_v24 = vrot.slane %v6546_v23, 5 }
 0x1c4   : > { %v3611_v33 = vpack.c.b16 %v3588_v4, %v3587_v39  ;;  %v1476_v27 = vsel %vm5899_vm14, %v1471_v62, %v1475_v12  ;;  %v1480_v17 = vor.u32 %v1479_v14, %v1475_v12  ;;  %v6671_v16 = vunpack.c.l.b16 %v1919_v52  ;;  %v2252_v12 = vld [vmem:[#allocation2 + $0x84] sm:$0xe]  ;;  %v1852_v4 = vld [vmem:[#allocation2 + $0x8c] sm:$0x1] }
 0x1c5   : > { %v1757_v45 = vsel %vm5809_vm8, %v4956_v3, %v1756_v32  ;;  %v1758_v59 = vrot.slane %v1756_v32, 4  ;;  %v981_v23 = vsel %vm5850_vm11, %v973_v58, %v980_v35  ;;  %v1173_v19 = vsel %vm5782_vm2, %v982_v37, %v1172_v38  ;;  %v3318_v32 = vpop.permute.xlu2 %3317 }
 0x1c6   : > { %3635 = vrot.lane.b32.xlu2 %v3611_v33, %s5609_s20  ;;  %v3187_v13 = vunpack.c.l.b16 %v1757_v45  ;;  %1171 = vst.msk [vmem:[#allocation2 + $0xa0] sm:$0xf] %vm617_vm3, %v981_v23  ;;  %v1481_v26 = vrot.slane %v1480_v17, 4  ;;  %v3109_v2 = vunpack.c.l.b16 %v1476_v27  ;;  %v4989_v52 = vrot.slane %v2860_v0, 9 }
 0x1c7   : > { %v1760_v51 = vsel %vm5809_vm8, %v1758_v59, %v1759_v24  ;;  %1174 = vst [vmem:[#allocation2 + $0xa4] sm:$0x1] %v1173_v19  ;;  %v2980_v39 = vrot.slane %v6667_v56, 5  ;;  %v2983_v8 = vrot.slane %v6669_v42, 5  ;;  %v571_v18 = vadd.f32 %v6471_v44, %v570_v41  ;;  %v5354_v24 = vld [vmem:[#allocation2 + $0x6c] sm:$0xff] }
 0x1c8   : > { %v3188_v58 = vunpack.c.l.b16 %v1760_v51  ;;  %v6686_v60 = vunpack.c.l.b16 %v1929_v28  ;;  %v1486_v49 = vsel %vm5899_vm14, %v1481_v26, %v1485_v63  ;;  %v3752_v25 = vsel %vm3748_vm0, %v6625_v46, %v3222_v34  ;;  %v1816_v63 = vld [vmem:[#allocation2 + $0x30] sm:$0xf]  ;;  %v2437_v26 = vld [vmem:[#allocation2 + $0x84] sm:$0xf] }
 0x1c9   : > { %v670_v43 = vsel %vm5782_vm2, 0, %v669_v48  ;;  %v3110_v50 = vunpack.c.l.b16 %v1486_v49  ;;  %v2981_v62 = vsel %vm5809_vm8, %v4989_v52, %v2980_v39  ;;  %v2982_v14 = vrot.slane %v2980_v39, 4 }
 0x1ca   : > { %v3211_v3 = vpack.c.b16 %v3188_v58, %v3187_v13  ;;  %671 = vst [vmem:[#allocation2 + $0xa8] sm:$0x1] %v670_v43  ;;  %v3669_v28 = vunpack.c.l.b16 %v2981_v62  ;;  %v611_v33 = vmax.f32 %v571_v18, 0.0  ;;  %v4974_v35 = vrot.slane %v2252_v12, 9  ;;  %v6709_v18 = vld [vmem:[#allocation2 + $0x58] sm:$0xf] }
 0x1cb   : > { %v2378_v37 = vrot.slane %v1831_v7, 5  ;;  %v3132_v38 = vpack.c.b16 %v3110_v50, %v3109_v2  ;;  %v2984_v46 = vsel %vm5809_vm8, %v2982_v14, %v2983_v8  ;;  %v2381_v0 = vrot.slane %v1852_v4, 5  ;;  %v3144_v50 = vpop.permute.xlu0 %3143 }
 0x1cc   : > { %3235 = vrot.lane.b32.xlu1 %v3211_v3, %s5608_s8  ;;  %v3786_v27 = vsel %vm3781_vm1, %v3752_v25, %v3318_v32  ;;  %v3670_v17 = vunpack.c.l.b16 %v2984_v46  ;;  %v754_v45 = vpack.c.bf16 %v611_v33, %v611_v33  ;;  %v1931_v13 = vshrl.u32 %v1816_v63, 16  ;;  %v5332_v33 = vld [vmem:[#allocation2 + $0x18] sm:$0xff] }
 0x1cd   : > { %v2379_v59 = vsel %vm5809_vm8, %v4974_v35, %v2378_v37  ;;  %v2380_v23 = vrot.slane %v2378_v37, 4  ;;  %4167 = vmatmul.bf16.gmra.mxu1 %v3786_v27  ;;  %3157 = vrot.lane.b32.xlu0 %v3132_v38, %s5610_s10  ;;  %v1934_v34 = vshll.u32 %v1816_v63, 16  ;;  %v1940_v48 = vshll.u32 %v6483_v53, 16  ;;  %v2861_v53 = vld [vmem:[#allocation2 + $0x90] sm:$0xe] }
 0x1ce   : > { %3331 = vrot.lane.b32.xlu2 %v5354_v24, %s5609_s20  ;;  %v3415_v19 = vunpack.c.l.b16 %v2379_v59  ;;  %v3692_v2 = vpack.c.b16 %v3670_v17, %v3669_v28  ;;  %v984_v51 = vshrl.u32 %v754_v45, 16  ;;  %v987_v52 = vshll.u32 %v754_v45, 16  ;;  %v5371_v28 = vld [vmem:[#allocation2 + $0x84] sm:$0xff] }
 0x1cf   : > { %v2382_v41 = vsel %vm5809_vm8, %v2380_v23, %v2381_v0  ;;  %v1933_v58 = vrot.slane %v1931_v13, 4  ;;  %v1936_v39 = vrot.slane %v1934_v34, 5  ;;  %v6707_v8 = vrot.slane %v1940_v48, 5  ;;  %v6727_v0 = vld [vmem:[#allocation2 + $0x94] sm:$0xf]  ;;  %v3544_v23 = vpop.permute.xlu1 %3543 }
 0x1d0   : > { %v3416_v7 = vunpack.c.l.b16 %v2382_v41  ;;  %v2016_v12 = vshrl.u32 %v6709_v18, 16  ;;  %5269 = vmatmul.msk.bf16.gmra.mxu0 %vm3699_vm15, %v3692_v2  ;;  %v6713_v49 = vrot.slane %v984_v51, 7  ;;  %v1946_v25 = vrot.slane %v1944_v54, 4  ;;  %v6722_v54 = vld [vmem:[#allocation2 + $0x5c] sm:$0x1] }
 0x1d1   : > { %v2684_v43 = vshrl.u32 %v2437_v26, 16  ;;  %v3381_v4 = vpack.c.b16 %v6686_v60, %v6671_v16  ;;  %v1175_v3 = vld [vmem:[#allocation2 + $0xa8] sm:$0xf]  ;;  %v2687_v14 = vshll.u32 %v2437_v26, 16  ;;  %v2693_v32 = vshll.u32 %v6667_v56, 16  ;;  %v572_v26 = vpop.f32.mrf.mxu2 }
 0x1d2   : > { %v3437_v62 = vpack.c.b16 %v3416_v7, %v3415_v19  ;;  %v989_v35 = vor.u32 %v987_v52, %v6713_v49  ;;  %v1937_v37 = vor.u32 %v1936_v39, %v1933_v58  ;;  %v1947_v63 = vor.u32 %v1946_v25, %v6707_v8  ;;  %v6737_v19 = vld [vmem:[#allocation2 + $0x98] sm:$0x1]  ;;  %v719_v13 = vld [vmem:[#allocation2 + $0xb0] sm:$0x1] }
 0x1d3   : > { %v2686_v38 = vrot.slane %v2684_v43, 4  ;;  %v2022_v24 = vshll.u32 %v6722_v54, 16  ;;  %v2689_v16 = vrot.slane %v2687_v14, 5  ;;  %v2695_v60 = vrot.slane %v2693_v32, 5 }
 0x1d4   : > { %v2697_v46 = vshrl.u32 %v6667_v56, 16  ;;  %3557 = vrot.lane.b32.xlu1 %v5371_v28, %s5608_s8  ;;  %v3838_v27 = vsel %vm3699_vm15, %v3381_v4, %v6681_v61  ;;  %v6732_v17 = vsel %vm3699_vm15, %v5332_v33, %v3144_v50  ;;  %v1176_v45 = vsel %vm5838_vm9, %v989_v35, %v1175_v3  ;;  %v6759_v28 = vld [vmem:[#allocation2 + $0x7c] sm:$0xf] }
 0x1d5   : > { %v2703_v59 = vshll.u32 %v6669_v42, 16  ;;  %1177 = vst [vmem:[#allocation2 + $0xa8] sm:$0xf] %v1176_v45  ;;  %3463 = vrot.lane.b32.xlu0 %v3437_v62, %s5610_s10  ;;  %v6742_v56 = vrot.slane %v1950_v57, 5  ;;  %v2690_v61 = vor.u32 %v2689_v16, %v2686_v38  ;;  %v4990_v48 = vrot.slane %v2861_v53, 9  ;;  %v3624_v57 = vpop.permute.xlu2 %3623 }
 0x1d6   : > { %v2699_v34 = vrot.slane %v2697_v46, 4  ;;  %v990_v2 = vrot.slane %v6713_v49, 4  ;;  %v6745_v51 = vrot.slane %v1937_v37, 4  ;;  %v6747_v42 = vrot.slane %v1947_v63, 4  ;;  %v6763_v63 = vld [vmem:[#allocation2 + $0x80] sm:$0x1] }
 0x1d7   : > { %v2987_v52 = vrot.slane %v6727_v0, 5  ;;  %v2691_v41 = vrot.slane %v2690_v61, 4  ;;  %v2705_v58 = vrot.slane %v2703_v59, 5  ;;  %v2990_v39 = vrot.slane %v6737_v19, 5 }
 0x1d8   : > { %v2700_v7 = vor.u32 %v2699_v34, %v2695_v60  ;;  %v573_v4 = vadd.f32 %v6471_v44, %v572_v26  ;;  %v720_v50 = vsel %vm5795_vm5, 0, %v719_v13  ;;  %v3883_v14 = vsel %vm3748_vm0, %v3838_v27, %v3544_v23  ;;  %v1640_v26 = vld [vmem:[#allocation2 + $0x6c] sm:$0xe] }
 0x1d9   : > { %v2988_v25 = vsel %vm5809_vm8, %v4990_v48, %v2987_v52  ;;  %v2989_v43 = vrot.slane %v2987_v52, 4  ;;  %v2696_v3 = vsel %vm5899_vm14, %v2691_v41, %v2695_v60  ;;  %721 = vst [vmem:[#allocation2 + $0xb0] sm:$0x1] %v720_v50  ;;  %v1488_v38 = vshrl.u32 %v1216_v36, 16 }
 0x1da   : > { %v2701_v62 = vrot.slane %v2700_v7, 4  ;;  %v3671_v32 = vunpack.c.l.b16 %v2988_v25  ;;  %v3589_v33 = vunpack.c.l.b16 %v2696_v3  ;;  %v612_v37 = vmax.f32 %v573_v4, 0.0  ;;  %v3224_v7 = vpop.permute.xlu1 %3223 }
 0x1db   : > { %v2991_v35 = vsel %vm5809_vm8, %v2989_v43, %v2990_v39  ;;  %v1943_v53 = vsel %vm5899_vm14, %v6745_v51, %v6707_v8  ;;  %v1491_v46 = vshll.u32 %v1216_v36, 16  ;;  %v1490_v59 = vrot.slane %v1488_v38, 4 }
 0x1dc   : > { %v2706_v16 = vsel %vm5899_vm14, %v2701_v62, %v2705_v58  ;;  %v3672_v60 = vunpack.c.l.b16 %v2991_v35  ;;  %v755_v45 = vpack.c.bf16 %v612_v37, %v612_v37  ;;  %v1497_v23 = vshll.u32 %v6759_v28, 16 }
 0x1dd   : > { %v3590_v27 = vunpack.c.l.b16 %v2706_v16  ;;  %v1493_v61 = vrot.slane %v1491_v46, 5  ;;  %v1501_v34 = vshrl.u32 %v6759_v28, 16  ;;  %v1507_v48 = vshll.u32 %v6763_v63, 16  ;;  %v575_v16 = vpop.f32.mrf.mxu2  ;;  %v6787_v46 = vpop.permute.xlu0 %3449 }
 0x1de   : > { %v3693_v13 = vpack.c.b16 %v3672_v60, %v3671_v32  ;;  %v992_v41 = vshrl.u32 %v755_v45, 16  ;;  %v995_v8 = vshll.u32 %v755_v45, 16  ;;  %v1499_v51 = vrot.slane %v1497_v23, 5  ;;  %v672_v60 = vld [vmem:[#allocation2 + $0xb4] sm:$0x1] }
 0x1df   : > { %v3612_v52 = vpack.c.b16 %v3590_v27, %v3589_v33  ;;  %v1953_v58 = vsel %vm5899_vm14, %v6747_v42, %v6742_v56  ;;  %v1494_v39 = vor.u32 %v1493_v61, %v1490_v59  ;;  %v1503_v36 = vrot.slane %v1501_v34, 4  ;;  %v3320_v42 = vpop.permute.xlu2 %3319  ;;  %v2253_v59 = vld [vmem:[#allocation2 + $0x90] sm:$0xe]  ;;  %v1833_v34 = vld [vmem:[#allocation2 + $0x94] sm:$0xf] }
 0x1e0   : > { %5270 = vmatmul.msk.bf16.vlgmr.msra.gmra.mxu3 %vm3699_vm15, %v3693_v13  ;;  %v3917_v25 = vsel %vm3781_vm1, %v3883_v14, %v3624_v57  ;;  %v994_v43 = vrot.slane %v992_v41, 7  ;;  %v1509_v4 = vrot.slane %v1507_v48, 5  ;;  %v4957_v50 = vrot.slane %v1640_v26, 9  ;;  %v1179_v62 = vld [vmem:[#allocation2 + $0xb0] sm:$0x1] }
 0x1e1   : > { %3637 = vrot.lane.b32.xlu2 %v3612_v52, %s5609_s20  ;;  %4261 = vmatmul.bf16.gmra.mxu2 %v3917_v25  ;;  %v1763_v3 = vrot.slane %v6641_v1, 5  ;;  %v1495_v32 = vrot.slane %v1494_v39, 4  ;;  %v1504_v33 = vor.u32 %v1503_v36, %v1499_v51  ;;  %v1766_v35 = vrot.slane %v6648_v40, 5  ;;  %v1853_v48 = vld [vmem:[#allocation2 + $0x98] sm:$0x1] }
 0x1e2   : > { %v3754_v56 = vsel %vm3748_vm0, %v6732_v17, %v3224_v7  ;;  %v997_v37 = vor.u32 %v995_v8, %v994_v43  ;;  %v999_v38 = vrot.slane %v994_v43, 4  ;;  %v576_v40 = vadd.f32 %v6471_v44, %v575_v16  ;;  %v5355_v7 = vld [vmem:[#allocation2 + $0x78] sm:$0xff] }
 0x1e3   : > { %v1764_v57 = vsel %vm5809_vm8, %v4957_v50, %v1763_v3  ;;  %v1765_v14 = vrot.slane %v1763_v3, 4  ;;  %v1500_v1 = vsel %vm5899_vm14, %v1495_v32, %v1499_v51  ;;  %v1505_v27 = vrot.slane %v1504_v33, 4 }
 0x1e4   : > { %v3189_v45 = vunpack.c.l.b16 %v1764_v57  ;;  %v998_v17 = vsel %vm5850_vm11, %v990_v2, %v997_v37  ;;  %v1180_v23 = vsel %vm5782_vm2, %v999_v38, %v1179_v62  ;;  %v3111_v13 = vunpack.c.l.b16 %v1500_v1  ;;  %v1818_v2 = vld [vmem:[#allocation2 + $0x3c] sm:$0xf]  ;;  %v2439_v37 = vld [vmem:[#allocation2 + $0x90] sm:$0xf] }
 0x1e5   : > { %v1767_v61 = vsel %vm5809_vm8, %v1765_v14, %v1766_v35  ;;  %1178 = vst.msk [vmem:[#allocation2 + $0xac] sm:$0xf] %vm617_vm3, %v998_v17  ;;  %v1510_v44 = vsel %vm5899_vm14, %v1505_v27, %v1509_v4  ;;  %v613_v52 = vmax.f32 %v576_v40, 0.0  ;;  %v673_v49 = vsel %vm5782_vm2, 0, %v672_v60  ;;  %v6815_v60 = vld [vmem:[#allocation2 + $0x68] sm:$0x1] }
 0x1e6   : > { %v3190_v26 = vunpack.c.l.b16 %v1767_v61  ;;  %v3353_v41 = vunpack.c.l.b16 %v1943_v53  ;;  %v3354_v8 = vunpack.c.l.b16 %v1953_v58  ;;  %1181 = vst [vmem:[#allocation2 + $0xb0] sm:$0x1] %v1180_v23  ;;  %v3112_v51 = vunpack.c.l.b16 %v1510_v44  ;;  %v3146_v61 = vpop.permute.xlu0 %3145 }
 0x1e7   : > { %v4975_v39 = vrot.slane %v2253_v59, 9  ;;  %674 = vst [vmem:[#allocation2 + $0xb4] sm:$0x1] %v673_v49  ;;  %v756_v25 = vpack.c.bf16 %v613_v52, %v613_v52  ;;  %v2385_v43 = vrot.slane %v1833_v34, 5  ;;  %v2388_v50 = vrot.slane %v1853_v48, 5  ;;  %v6822_v40 = vpop.permute.xlu2 %3625 }
 0x1e8   : > { %v3212_v36 = vpack.c.b16 %v3190_v26, %v3189_v45  ;;  %v3133_v3 = vpack.c.b16 %v3112_v51, %v3111_v13  ;;  %v3789_v4 = vsel %vm3781_vm1, %v3754_v56, %v3320_v42  ;;  %v1955_v62 = vshrl.u32 %v1818_v2, 16  ;;  %v6812_v56 = vld [vmem:[#allocation2 + $0x64] sm:$0xf]  ;;  %v6830_v52 = vld [vmem:[#allocation2 + $0xa0] sm:$0xf] }
 0x1e9   : > { %3333 = vrot.lane.b32.xlu2 %v5355_v7, %s5609_s20  ;;  %v1958_v32 = vshll.u32 %v1818_v2, 16  ;;  %v1001_v53 = vshrl.u32 %v756_v25, 16  ;;  %v1004_v58 = vshll.u32 %v756_v25, 16  ;;  %v2386_v33 = vsel %vm5809_vm8, %v4975_v39, %v2385_v43  ;;  %4172 = vmatmul.bf16.gmra.mxu1 %v3789_v4  ;;  %v2862_v49 = vld [vmem:[#allocation2 + $0x9c] sm:$0xe]  ;;  %v5333_v51 = vld [vmem:[#allocation2 + $0x24] sm:$0xff] }
 0x1ea   : > { %3237 = vrot.lane.b32.xlu1 %v3212_v36, %s5608_s8  ;;  %v2387_v35 = vrot.slane %v2385_v43, 4  ;;  %3159 = vrot.lane.b32.xlu0 %v3133_v3, %s5610_s10  ;;  %v3417_v38 = vunpack.c.l.b16 %v2386_v33  ;;  %v1957_v57 = vrot.slane %v1955_v62, 4  ;;  %v1964_v16 = vshll.u32 %v6500_v47, 16  ;;  %v5397_v25 = vld [vmem:[%s7700_s3 + $0x8] sm:$0xff]  ;;  %v5372_v62 = vld [vmem:[#allocation2 + $0x90] sm:$0xff]  ;;  %v577_v33 = vpop.f32.mrf.mxu2 }
 0x1eb   : > { %v1960_v14 = vrot.slane %v1958_v32, 5  ;;  %v2040_v42 = vshrl.u32 %v6812_v56, 16  ;;  %v2046_v1 = vshll.u32 %v6815_v60, 16  ;;  %v6818_v27 = vrot.slane %v1001_v53, 7  ;;  %4543 = vmatpush.bf16.msrb.mxu3 %v5397_v25 }
 0x1ec   : > { %v2389_v45 = vsel %vm5809_vm8, %v2387_v35, %v2388_v50  ;;  %v1970_v23 = vrot.slane %v1968_v21, 4  ;;  %v2708_v13 = vshrl.u32 %v2439_v37, 16  ;;  %v6827_v48 = vrot.slane %v1964_v16, 5  ;;  %v3546_v21 = vpop.permute.xlu1 %3545 }
 0x1ed   : > { %v3418_v59 = vunpack.c.l.b16 %v2389_v45  ;;  %v1961_v17 = vor.u32 %v1960_v14, %v1957_v57  ;;  %v1006_v34 = vor.u32 %v1004_v58, %v6818_v27  ;;  %v2711_v44 = vshll.u32 %v2439_v37, 16  ;;  %v1218_v57 = vld [vmem:[#allocation2 + $0x84] sm:$0xf] }
 0x1ee   : > { %v2717_v26 = vshll.u32 %v6727_v0, 16  ;;  %v3382_v2 = vpack.c.b16 %v3354_v8, %v3353_v41  ;;  %v1182_v7 = vld [vmem:[#allocation2 + $0xb4] sm:$0xf]  ;;  %v2710_v47 = vrot.slane %v2708_v13, 4  ;;  %v2721_v4 = vshrl.u32 %v6727_v0, 16 }
 0x1ef   : > { %v3438_v39 = vpack.c.b16 %v3418_v59, %v3417_v38  ;;  %v6832_v36 = vrot.slane %v1961_v17, 4  ;;  %v1183_v43 = vsel %vm5838_vm9, %v1006_v34, %v1182_v7  ;;  %v2713_v50 = vrot.slane %v2711_v44, 5  ;;  %v6840_v41 = vld [vmem:[#allocation2 + $0xa4] sm:$0x1]  ;;  %v6865_v17 = vld [vmem:[%s7701_s4] ss:$0 sm:$0xff] }
 0x1f0   : > { %v2719_v3 = vrot.slane %v2717_v26, 5  ;;  %v3841_v8 = vsel %vm3699_vm15, %v3382_v2, %v6787_v46  ;;  %v6845_v32 = vsel %vm3699_vm15, %v5333_v51, %v3146_v61  ;;  %1184 = vst [vmem:[#allocation2 + $0xb4] sm:$0xf] %v1183_v43  ;;  %v6849_v53 = vrot.slane %v1974_v31, 5  ;;  %v722_v46 = vld [vmem:[#allocation2 + $0xbc] sm:$0x1] }
 0x1f1   : > { %v2727_v58 = vshll.u32 %v6737_v19, 16  ;;  %v1971_v0 = vor.u32 %v1970_v23, %v6827_v48  ;;  %v2714_v35 = vor.u32 %v2713_v50, %v2710_v47  ;;  %v2723_v37 = vrot.slane %v2721_v4, 4  ;;  %v6876_v7 = vld [vmem:[#allocation2 + $0x88] sm:$0xf]  ;;  %v6883_v4 = vld [vmem:[#allocation2 + $0x8c] sm:$0x1] }
 0x1f2   : > { %3559 = vrot.lane.b32.xlu1 %v5372_v62, %s5608_s8  ;;  %v4991_v38 = vrot.slane %v2862_v49, 9  ;;  %v1007_v14 = vrot.slane %v6818_v27, 4  ;;  %3465 = vrot.lane.b32.xlu0 %v3438_v39, %s5610_s10  ;;  %v1967_v5 = vsel %vm5899_vm14, %v6832_v36, %v6827_v48  ;;  %v2994_v31 = vrot.slane %v6830_v52, 5  ;;  %v6878_v39 = vpop.permute.xlu2 %3321 }
 0x1f3   : > { %v2997_v19 = vrot.slane %v6840_v41, 5  ;;  %v2715_v16 = vrot.slane %v2714_v35, 4  ;;  %v2724_v45 = vor.u32 %v2723_v37, %v2719_v3  ;;  %v2729_v59 = vrot.slane %v2727_v58, 5 }
 0x1f4   : > { %v578_v23 = vadd.f32 %v6865_v17, %v577_v33  ;;  %v2995_v13 = vsel %vm5809_vm8, %v4991_v38, %v2994_v31  ;;  %v2996_v61 = vrot.slane %v2994_v31, 4  ;;  %v723_v34 = vsel %vm5795_vm5, 0, %v722_v46  ;;  %v3226_v46 = vpop.permute.xlu1 %3225 }
 0x1f5   : > { %v1512_v44 = vshrl.u32 %v1218_v57, 16  ;;  %v6872_v26 = vrot.slane %v1971_v0, 4  ;;  %v2720_v49 = vsel %vm5899_vm14, %v2715_v16, %v2719_v3  ;;  %v2725_v2 = vrot.slane %v2724_v45, 4  ;;  %724 = vst [vmem:[#allocation2 + $0xbc] sm:$0x1] %v723_v34 }
 0x1f6   : > { %v3673_v51 = vunpack.c.l.b16 %v2995_v13  ;;  %v3591_v47 = vunpack.c.l.b16 %v2720_v49  ;;  %v3885_v25 = vsel %vm3748_vm0, %v3841_v8, %v3546_v21  ;;  %v2998_v43 = vsel %vm5809_vm8, %v2996_v61, %v2997_v19  ;;  %v1641_v16 = vld [vmem:[#allocation2 + $0x78] sm:$0xe]  ;;  %v6897_v49 = vpop.permute.xlu0 %3451 }
 0x1f7   : > { %v614_v50 = vmax.f32 %v578_v23, 0.0  ;;  %v2730_v62 = vsel %vm5899_vm14, %v2725_v2, %v2729_v59  ;;  %v3674_v3 = vunpack.c.l.b16 %v2998_v43  ;;  %v1514_v58 = vrot.slane %v1512_v44, 4 }
 0x1f8   : > { %v1515_v33 = vshll.u32 %v1218_v57, 16  ;;  %v3592_v0 = vunpack.c.l.b16 %v2730_v62  ;;  %v1521_v37 = vshll.u32 %v6876_v7, 16  ;;  %v1525_v38 = vshrl.u32 %v6876_v7, 16 }
 0x1f9   : > { %v757_v35 = vpack.c.bf16 %v614_v50, %v614_v50  ;;  %v3694_v21 = vpack.c.b16 %v3674_v3, %v3673_v51  ;;  %v1531_v31 = vshll.u32 %v6883_v4, 16  ;;  %v3920_v19 = vsel %vm3781_vm1, %v3885_v25, %v6822_v40  ;;  %v580_v25 = vpop.f32.mrf.mxu2 }
 0x1fa   : > { %v1517_v8 = vrot.slane %v1515_v33, 5  ;;  %v3613_v45 = vpack.c.b16 %v3592_v0, %v3591_v47  ;;  %v1523_v13 = vrot.slane %v1521_v37, 5  ;;  %4266 = vmatmul.bf16.gmra.mxu2 %v3920_v19  ;;  %v1977_v57 = vsel %vm5899_vm14, %v6872_v26, %v6849_v53 }
 0x1fb   : > { %v1009_v59 = vshrl.u32 %v757_v35, 16  ;;  %v1012_v23 = vshll.u32 %v757_v35, 16  ;;  %5271 = vmatmul.msk.bf16.gmra.mxu3 %vm3699_vm15, %v3694_v21  ;;  %v1527_v34 = vrot.slane %v1525_v38, 4  ;;  %v1533_v44 = vrot.slane %v1531_v31, 5  ;;  %v675_v35 = vld [vmem:[#allocation2 + $0xc0] sm:$0x1] }
 0x1fc   : > { %v1518_v61 = vor.u32 %v1517_v8, %v1514_v58  ;;  %3639 = vrot.lane.b32.xlu2 %v3613_v45, %s5609_s20  ;;  %v4958_v2 = vrot.slane %v1641_v16, 9  ;;  %v1770_v51 = vrot.slane %v6759_v28, 5  ;;  %v1773_v47 = vrot.slane %v6763_v63, 5  ;;  %v1186_v43 = vld [vmem:[#allocation2 + $0xbc] sm:$0x1]  ;;  %v6909_v8 = vpop.permute.xlu2 %3627 }
 0x1fd   : > { %v1011_v40 = vrot.slane %v1009_v59, 7  ;;  %v1528_v62 = vor.u32 %v1527_v34, %v1523_v13  ;;  %v3756_v53 = vsel %vm3748_vm0, %v6845_v32, %v3226_v46  ;;  %v581_v26 = vadd.f32 %v6865_v17, %v580_v25  ;;  %v2254_v21 = vld [vmem:[#allocation2 + $0x9c] sm:$0xe]  ;;  %v1835_v16 = vld [vmem:[#allocation2 + $0xa0] sm:$0xf] }
 0x1fe   : > { %v1519_v50 = vrot.slane %v1518_v61, 4  ;;  %v1771_v33 = vsel %vm5809_vm8, %v4958_v2, %v1770_v51  ;;  %v1772_v0 = vrot.slane %v1770_v51, 4  ;;  %v1820_v45 = vld [vmem:[#allocation2 + $0x48] sm:$0xf]  ;;  %v676_v27 = vsel %vm5782_vm2, 0, %v675_v35 }
 0x1ff   : > { %v1014_v3 = vor.u32 %v1012_v23, %v1011_v40  ;;  %v1016_v58 = vrot.slane %v1011_v40, 4  ;;  %v1529_v63 = vrot.slane %v1528_v62, 4  ;;  %v3191_v37 = vunpack.c.l.b16 %v1771_v33  ;;  %v5356_v2 = vld [vmem:[#allocation2 + $0x84] sm:$0xff]  ;;  %677 = vst [vmem:[#allocation2 + $0xc0] sm:$0x1] %v676_v27 }
 0x200   : > { %v1524_v28 = vsel %vm5899_vm14, %v1519_v50, %v1523_v13  ;;  %v615_v38 = vmax.f32 %v581_v26, 0.0  ;;  %v1774_v19 = vsel %vm5809_vm8, %v1772_v0, %v1773_v47  ;;  %v3355_v61 = vunpack.c.l.b16 %v1967_v5  ;;  %v6929_v47 = vpop.permute.xlu1 %3547  ;;  %v2441_v33 = vld [vmem:[#allocation2 + $0x9c] sm:$0xf]  ;;  %v3148_v0 = vpop.permute.xlu0 %3147  ;;  %v6953_v27 = vld [vmem:[#allocation2 + $0xac] sm:$0xf] }
 0x201   : > { %v1015_v32 = vsel %vm5850_vm11, %v1007_v14, %v1014_v3  ;;  %v1187_v46 = vsel %vm5782_vm2, %v1016_v58, %v1186_v43  ;;  %v3113_v31 = vunpack.c.l.b16 %v1524_v28  ;;  %v1534_v59 = vsel %vm5899_vm14, %v1529_v63, %v1533_v44  ;;  %v1854_v14 = vld [vmem:[#allocation2 + $0xa4] sm:$0x1] }
 0x202   : > { %1185 = vst.msk [vmem:[#allocation2 + $0xb8] sm:$0xf] %vm617_vm3, %v1015_v32  ;;  %v3192_v23 = vunpack.c.l.b16 %v1774_v19  ;;  %v758_v13 = vpack.c.bf16 %v615_v38, %v615_v38  ;;  %v3356_v34 = vunpack.c.l.b16 %v1977_v57  ;;  %v3114_v40 = vunpack.c.l.b16 %v1534_v59 }
 0x203   : > { %1188 = vst [vmem:[#allocation2 + $0xbc] sm:$0x1] %v1187_v46  ;;  %v4976_v51 = vrot.slane %v2254_v21, 9  ;;  %v2392_v50 = vrot.slane %v1835_v16, 5  ;;  %v2395_v26 = vrot.slane %v1854_v14, 5  ;;  %v3792_v48 = vsel %vm3781_vm1, %v3756_v53, %v6878_v39 }
 0x204   : > { %v3213_v44 = vpack.c.b16 %v3192_v23, %v3191_v37  ;;  %v1018_v25 = vshrl.u32 %v758_v13, 16  ;;  %v1021_v43 = vshll.u32 %v758_v13, 16  ;;  %v3134_v62 = vpack.c.b16 %v3114_v40, %v3113_v31  ;;  %3335 = vrot.lane.b32.xlu2 %v5356_v2, %s5609_s20  ;;  %4177 = vmatmul.bf16.gmra.mxu1 %v3792_v48  ;;  %v6943_v53 = vld [vmem:[#allocation2 + $0x70] sm:$0xf]  ;;  %v6955_v13 = vpop.permute.xlu2 %3323 }
 0x205   : > { %v1979_v36 = vshrl.u32 %v1820_v45, 16  ;;  %v2393_v57 = vsel %vm5809_vm8, %v4976_v51, %v2392_v50  ;;  %v2394_v3 = vrot.slane %v2392_v50, 4  ;;  %v1982_v58 = vshll.u32 %v1820_v45, 16  ;;  %v5334_v45 = vld [vmem:[#allocation2 + $0x30] sm:$0xff]  ;;  %v2863_v51 = vld [vmem:[#allocation2 + $0xa8] sm:$0xe] }
 0x206   : > { %3239 = vrot.lane.b32.xlu1 %v3213_v44, %s5608_s8  ;;  %v6935_v5 = vrot.slane %v1018_v25, 7  ;;  %3161 = vrot.lane.b32.xlu0 %v3134_v62, %s5610_s10  ;;  %v3419_v35 = vunpack.c.l.b16 %v2393_v57  ;;  %v1988_v63 = vshll.u32 %v6604_v30, 16  ;;  %v1994_v39 = vrot.slane %v1992_v10, 4  ;;  %v1189_v14 = vld [vmem:[#allocation2 + $0xc0] sm:$0xf] }
 0x207   : > { %v1981_v28 = vrot.slane %v1979_v36, 4  ;;  %v2064_v37 = vshrl.u32 %v6943_v53, 16  ;;  %v2396_v21 = vsel %vm5809_vm8, %v2394_v3, %v2395_v26  ;;  %v1984_v32 = vrot.slane %v1982_v58, 5  ;;  %v6959_v44 = vld [vmem:[#allocation2 + $0x74] sm:$0x1]  ;;  %v5373_v62 = vld [vmem:[#allocation2 + $0x9c] sm:$0xff] }
 0x208   : > { %v1023_v38 = vor.u32 %v1021_v43, %v6935_v5  ;;  %v3383_v46 = vpack.c.b16 %v3356_v34, %v3355_v61  ;;  %v3420_v31 = vunpack.c.l.b16 %v2396_v21  ;;  %v6949_v19 = vrot.slane %v1988_v63, 5  ;;  %v6964_v26 = vld [vmem:[#allocation2 + $0xb0] sm:$0x1]  ;;  %v6975_v3 = vpop.permute.xlu1 %3227 }
 0x209   : > { %v2732_v16 = vshrl.u32 %v2441_v33, 16  ;;  %v1985_v59 = vor.u32 %v1984_v32, %v1981_v28  ;;  %v2735_v23 = vshll.u32 %v2441_v33, 16  ;;  %v2741_v30 = vshll.u32 %v6830_v52, 16  ;;  %v582_v28 = vpop.f32.mrf.mxu2 }
 0x20a   : > { %v2745_v10 = vshrl.u32 %v6830_v52, 16  ;;  %v3439_v40 = vpack.c.b16 %v3420_v31, %v3419_v35  ;;  %v1995_v2 = vor.u32 %v1994_v39, %v6949_v19  ;;  %v2751_v34 = vshll.u32 %v6840_v41, 16  ;;  %v6985_v31 = vpop.permute.xlu0 %3453 }
 0x20b   : > { %v2734_v61 = vrot.slane %v2732_v16, 4  ;;  %v2070_v25 = vshll.u32 %v6959_v44, 16  ;;  %v1190_v43 = vsel %vm5838_vm9, %v1023_v38, %v1189_v14  ;;  %v2737_v52 = vrot.slane %v2735_v23, 5  ;;  %v6997_v14 = vld [vmem:[#allocation2 + $0x94] sm:$0xf] }
 0x20c   : > { %v2743_v50 = vrot.slane %v2741_v30, 5  ;;  %v3844_v48 = vsel %vm3699_vm15, %v3383_v46, %v6897_v49  ;;  %v6969_v36 = vsel %vm3699_vm15, %v5334_v45, %v3148_v0  ;;  %1191 = vst [vmem:[#allocation2 + $0xc0] sm:$0xf] %v1190_v43  ;;  %v6973_v41 = vrot.slane %v1998_v11, 5  ;;  %v725_v49 = vld [vmem:[#allocation2 + $0xc8] sm:$0x1] }
 0x20d   : > { %v2747_v57 = vrot.slane %v2745_v10, 4  ;;  %v1986_v55 = vrot.slane %v1985_v59, 4  ;;  %v2738_v58 = vor.u32 %v2737_v52, %v2734_v61  ;;  %v4992_v33 = vrot.slane %v2863_v51, 9  ;;  %v1220_v11 = vld [vmem:[#allocation2 + $0x90] sm:$0xf] }
 0x20e   : > { %3561 = vrot.lane.b32.xlu1 %v5373_v62, %s5608_s8  ;;  %v3001_v35 = vrot.slane %v6953_v27, 5  ;;  %3467 = vrot.lane.b32.xlu0 %v3439_v40, %s5610_s10  ;;  %v1996_v0 = vrot.slane %v1995_v2, 4  ;;  %v2753_v39 = vrot.slane %v2751_v34, 5  ;;  %v3004_v9 = vrot.slane %v6964_v26, 5  ;;  %v7001_v34 = vld [vmem:[#allocation2 + $0x98] sm:$0x1] }
 0x20f   : > { %v2748_v63 = vor.u32 %v2747_v57, %v2743_v50  ;;  %v2739_v38 = vrot.slane %v2738_v58, 4  ;;  %v3887_v21 = vsel %vm3748_vm0, %v3844_v48, %v6929_v47  ;;  %v583_v59 = vadd.f32 %v6865_v17, %v582_v28  ;;  %v1642_v58 = vld [vmem:[#allocation2 + $0x84] sm:$0xe] }
 0x210   : > { %v3002_v32 = vsel %vm5809_vm8, %v4992_v33, %v3001_v35  ;;  %v3003_v46 = vrot.slane %v3001_v35, 4  ;;  %v726_v23 = vsel %vm5795_vm5, 0, %v725_v49  ;;  %v1991_v30 = vsel %vm5899_vm14, %v1986_v55, %v6949_v19 }
 0x211   : > { %v2749_v16 = vrot.slane %v2748_v63, 4  ;;  %v3675_v45 = vunpack.c.l.b16 %v3002_v32  ;;  %v2744_v47 = vsel %vm5899_vm14, %v2739_v38, %v2743_v50  ;;  %727 = vst [vmem:[#allocation2 + $0xc8] sm:$0x1] %v726_v23  ;;  %v1536_v40 = vshrl.u32 %v1220_v11, 16  ;;  %v7006_v50 = vpop.permute.xlu2 %3629 }
 0x212   : > { %v3005_v10 = vsel %vm5809_vm8, %v3003_v46, %v3004_v9  ;;  %v3593_v2 = vunpack.c.l.b16 %v2744_v47  ;;  %v616_v61 = vmax.f32 %v583_v59, 0.0  ;;  %v2001_v19 = vsel %vm5899_vm14, %v1996_v0, %v6973_v41  ;;  %v7014_v9 = vpop.permute.xlu1 %3549  ;;  %v2255_v59 = vld [vmem:[#allocation2 + $0xa8] sm:$0xe] }
 0x213   : > { %v2754_v17 = vsel %vm5899_vm14, %v2749_v16, %v2753_v39  ;;  %v3676_v20 = vunpack.c.l.b16 %v3005_v10  ;;  %v1538_v43 = vrot.slane %v1536_v40, 4  ;;  %v1539_v52 = vshll.u32 %v1220_v11, 16 }
 0x214   : > { %v3594_v51 = vunpack.c.l.b16 %v2754_v17  ;;  %v759_v48 = vpack.c.bf16 %v616_v61, %v616_v61  ;;  %v1545_v57 = vshll.u32 %v6997_v14, 16  ;;  %v1549_v55 = vshrl.u32 %v6997_v14, 16 }
 0x215   : > { %v3695_v62 = vpack.c.b16 %v3676_v20, %v3675_v45  ;;  %v1541_v35 = vrot.slane %v1539_v52, 5  ;;  %v1555_v28 = vshll.u32 %v7001_v34, 16  ;;  %v3923_v49 = vsel %vm3781_vm1, %v3887_v21, %v6909_v8  ;;  %v7027_v20 = vpop.permute.xlu0 %3149 }
 0x216   : > { %v3614_v33 = vpack.c.b16 %v3594_v51, %v3593_v2  ;;  %v1026_v41 = vshrl.u32 %v759_v48, 16  ;;  %v1029_v0 = vshll.u32 %v759_v48, 16  ;;  %v1547_v63 = vrot.slane %v1545_v57, 5  ;;  %4271 = vmatmul.bf16.gmra.mxu2 %v3923_v49  ;;  %v1855_v51 = vld [vmem:[#allocation2 + $0xb0] sm:$0x1] }
 0x217   : > { %5272 = vmatmul.msk.bf16.gmra.mxu3 %vm3699_vm15, %v3695_v62  ;;  %v1551_v39 = vrot.slane %v1549_v55, 4  ;;  %v1024_v11 = vrot.slane %v6935_v5, 4  ;;  %v7017_v38 = vunpack.c.l.b16 %v1991_v30  ;;  %v1542_v32 = vor.u32 %v1541_v35, %v1538_v43  ;;  %v1822_v62 = vld [vmem:[#allocation2 + $0x54] sm:$0xf] }
 0x218   : > { %3641 = vrot.lane.b32.xlu2 %v3614_v33, %s5609_s20  ;;  %v4959_v46 = vrot.slane %v1642_v58, 9  ;;  %v1028_v16 = vrot.slane %v1026_v41, 7  ;;  %v1557_v8 = vrot.slane %v1555_v28, 5  ;;  %v1777_v21 = vrot.slane %v6876_v7, 5  ;;  %v1193_v47 = vld [vmem:[#allocation2 + $0xc8] sm:$0x1] }
 0x219   : > { %v1552_v45 = vor.u32 %v1551_v39, %v1547_v63  ;;  %v7021_v23 = vunpack.c.l.b16 %v2001_v19  ;;  %v1543_v10 = vrot.slane %v1542_v32, 4  ;;  %v1780_v40 = vrot.slane %v6883_v4, 5  ;;  %v1837_v7 = vld [vmem:[#allocation2 + $0xac] sm:$0xf]  ;;  %v5357_v58 = vld [vmem:[#allocation2 + $0x90] sm:$0xff]  ;;  %v7042_v49 = vpop.permute.xlu2 %3325 }
 0x21a   : > { %v3758_v5 = vsel %vm3748_vm0, %v6969_v36, %v6975_v3  ;;  %v1031_v30 = vor.u32 %v1029_v0, %v1028_v16  ;;  %v1033_v17 = vrot.slane %v1028_v16, 4  ;;  %v1778_v61 = vsel %vm5809_vm8, %v4959_v46, %v1777_v21  ;;  %v2443_v46 = vld [vmem:[#allocation2 + $0xa8] sm:$0xf] }
 0x21b   : > { %v1553_v2 = vrot.slane %v1552_v45, 4  ;;  %v1548_v19 = vsel %vm5899_vm14, %v1543_v10, %v1547_v63  ;;  %v1779_v43 = vrot.slane %v1777_v21, 4  ;;  %v3193_v52 = vunpack.c.l.b16 %v1778_v61 }
 0x21c   : > { %v4977_v4 = vrot.slane %v2255_v59, 9  ;;  %v1032_v36 = vsel %vm5850_vm11, %v1024_v11, %v1031_v30  ;;  %v1194_v3 = vsel %vm5782_vm2, %v1033_v17, %v1193_v47  ;;  %v3115_v57 = vunpack.c.l.b16 %v1548_v19  ;;  %v7060_v17 = vld [vmem:[#allocation2 + $0xb8] sm:$0xf]  ;;  %v2864_v19 = vld [vmem:[#allocation2 + $0xb4] sm:$0xe] }
 0x21d   : > { %v1558_v48 = vsel %vm5899_vm14, %v1553_v2, %v1557_v8  ;;  %1192 = vst.msk [vmem:[#allocation2 + $0xc4] sm:$0xf] %vm617_vm3, %v1032_v36  ;;  %v1781_v33 = vsel %vm5809_vm8, %v1779_v43, %v1780_v40  ;;  %v2399_v35 = vrot.slane %v1837_v7, 5  ;;  %v2402_v28 = vrot.slane %v1855_v51, 5 }
 0x21e   : > { %v3116_v55 = vunpack.c.l.b16 %v1558_v48  ;;  %1195 = vst [vmem:[#allocation2 + $0xc8] sm:$0x1] %v1194_v3  ;;  %v3194_v6 = vunpack.c.l.b16 %v1781_v33  ;;  %v3795_v15 = vsel %vm3781_vm1, %v3758_v5, %v6955_v13  ;;  %v2003_v41 = vshrl.u32 %v1822_v62, 16  ;;  %v7052_v13 = vpop.permute.xlu1 %3229 }
 0x21f   : > { %v2006_v0 = vshll.u32 %v1822_v62, 16  ;;  %v2400_v39 = vsel %vm5809_vm8, %v4977_v4, %v2399_v35  ;;  %v2401_v11 = vrot.slane %v2399_v35, 4  ;;  %4182 = vmatmul.bf16.gmra.mxu1 %v3795_v15  ;;  %v2012_v32 = vshll.u32 %v6709_v18, 16  ;;  %v7069_v62 = vld [vmem:[#allocation2 + $0xbc] sm:$0x1] }
 0x220   : > { %v3135_v63 = vpack.c.b16 %v3116_v55, %v3115_v57  ;;  %3337 = vrot.lane.b32.xlu2 %v5357_v58, %s5609_s20  ;;  %v3384_v16 = vpack.c.b16 %v7021_v23, %v7017_v38  ;;  %v3214_v45 = vpack.c.b16 %v3194_v6, %v3193_v52  ;;  %v2005_v8 = vrot.slane %v2003_v41, 4  ;;  %v1222_v55 = vld [vmem:[#allocation2 + $0x9c] sm:$0xf] }
 0x221   : > { %v2008_v21 = vrot.slane %v2006_v0, 5  ;;  %v2403_v59 = vsel %vm5809_vm8, %v2401_v11, %v2402_v28  ;;  %v3421_v47 = vunpack.c.l.b16 %v2400_v39  ;;  %v2014_v10 = vrot.slane %v2012_v32, 5  ;;  %v7078_v6 = vpop.permute.xlu2 %3631  ;;  %v5374_v0 = vld [vmem:[#allocation2 + $0xa8] sm:$0xff] }
 0x222   : > { %3163 = vrot.lane.b32.xlu0 %v3135_v63, %s5610_s10  ;;  %v2018_v40 = vrot.slane %v2016_v12, 4  ;;  %3241 = vrot.lane.b32.xlu1 %v3214_v45, %s5608_s8  ;;  %v3422_v5 = vunpack.c.l.b16 %v2403_v59  ;;  %v2756_v38 = vshrl.u32 %v2443_v46, 16  ;;  %v2759_v23 = vshll.u32 %v2443_v46, 16  ;;  %v7067_v12 = vpop.permute.xlu0 %3455 }
 0x223   : > { %v2009_v30 = vor.u32 %v2008_v21, %v2005_v8  ;;  %v2765_v61 = vshll.u32 %v6953_v27, 16  ;;  %v2769_v7 = vshrl.u32 %v6953_v27, 16  ;;  %v2775_v51 = vshll.u32 %v6964_v26, 16  ;;  %v7093_v21 = vld [vmem:[#allocation2 + $0xa4] sm:$0x1] }
 0x224   : > { %v2019_v2 = vor.u32 %v2018_v40, %v2014_v10  ;;  %v2024_v18 = vrot.slane %v2022_v24, 5  ;;  %v2758_v52 = vrot.slane %v2756_v38, 4  ;;  %v2761_v4 = vrot.slane %v2759_v23, 5 }
 0x225   : > { %v2010_v43 = vrot.slane %v2009_v30, 4  ;;  %v3440_v36 = vpack.c.b16 %v3422_v5, %v3421_v47  ;;  %v2767_v48 = vrot.slane %v2765_v61, 5  ;;  %v2771_v57 = vrot.slane %v2769_v7, 4  ;;  %v1643_v7 = vld [vmem:[#allocation2 + $0x90] sm:$0xe] }
 0x226   : > { %v2020_v3 = vrot.slane %v2019_v2, 4  ;;  %v3847_v27 = vsel %vm3699_vm15, %v3384_v16, %v6985_v31  ;;  %v2762_v26 = vor.u32 %v2761_v4, %v2758_v52  ;;  %v2777_v58 = vrot.slane %v2775_v51, 5  ;;  %v7095_v47 = vpop.permute.xlu1 %3551  ;;  %v5335_v51 = vld [vmem:[#allocation2 + $0x3c] sm:$0xff] }
 0x227   : > { %v4993_v33 = vrot.slane %v2864_v19, 9  ;;  %v2015_v54 = vsel %vm5899_vm14, %v2010_v43, %v2014_v10  ;;  %v2772_v24 = vor.u32 %v2771_v57, %v2767_v48  ;;  %v3889_v35 = vsel %vm3748_vm0, %v3847_v27, %v7014_v9  ;;  %v7086_v9 = vld [vmem:[#allocation2 + $0xa0] sm:$0xf]  ;;  %v7108_v4 = vld [vmem:[#allocation2 + $0x7c] sm:$0xf] }
 0x228   : > { %v3008_v28 = vrot.slane %v7060_v17, 5  ;;  %v2025_v15 = vsel %vm5899_vm14, %v2020_v3, %v2024_v18  ;;  %v2763_v41 = vrot.slane %v2762_v26, 4  ;;  %v3011_v31 = vrot.slane %v7069_v62, 5  ;;  %v2256_v27 = vld [vmem:[#allocation2 + $0xb4] sm:$0xe] }
 0x229   : > { %v1560_v63 = vshrl.u32 %v1222_v55, 16  ;;  %v2773_v39 = vrot.slane %v2772_v24, 4  ;;  %v1563_v46 = vshll.u32 %v1222_v55, 16  ;;  %v7088_v16 = vunpack.c.l.b16 %v2015_v54  ;;  %v1839_v24 = vld [vmem:[#allocation2 + $0xb8] sm:$0xf] }
 0x22a   : > { %3469 = vrot.lane.b32.xlu0 %v3440_v36, %s5610_s10  ;;  %v3009_v11 = vsel %vm5809_vm8, %v4993_v33, %v3008_v28  ;;  %v3010_v32 = vrot.slane %v3008_v28, 4  ;;  %v2768_v45 = vsel %vm5899_vm14, %v2763_v41, %v2767_v48  ;;  %3563 = vrot.lane.b32.xlu1 %v5374_v0, %s5608_s8  ;;  %v7101_v38 = vunpack.c.l.b16 %v2025_v15  ;;  %v7111_v55 = vpop.permute.xlu0 %3151  ;;  %v1856_v41 = vld [vmem:[#allocation2 + $0xbc] sm:$0x1] }
 0x22b   : > { %v3677_v8 = vunpack.c.l.b16 %v3009_v11  ;;  %v1562_v59 = vrot.slane %v1560_v63, 4  ;;  %v2778_v10 = vsel %vm5899_vm14, %v2773_v39, %v2777_v58  ;;  %v3595_v40 = vunpack.c.l.b16 %v2768_v45  ;;  %v1824_v39 = vld [vmem:[#allocation2 + $0x60] sm:$0xf]  ;;  %v7125_v11 = vpop.permute.xlu2 %3327 }
 0x22c   : > { %v3012_v5 = vsel %vm5809_vm8, %v3010_v32, %v3011_v31  ;;  %v1565_v30 = vrot.slane %v1563_v46, 5  ;;  %v3596_v23 = vunpack.c.l.b16 %v2778_v10  ;;  %v1569_v61 = vshll.u32 %v7086_v9, 16 }
 0x22d   : > { %v3678_v2 = vunpack.c.l.b16 %v3012_v5  ;;  %v1573_v43 = vshrl.u32 %v7086_v9, 16  ;;  %v1579_v18 = vshll.u32 %v7093_v21, 16  ;;  %v3926_v52 = vsel %vm3781_vm1, %v3889_v35, %v7006_v50 }
 0x22e   : > { %v1566_v19 = vor.u32 %v1565_v30, %v1562_v59  ;;  %v2088_v36 = vshrl.u32 %v7108_v4, 16  ;;  %v3615_v3 = vpack.c.b16 %v3596_v23, %v3595_v40  ;;  %v1571_v57 = vrot.slane %v1569_v61, 5  ;;  %4276 = vmatmul.bf16.gmra.mxu2 %v3926_v52  ;;  %v7135_v30 = vpop.permute.xlu1 %3231 }
 0x22f   : > { %v3696_v48 = vpack.c.b16 %v3678_v2, %v3677_v8  ;;  %v3717_v26 = vsel %vm3699_vm15, %v5335_v51, %v7027_v20  ;;  %v1575_v33 = vrot.slane %v1573_v43, 4  ;;  %v4960_v54 = vrot.slane %v1643_v7, 9  ;;  %v2445_v7 = vld [vmem:[#allocation2 + $0xb4] sm:$0xf] }
 0x230   : > { %v1567_v58 = vrot.slane %v1566_v19, 4  ;;  %v3385_v50 = vpack.c.b16 %v7101_v38, %v7088_v16  ;;  %3643 = vrot.lane.b32.xlu2 %v3615_v3, %s5609_s20  ;;  %v1784_v35 = vrot.slane %v6997_v14, 5  ;;  %v1787_v28 = vrot.slane %v7001_v34, 5 }
 0x231   : > { %5273 = vmatmul.msk.bf16.gmra.mxu3 %vm3699_vm15, %v3696_v48  ;;  %v3760_v15 = vsel %vm3748_vm0, %v3717_v26, %v7052_v13  ;;  %v1576_v0 = vor.u32 %v1575_v33, %v1571_v57  ;;  %v1581_v31 = vrot.slane %v1579_v18, 5  ;;  %v4978_v63 = vrot.slane %v2256_v27, 9 }
 0x232   : > { %v1572_v20 = vsel %vm5899_vm14, %v1567_v58, %v1571_v57  ;;  %v1785_v46 = vsel %vm5809_vm8, %v4960_v54, %v1784_v35  ;;  %v1786_v14 = vrot.slane %v1784_v35, 4  ;;  %v2406_v16 = vrot.slane %v1839_v24, 5  ;;  %v7147_v33 = vpop.permute.xlu0 %3457  ;;  %v7149_v24 = vld [vmem:[#allocation2 + $0xc4] sm:$0xf] }
 0x233   : > { %v3117_v32 = vunpack.c.l.b16 %v1572_v20  ;;  %v1577_v34 = vrot.slane %v1576_v0, 4  ;;  %v3195_v45 = vunpack.c.l.b16 %v1785_v46  ;;  %v2409_v8 = vrot.slane %v1856_v41, 5  ;;  %v5396_v35 = vld [vmem:[%s7700_s3] sm:$0xff]  ;;  %v7163_v46 = vpop.permute.xlu2 %3633 }
 0x234   : > { %v3798_v13 = vsel %vm3781_vm1, %v3760_v15, %v7042_v49  ;;  %v1788_v59 = vsel %vm5809_vm8, %v1786_v14, %v1787_v28  ;;  %v2407_v10 = vsel %vm5809_vm8, %v4978_v63, %v2406_v16  ;;  %v2408_v40 = vrot.slane %v2406_v16, 4  ;;  %v5358_v49 = vld [vmem:[#allocation2 + $0x9c] sm:$0xff]  ;;  %4544 = vmatpush.bf16.msrb.mxu3 %v5396_v35 }
 0x235   : > { %4187 = vmatmul.bf16.gmra.mxu1 %v3798_v13  ;;  %v2027_v5 = vshrl.u32 %v1824_v39, 16  ;;  %v1582_v38 = vsel %vm5899_vm14, %v1577_v34, %v1581_v31  ;;  %v3196_v23 = vunpack.c.l.b16 %v1788_v59  ;;  %v3423_v2 = vunpack.c.l.b16 %v2407_v10  ;;  %v2865_v28 = vld [vmem:[#allocation2 + $0xc0] sm:$0xe]  ;;  %v7161_v31 = vld [vmem:[#allocation2 + $0xc8] sm:$0x1] }
 0x236   : > { %v2030_v61 = vshll.u32 %v1824_v39, 16  ;;  %v3118_v51 = vunpack.c.l.b16 %v1582_v38  ;;  %v2410_v19 = vsel %vm5809_vm8, %v2408_v40, %v2409_v8  ;;  %v2036_v18 = vshll.u32 %v6812_v56, 16 }
 0x237   : > { %v2029_v43 = vrot.slane %v2027_v5, 4  ;;  %v3215_v52 = vpack.c.b16 %v3196_v23, %v3195_v45  ;;  %v3424_v3 = vunpack.c.l.b16 %v2410_v19  ;;  %v2042_v57 = vrot.slane %v2040_v42, 4  ;;  %v7173_v5 = vld [vmem:[#allocation2 + $0xac] sm:$0xf]  ;;  %v7175_v23 = vpop.permute.xlu1 %3553 }
 0x238   : > { %v2032_v48 = vrot.slane %v2030_v61, 5  ;;  %v3850_v27 = vsel %vm3699_vm15, %v3385_v50, %v7067_v12  ;;  %v3136_v26 = vpack.c.b16 %v3118_v51, %v3117_v32  ;;  %3339 = vrot.lane.b32.xlu2 %v5358_v49, %s5609_s20  ;;  %v2038_v58 = vrot.slane %v2036_v18, 5  ;;  %v5375_v61 = vld [vmem:[#allocation2 + $0xb4] sm:$0xff] }
 0x239   : > { %v2780_v54 = vshrl.u32 %v2445_v7, 16  ;;  %3243 = vrot.lane.b32.xlu1 %v3215_v52, %s5608_s8  ;;  %v2048_v42 = vrot.slane %v2046_v1, 5  ;;  %v2783_v12 = vshll.u32 %v2445_v7, 16  ;;  %v2789_v50 = vshll.u32 %v7060_v17, 16  ;;  %v1224_v1 = vld [vmem:[#allocation2 + $0xa8] sm:$0xf] }
 0x23a   : > { %v2033_v56 = vor.u32 %v2032_v48, %v2029_v43  ;;  %3165 = vrot.lane.b32.xlu0 %v3136_v26, %s5610_s10  ;;  %v2043_v15 = vor.u32 %v2042_v57, %v2038_v58  ;;  %v2793_v20 = vshrl.u32 %v7060_v17, 16  ;;  %v2799_v0 = vshll.u32 %v7069_v62, 16  ;;  %v7184_v57 = vld [vmem:[#allocation2 + $0xb0] sm:$0x1] }
 0x23b   : > { %v2782_v41 = vrot.slane %v2780_v54, 4  ;;  %v3441_v63 = vpack.c.b16 %v3424_v3, %v3423_v2  ;;  %v2785_v32 = vrot.slane %v2783_v12, 5  ;;  %v2791_v60 = vrot.slane %v2789_v50, 5  ;;  %v7192_v12 = vld [vmem:[#allocation2 + $0x80] sm:$0x1] }
 0x23c   : > { %v2034_v39 = vrot.slane %v2033_v56, 4  ;;  %v2044_v14 = vrot.slane %v2043_v15, 4  ;;  %v2795_v16 = vrot.slane %v2793_v20, 4  ;;  %v3891_v34 = vsel %vm3748_vm0, %v3850_v27, %v7095_v47  ;;  %v7190_v56 = vpop.permute.xlu0 %3153  ;;  %v5336_v20 = vld [vmem:[#allocation2 + $0x48] sm:$0xff] }
 0x23d   : > { %v4994_v45 = vrot.slane %v2865_v28, 9  ;;  %v2786_v62 = vor.u32 %v2785_v32, %v2782_v41  ;;  %v3015_v8 = vrot.slane %v7149_v24, 5  ;;  %v3018_v13 = vrot.slane %v7161_v31, 5 }
 0x23e   : > { %v2039_v17 = vsel %vm5899_vm14, %v2034_v39, %v2038_v58  ;;  %v2049_v59 = vsel %vm5899_vm14, %v2044_v14, %v2048_v42  ;;  %v2796_v10 = vor.u32 %v2795_v16, %v2791_v60  ;;  %v2801_v40 = vrot.slane %v2799_v0, 5  ;;  %v1644_v42 = vld [vmem:[#allocation2 + $0x9c] sm:$0xe] }
 0x23f   : > { %v1584_v38 = vshrl.u32 %v1224_v1, 16  ;;  %v3361_v47 = vunpack.c.l.b16 %v2039_v17  ;;  %v2787_v2 = vrot.slane %v2786_v62, 4  ;;  %v3016_v7 = vsel %vm5809_vm8, %v4994_v45, %v3015_v8  ;;  %v2257_v45 = vld [vmem:[#allocation2 + $0xc0] sm:$0xe]  ;;  %v7201_v62 = vpop.permute.xlu2 %3329 }
 0x240   : > { %v3017_v51 = vrot.slane %v3015_v8, 4  ;;  %v2797_v49 = vrot.slane %v2796_v10, 4  ;;  %v3679_v19 = vunpack.c.l.b16 %v3016_v7  ;;  %v1587_v18 = vshll.u32 %v1224_v1, 16  ;;  %v7206_v10 = vld [vmem:[#allocation2 + $0xc4] sm:$0xf] }
 0x241   : > { %v1586_v43 = vrot.slane %v1584_v38, 4  ;;  %v3362_v52 = vunpack.c.l.b16 %v2049_v59  ;;  %v2792_v3 = vsel %vm5899_vm14, %v2787_v2, %v2791_v60  ;;  %3565 = vrot.lane.b32.xlu1 %v5375_v61, %s5608_s8  ;;  %v1593_v27 = vshll.u32 %v7173_v5, 16  ;;  %v7219_v2 = vpop.f32.mrf.mxu0 }
 0x242   : > { %v3019_v48 = vsel %vm5809_vm8, %v3017_v51, %v3018_v13  ;;  %3471 = vrot.lane.b32.xlu0 %v3441_v63, %s5610_s10  ;;  %v2802_v26 = vsel %vm5899_vm14, %v2797_v49, %v2801_v40  ;;  %v3597_v58 = vunpack.c.l.b16 %v2792_v3  ;;  %v1589_v35 = vrot.slane %v1587_v18, 5 }
 0x243   : > { %v3680_v54 = vunpack.c.l.b16 %v3019_v48  ;;  %v2094_v50 = vshll.u32 %v7192_v12, 16  ;;  %v3598_v28 = vunpack.c.l.b16 %v2802_v26  ;;  %v1595_v15 = vrot.slane %v1593_v27, 5 }
 0x244   : > { %v1597_v41 = vshrl.u32 %v7173_v5, 16  ;;  %v1590_v63 = vor.u32 %v1589_v35, %v1586_v43  ;;  %v1603_v39 = vshll.u32 %v7184_v57, 16  ;;  %v3929_v32 = vsel %vm3781_vm1, %v3891_v34, %v7078_v6  ;;  %v7208_v6 = vpop.permute.xlu1 %3233 }
 0x245   : > { %v3697_v0 = vpack.c.b16 %v3680_v54, %v3679_v19  ;;  %v3386_v60 = vpack.c.b16 %v3362_v52, %v3361_v47  ;;  %v3616_v1 = vpack.c.b16 %v3598_v28, %v3597_v58  ;;  %4281 = vmatmul.bf16.gmra.mxu2 %v3929_v32  ;;  %v4961_v16 = vrot.slane %v1644_v42, 9  ;;  %v7217_v47 = vld [vmem:[#allocation2 + $0xc8] sm:$0x1] }
 0x246   : > { %v1599_v14 = vrot.slane %v1597_v41, 4  ;;  %v3720_v17 = vsel %vm3699_vm15, %v5336_v20, %v7111_v55  ;;  %v1591_v8 = vrot.slane %v1590_v63, 4  ;;  %v1791_v13 = vrot.slane %v7086_v9, 5  ;;  %v1826_v9 = vld [vmem:[#allocation2 + $0x6c] sm:$0xf] }
 0x247   : > { %5274 = vmatmul.msk.bf16.gmra.mxu3 %vm3699_vm15, %v3697_v0  ;;  %v1794_v59 = vrot.slane %v7093_v21, 5  ;;  %v7212_v34 = vsel %vm3699_vm15, %v3386_v60, %v7147_v33  ;;  %3645 = vrot.lane.b32.xlu2 %v3616_v1, %s5609_s20  ;;  %v1605_v40 = vrot.slane %v1603_v39, 5  ;;  %v3762_v38 = vsel %vm3748_vm0, %v3720_v17, %v7135_v30  ;;  %v2447_v41 = vld [vmem:[#allocation2 + $0xc0] sm:$0xf]  ;;  %v5359_v20 = vld [vmem:[#allocation2 + $0xa8] sm:$0xff] }
 0x248   : > { %v1600_v55 = vor.u32 %v1599_v14, %v1595_v15  ;;  %v1596_v21 = vsel %vm5899_vm14, %v1591_v8, %v1595_v15  ;;  %v1792_v61 = vsel %vm5809_vm8, %v4961_v16, %v1791_v13  ;;  %v1793_v33 = vrot.slane %v1791_v13, 4  ;;  %v7235_v15 = vpop.permute.xlu0 %3459 }
 0x249   : > { %v4979_v7 = vrot.slane %v2257_v45, 9  ;;  %v3119_v49 = vunpack.c.l.b16 %v1596_v21  ;;  %v3197_v19 = vunpack.c.l.b16 %v1792_v61  ;;  %v2413_v43 = vrot.slane %v7206_v10, 5 }
 0x24a   : > { %v1601_v51 = vrot.slane %v1600_v55, 4  ;;  %v1795_v30 = vsel %vm5809_vm8, %v1793_v33, %v1794_v59  ;;  %v2416_v18 = vrot.slane %v7217_v47, 5  ;;  %v3801_v52 = vsel %vm3781_vm1, %v3762_v38, %v7125_v11  ;;  %v1226_v55 = vld [vmem:[#allocation2 + $0xb4] sm:$0xf]  ;;  %v7256_v33 = vld [vmem:[#allocation2 + $0xb8] sm:$0xf] }
 0x24b   : > { %v2051_v3 = vshrl.u32 %v1826_v9, 16  ;;  %v3198_v27 = vunpack.c.l.b16 %v1795_v30  ;;  %v2414_v26 = vsel %vm5809_vm8, %v4979_v7, %v2413_v43  ;;  %v2415_v58 = vrot.slane %v2413_v43, 4  ;;  %4192 = vmatmul.bf16.gmra.mxu1 %v3801_v52  ;;  %v7258_v7 = vpop.f32.mrf.mxu0 }
 0x24c   : > { %v1606_v48 = vsel %vm5899_vm14, %v1601_v51, %v1605_v40  ;;  %v3425_v35 = vunpack.c.l.b16 %v2414_v26  ;;  %v2054_v28 = vshll.u32 %v1826_v9, 16  ;;  %v2060_v63 = vshll.u32 %v6943_v53, 16  ;;  %v7247_v13 = vpop.permute.xlu1 %3555  ;;  %v7250_v53 = vpop.permute.xlu2 %3635 }
 0x24d   : > { %v3120_v54 = vunpack.c.l.b16 %v1606_v48  ;;  %v2053_v42 = vrot.slane %v2051_v3, 4  ;;  %v3216_v0 = vpack.c.b16 %v3198_v27, %v3197_v19  ;;  %v2417_v11 = vsel %vm5809_vm8, %v2415_v58, %v2416_v18  ;;  %v7254_v40 = vpop.f32.mrf.mxu2  ;;  %v7265_v48 = vld [vmem:[#allocation2 + $0xbc] sm:$0x1] }
 0x24e   : > { %v2066_v39 = vrot.slane %v2064_v37, 4  ;;  %v3426_v60 = vunpack.c.l.b16 %v2417_v11  ;;  %v2056_v1 = vrot.slane %v2054_v28, 5  ;;  %v2072_v14 = vrot.slane %v2070_v25, 5  ;;  %v5337_v11 = vld [vmem:[#allocation2 + $0x54] sm:$0xff] }
 0x24f   : > { %v3137_v32 = vpack.c.b16 %v3120_v54, %v3119_v49  ;;  %3341 = vrot.lane.b32.xlu2 %v5359_v20, %s5609_s20  ;;  %3245 = vrot.lane.b32.xlu1 %v3216_v0, %s5608_s8  ;;  %v2062_v16 = vrot.slane %v2060_v63, 5  ;;  %v2804_v45 = vshrl.u32 %v2447_v41, 16  ;;  %v2807_v17 = vshll.u32 %v2447_v41, 16 }
 0x250   : > { %v2813_v8 = vshll.u32 %v7149_v24, 16  ;;  %v3442_v37 = vpack.c.b16 %v3426_v60, %v3425_v35  ;;  %v2057_v59 = vor.u32 %v2056_v1, %v2053_v42  ;;  %v2817_v44 = vshrl.u32 %v7149_v24, 16  ;;  %v7271_v0 = vpop.permute.xlu0 %3155  ;;  %v1645_v1 = vld [vmem:[#allocation2 + $0xa8] sm:$0xe] }
 0x251   : > { %3167 = vrot.lane.b32.xlu0 %v3137_v32, %s5610_s10  ;;  %v2823_v25 = vshll.u32 %v7161_v31, 16  ;;  %v2067_v38 = vor.u32 %v2066_v39, %v2062_v16  ;;  %v2806_v9 = vrot.slane %v2804_v45, 4  ;;  %v2809_v21 = vrot.slane %v2807_v17, 5 }
 0x252   : > { %v2815_v61 = vrot.slane %v2813_v8, 5  ;;  %v2058_v51 = vrot.slane %v2057_v59, 4  ;;  %v2819_v49 = vrot.slane %v2817_v44, 4  ;;  %v3893_v24 = vsel %vm3748_vm0, %v7212_v34, %v7175_v23  ;;  %v5376_v23 = vld [vmem:[#allocation2 + $0xc0] sm:$0xff] }
 0x253   : > { %v2825_v19 = vrot.slane %v2823_v25, 5  ;;  %v2068_v43 = vrot.slane %v2067_v38, 4  ;;  %v2810_v31 = vor.u32 %v2809_v21, %v2806_v9  ;;  %v1608_v30 = vshrl.u32 %v1226_v55, 16 }
 0x254   : > { %v1611_v18 = vshll.u32 %v1226_v55, 16  ;;  %v2063_v52 = vsel %vm5899_vm14, %v2058_v51, %v2062_v16  ;;  %v2820_v3 = vor.u32 %v2819_v49, %v2815_v61  ;;  %v1617_v27 = vshll.u32 %v7256_v33, 16  ;;  %v7286_v38 = vpop.permute.xlu1 %3235  ;;  %v7290_v9 = vpop.permute.xlu2 %3331  ;;  %v1828_v51 = vld [vmem:[#allocation2 + $0x78] sm:$0xf] }
 0x255   : > { %v1621_v26 = vshrl.u32 %v7256_v33, 16  ;;  %v2073_v58 = vsel %vm5899_vm14, %v2068_v43, %v2072_v14  ;;  %v3363_v54 = vunpack.c.l.b16 %v2063_v52  ;;  %v2811_v35 = vrot.slane %v2810_v31, 4  ;;  %v7279_v14 = vpop.f32.mrf.mxu1  ;;  %v7293_v49 = vpop.f32.mrf.mxu2 }
 0x256   : > { %v1610_v34 = vrot.slane %v1608_v30, 4  ;;  %v3364_v42 = vunpack.c.l.b16 %v2073_v58  ;;  %v2821_v28 = vrot.slane %v2820_v3, 4  ;;  %v1613_v41 = vrot.slane %v1611_v18, 5  ;;  %v7298_v31 = vpop.f32.mrf.mxu0 }
 0x257   : > { %v1619_v20 = vrot.slane %v1617_v27, 5  ;;  %v2816_v63 = vsel %vm5899_vm14, %v2811_v35, %v2815_v61  ;;  %3567 = vrot.lane.b32.xlu1 %v5376_v23, %s5608_s8  ;;  %v1623_v39 = vrot.slane %v1621_v26, 4  ;;  %v1627_v32 = vshll.u32 %v7265_v48, 16  ;;  %v2449_v27 = vld [vmem:[#allocation2 + $0xcc] sm:$0xf] }
 0x258   : > { %v3932_v60 = vsel %vm3781_vm1, %v3893_v24, %v7163_v46  ;;  %v3387_v16 = vpack.c.b16 %v3364_v42, %v3363_v54  ;;  %v2826_v45 = vsel %vm5899_vm14, %v2821_v28, %v2825_v19  ;;  %v3599_v17 = vunpack.c.l.b16 %v2816_v63  ;;  %v2450_v23 = vld [vmem:[#allocation2 + $0xd0] sm:$0xf] }
 0x259   : > { %3473 = vrot.lane.b32.xlu0 %v3442_v37, %s5610_s10  ;;  %v1614_v8 = vor.u32 %v1613_v41, %v1610_v34  ;;  %4286 = vmatmul.bf16.gmra.mxu2 %v3932_v60  ;;  %v3723_v59 = vsel %vm3699_vm15, %v5337_v11, %v7190_v56  ;;  %v3600_v44 = vunpack.c.l.b16 %v2826_v45  ;;  %v1624_v25 = vor.u32 %v1623_v39, %v1619_v20  ;;  %v2466_v41 = vld [vmem:[#allocation2 + $0xd4] sm:$0x1] }
 0x25a   : > { %v1629_v55 = vrot.slane %v1627_v32, 5  ;;  %v3856_v46 = vsel %vm3699_vm15, %v3387_v16, %v7235_v15  ;;  %v4962_v21 = vrot.slane %v1645_v1, 9  ;;  %v1798_v61 = vrot.slane %v7173_v5, 5  ;;  %v7320_v32 = vpop.permute.xlu0 %3461 }
 0x25b   : > { %v1615_v37 = vrot.slane %v1614_v8, 4  ;;  %v3617_v19 = vpack.c.b16 %v3600_v44, %v3599_v17  ;;  %v1625_v24 = vrot.slane %v1624_v25, 4  ;;  %v1801_v56 = vrot.slane %v7184_v57, 5  ;;  %v2866_v8 = vld [vmem:[#allocation2 + $0xcc] sm:$0xe] }
 0x25c   : > { %v3764_v43 = vsel %vm3748_vm0, %v3723_v59, %v7208_v6  ;;  %v1799_v30 = vsel %vm5809_vm8, %v4962_v21, %v1798_v61  ;;  %v1800_v18 = vrot.slane %v1798_v61, 4  ;;  %v2075_v6 = vshrl.u32 %v1828_v51, 16  ;;  %v5360_v59 = vld [vmem:[#allocation2 + $0xb4] sm:$0xff]  ;;  %v7326_v21 = vpop.permute.xlu1 %3557  ;;  %v7328_v61 = vpop.permute.xlu2 %3637 }
 0x25d   : > { %v1620_v15 = vsel %vm5899_vm14, %v1615_v37, %v1619_v20  ;;  %v3804_v5 = vsel %vm3781_vm1, %v3764_v43, %v7201_v62  ;;  %3647 = vrot.lane.b32.xlu2 %v3617_v19, %s5609_s20  ;;  %v1630_v57 = vsel %vm5899_vm14, %v1625_v24, %v1629_v55  ;;  %v3199_v3 = vunpack.c.l.b16 %v1799_v30  ;;  %v7318_v20 = vpop.f32.mrf.mxu1  ;;  %v7332_v43 = vpop.f32.mrf.mxu2 }
 0x25e   : > { %v3121_v52 = vunpack.c.l.b16 %v1620_v15  ;;  %4197 = vmatmul.bf16.gmra.mxu1 %v3804_v5  ;;  %v3122_v26 = vunpack.c.l.b16 %v1630_v57  ;;  %v1802_v58 = vsel %vm5809_vm8, %v1800_v18, %v1801_v56  ;;  %v2078_v54 = vshll.u32 %v1828_v51, 16  ;;  %v5338_v15 = vld [vmem:[#allocation2 + $0x60] sm:$0xff] }
 0x25f   : > { %v2084_v35 = vshll.u32 %v7108_v4, 16  ;;  %v3200_v34 = vunpack.c.l.b16 %v1802_v58  ;;  %v2077_v62 = vrot.slane %v2075_v6, 4  ;;  %v2090_v42 = vrot.slane %v2088_v36, 4 }
 0x260   : > { %v7316_v28 = vrot.slane %v2094_v50, 5  ;;  %v3138_v11 = vpack.c.b16 %v3122_v26, %v3121_v52  ;;  %v2080_v63 = vrot.slane %v2078_v54, 5  ;;  %v2828_v60 = vshrl.u32 %v2449_v27, 16 }
 0x261   : > { %v2086_v39 = vrot.slane %v2084_v35, 5  ;;  %v3217_v1 = vpack.c.b16 %v3200_v34, %v3199_v3  ;;  %v2831_v16 = vshll.u32 %v2449_v27, 16  ;;  %v2837_v45 = vshll.u32 %v2450_v23, 16  ;;  %v7335_v3 = vpop.f32.mrf.mxu0  ;;  %v5377_v35 = vld [vmem:[#allocation2 + $0xcc] sm:$0xff] }
 0x262   : > { %v2841_v17 = vshrl.u32 %v2450_v23, 16  ;;  %3169 = vrot.lane.b32.xlu0 %v3138_v11, %s5610_s10  ;;  %v2081_v4 = vor.u32 %v2080_v63, %v2077_v62  ;;  %v2830_v12 = vrot.slane %v2828_v60, 4  ;;  %v2847_v50 = vshll.u32 %v2466_v41, 16  ;;  %s4755_s10 = scalar_lea.sflag [#allocation5], %s5739_s22 }
 0x263   : > { %v2091_v36 = vor.u32 %v2090_v42, %v2086_v39  ;;  %3247 = vrot.lane.b32.xlu1 %v3217_v1, %s5608_s8  ;;  %v2833_v44 = vrot.slane %v2831_v16, 5  ;;  %v2839_v25 = vrot.slane %v2837_v45, 5  ;;  %v3895_v37 = vsel %vm3748_vm0, %v3856_v46, %v7247_v13  ;;  %v1646_v13 = vld [vmem:[#allocation2 + $0xb4] sm:$0xe]  ;;  %v5496_v46 = vld [vmem:[#allocation2 + $0x88] sm:$0xf]  ;;  %v3158_v45 = vpop.permute.xlu0 %3157 }
 0x264   : > { %v2843_v55 = vrot.slane %v2841_v17, 4  ;;  %v2082_v51 = vrot.slane %v2081_v4, 4  ;;  %v2849_v24 = vrot.slane %v2847_v50, 5  ;;  %v3935_v56 = vsel %vm3781_vm1, %v3895_v37, %v7250_v53  ;;  %v1830_v17 = vld [vmem:[#allocation2 + $0x84] sm:$0xf] }
 0x265   : > { %v2092_v19 = vrot.slane %v2091_v36, 4  ;;  %3343 = vrot.lane.b32.xlu2 %v5360_v59, %s5609_s20  ;;  %v2834_v30 = vor.u32 %v2833_v44, %v2830_v12  ;;  %v4995_v5 = vrot.slane %v2866_v8, 9  ;;  %v3022_v57 = vrot.slane %v2450_v23, 5  ;;  %v7344_v23 = vpop.f32.mrf.mxu1 }
 0x266   : > { %v2844_v18 = vor.u32 %v2843_v55, %v2839_v25  ;;  %v2112_v52 = vshrl.u32 %v5496_v46, 16  ;;  %v2087_v6 = vsel %vm5899_vm14, %v2082_v51, %v2086_v39  ;;  %v3025_v27 = vrot.slane %v2466_v41, 5 }
 0x267   : > { %v3726_v53 = vsel %vm3699_vm15, %v5338_v15, %v7271_v0  ;;  %v2097_v26 = vsel %vm5899_vm14, %v2092_v19, %v7316_v28  ;;  %v2835_v58 = vrot.slane %v2834_v30, 4  ;;  %v3023_v34 = vsel %vm5809_vm8, %v4995_v5, %v3022_v57  ;;  %v7352_v0 = vld [vmem:[%s7702_s5] ss:$0 sm:$0xff] }
 0x268   : > { %v2845_v54 = vrot.slane %v2844_v18, 4  ;;  %v3024_v62 = vrot.slane %v3022_v57, 4  ;;  %v4963_v42 = vrot.slane %v1646_v13, 9  ;;  %v1805_v41 = vrot.slane %v7256_v33, 5  ;;  %v5497_v57 = vld [vmem:[#allocation2 + $0x8c] sm:$0x1] }
 0x269   : > { %4291 = vmatmul.bf16.gmra.mxu2 %v3935_v56  ;;  %v3365_v11 = vunpack.c.l.b16 %v2087_v6  ;;  %v2840_v28 = vsel %vm5899_vm14, %v2835_v58, %v2839_v25  ;;  %v3681_v39 = vunpack.c.l.b16 %v3023_v34  ;;  %v3366_v4 = vunpack.c.l.b16 %v2097_v26  ;;  %v5339_v34 = vld [vmem:[#allocation2 + $0x6c] sm:$0xff] }
 0x26a   : > { %v2850_v63 = vsel %vm5899_vm14, %v2845_v54, %v2849_v24  ;;  %v3601_v60 = vunpack.c.l.b16 %v2840_v28  ;;  %v3026_v16 = vsel %vm5809_vm8, %v3024_v62, %v3025_v27  ;;  %v1806_v33 = vsel %vm5809_vm8, %v4963_v42, %v1805_v41  ;;  %v3238_v24 = vpop.permute.xlu1 %3237  ;;  %v1832_v42 = vld [vmem:[#allocation2 + $0x90] sm:$0xf] }
 0x26b   : > { %v3602_v1 = vunpack.c.l.b16 %v2850_v63  ;;  %3569 = vrot.lane.b32.xlu1 %v5377_v35, %s5608_s8  ;;  %v3682_v36 = vunpack.c.l.b16 %v3026_v16  ;;  %v1807_v12 = vrot.slane %v1805_v41, 4  ;;  %v1808_v50 = vrot.slane %v7265_v48, 5  ;;  %v3334_v48 = vpop.permute.xlu2 %3333  ;;  %v5498_v41 = vld [vmem:[#allocation2 + $0x94] sm:$0xf] }
 0x26c   : > { %v3201_v59 = vunpack.c.l.b16 %v1806_v33  ;;  %v3766_v44 = vsel %vm3748_vm0, %v3726_v53, %v7286_v38  ;;  %v4164_v25 = vadd.f32 %v7352_v0, %v7279_v14  ;;  %v2099_v19 = vshrl.u32 %v1830_v17, 16  ;;  %v7373_v38 = vpop.f32.mrf.mxu2 }
 0x26d   : > { %v3618_v8 = vpack.c.b16 %v3602_v1, %v3601_v60  ;;  %v3698_v55 = vpack.c.b16 %v3682_v36, %v3681_v39  ;;  %v1809_v37 = vsel %vm5809_vm8, %v1807_v12, %v1808_v50  ;;  %v3807_v51 = vsel %vm3781_vm1, %v3766_v44, %v7290_v9  ;;  %v4170_v5 = vpop.f32.mrf.mxu1  ;;  %v7376_v9 = vpop.f32.mrf.mxu0 }
 0x26e   : > { %v3202_v56 = vunpack.c.l.b16 %v1809_v37  ;;  %4202 = vmatmul.bf16.gmra.mxu1 %v3807_v51  ;;  %v2102_v15 = vshll.u32 %v1830_v17, 16  ;;  %v2108_v30 = vshll.u32 %v5496_v46, 16  ;;  %v3388_v18 = vpack.c.b16 %v3366_v4, %v3365_v11  ;;  %v3464_v39 = vpop.permute.xlu0 %3463 }
 0x26f   : > { %3649 = vrot.lane.b32.xlu2 %v3618_v8, %s5609_s20  ;;  %5275 = vmatmul.msk.bf16.gmra.mxu3 %vm3699_vm15, %v3698_v55  ;;  %v2101_v14 = vrot.slane %v2099_v19, 4  ;;  %v2114_v29 = vrot.slane %v2112_v52, 4  ;;  %v2118_v13 = vshll.u32 %v5497_v57, 16  ;;  %v4253_v46 = vadd.f32 %v7254_v40, %v4164_v25 }
 0x270   : > { %v2104_v6 = vrot.slane %v2102_v15, 5  ;;  %v2110_v27 = vrot.slane %v2108_v30, 5  ;;  %v3859_v53 = vsel %vm3699_vm15, %v3388_v18, %v7320_v32  ;;  %v3218_v26 = vpack.c.b16 %v3202_v56, %v3201_v59  ;;  %v5361_v32 = vld [vmem:[#allocation2 + $0xc0] sm:$0xff] }
 0x271   : > { %v4166_v58 = vadd.f32 %v7352_v0, %v7318_v20  ;;  %v3897_v52 = vsel %vm3748_vm0, %v3859_v53, %v7326_v21  ;;  %v2136_v11 = vshrl.u32 %v5498_v41, 16  ;;  %v2120_v40 = vrot.slane %v2118_v13, 5 }
 0x272   : > { %v2105_v54 = vor.u32 %v2104_v6, %v2101_v14  ;;  %v2115_v35 = vor.u32 %v2114_v29, %v2110_v27  ;;  %v3729_v20 = vsel %vm3699_vm15, %v5339_v34, %v3158_v45  ;;  %v4342_v60 = vadd.f32 %v7219_v2, %v4253_v46  ;;  %v3560_v36 = vpop.permute.xlu1 %3559  ;;  %v5499_v14 = vld [vmem:[#allocation2 + $0x98] sm:$0x1] }
 0x273   : > { %3249 = vrot.lane.b32.xlu1 %v3218_v26, %s5608_s8  ;;  %v4255_v62 = vadd.f32 %v7293_v49, %v4166_v58  ;;  %v3938_v21 = vsel %vm3781_vm1, %v3897_v52, %v7328_v61  ;;  %v3768_v49 = vsel %vm3748_vm0, %v3729_v20, %v3238_v24  ;;  %v2123_v16 = vshrl.u32 %v1832_v42, 16  ;;  %v3640_v50 = vpop.permute.xlu2 %3639 }
 0x274   : > { %v2106_v28 = vrot.slane %v2105_v54, 4  ;;  %v2116_v63 = vrot.slane %v2115_v35, 4  ;;  %v2126_v33 = vshll.u32 %v1832_v42, 16  ;;  %v2132_v17 = vshll.u32 %v5498_v41, 16  ;;  %v7400_v61 = vpop.f32.mrf.mxu2  ;;  %v5340_v54 = vld [vmem:[#allocation2 + $0x78] sm:$0xff] }
 0x275   : > { %v4344_v1 = vadd.f32 %v7258_v7, %v4255_v62  ;;  %v7394_v12 = vpop.f32.mrf.mxu1  ;;  %v4421_v45 = vmax.f32 %v4342_v60, 0.0  ;;  %v3810_v8 = vsel %vm3781_vm1, %v3768_v49, %v3334_v48  ;;  %v7403_v59 = vpop.f32.mrf.mxu0  ;;  %v2125_v44 = vrot.slane %v2123_v16, 4  ;;  %v1834_v42 = vld [vmem:[#allocation2 + $0x9c] sm:$0xf] }
 0x276   : > { %v2111_v2 = vsel %vm5899_vm14, %v2106_v28, %v2110_v27  ;;  %v2121_v7 = vsel %vm5899_vm14, %v2116_v63, %v2120_v40  ;;  %v2128_v25 = vrot.slane %v2126_v33, 5  ;;  %v2134_v55 = vrot.slane %v2132_v17, 5  ;;  %v3160_v30 = vpop.permute.xlu0 %3159 }
 0x277   : > { %3345 = vrot.lane.b32.xlu2 %v5361_v32, %s5609_s20  ;;  %v4422_v4 = vmax.f32 %v4344_v1, 0.0  ;;  %v2138_v37 = vrot.slane %v2136_v11, 4  ;;  %v3367_v51 = vunpack.c.l.b16 %v2111_v2  ;;  %v3368_v19 = vunpack.c.l.b16 %v2121_v7 }
 0x278   : > { %v4171_v56 = vadd.f32 %v7352_v0, %v4170_v5  ;;  %v4169_v15 = vadd.f32 %v7352_v0, %v7344_v23  ;;  %v2129_v18 = vor.u32 %v2128_v25, %v2125_v44  ;;  %v2142_v29 = vshll.u32 %v5499_v14, 16 }
 0x279   : > { %4296 = vmatmul.bf16.gmra.mxu2 %v3938_v21  ;;  %v4453_v24 = vpack.c.bf16 %v4422_v4, %v4421_v45  ;;  %v3389_v48 = vpack.c.b16 %v3368_v19, %v3367_v51  ;;  %v2139_v57 = vor.u32 %v2138_v37, %v2134_v55  ;;  %v2147_v40 = vshrl.u32 %v1834_v42, 16 }
 0x27a   : > { %v4260_v13 = vadd.f32 %v7373_v38, %v4171_v56  ;;  %v4258_v53 = vadd.f32 %v7332_v43, %v4169_v15  ;;  %v3240_v5 = vpop.permute.xlu1 %3239  ;;  %v2130_v46 = vrot.slane %v2129_v18, 4  ;;  %v2144_v52 = vrot.slane %v2142_v29, 5  ;;  %v7433_v15 = vpop.f32.mrf.mxu3 }
 0x27b   : > { %v3862_v27 = vsel %vm3699_vm15, %v3389_v48, %v3464_v39  ;;  %v3336_v26 = vpop.permute.xlu2 %3335  ;;  %v2140_v35 = vrot.slane %v2139_v57, 4  ;;  %v3732_v38 = vsel %vm3699_vm15, %v5340_v54, %v3160_v30  ;;  %v5500_v39 = vld [vmem:[#allocation2 + $0xa0] sm:$0xf]  ;;  %v2149_v4 = vrot.slane %v2147_v40, 4 }
 0x27c   : > { %v3899_v23 = vsel %vm3748_vm0, %v3862_v27, %v3560_v36  ;;  %v4264_v58 = vpop.f32.mrf.mxu2  ;;  %v4349_v34 = vadd.f32 %v7335_v3, %v4260_v13  ;;  %v4347_v41 = vadd.f32 %v7298_v31, %v4258_v53  ;;  %v2135_v11 = vsel %vm5899_vm14, %v2130_v46, %v2134_v55  ;;  %v5341_v53 = vld [vmem:[#allocation2 + $0x84] sm:$0xff] }
 0x27d   : > { %v4175_v6 = vpop.f32.mrf.mxu1  ;;  %v7414_v62 = vpop.f32.mrf.mxu0  ;;  %v3941_v43 = vsel %vm3781_vm1, %v3899_v23, %v3640_v50  ;;  %v3770_v32 = vsel %vm3748_vm0, %v3732_v38, %v3240_v5  ;;  %v2145_v28 = vsel %vm5899_vm14, %v2140_v35, %v2144_v52  ;;  %v2150_v3 = vshll.u32 %v1834_v42, 16  ;;  %v1836_v52 = vld [vmem:[#allocation2 + $0xa8] sm:$0xf]  ;;  %v5502_v42 = vld [vmem:[#allocation2 + $0xac] sm:$0xf] }
 0x27e   : > { %4207 = vmatmul.bf16.gmra.mxu1 %v3810_v8  ;;  %v4424_v63 = vmax.f32 %v4349_v34, 0.0  ;;  %v2160_v20 = vshrl.u32 %v5500_v39, 16  ;;  %v3466_v60 = vpop.permute.xlu0 %3465  ;;  %v2156_v1 = vshll.u32 %v5500_v39, 16  ;;  %v4423_v21 = vmax.f32 %v4347_v41, 0.0 }
 0x27f   : > { %5284 = vmatmul.msk.bf16.vlgmr.msrb.gmra.mxu3 %vm3699_vm15, %v4453_v24  ;;  %v3369_v49 = vunpack.c.l.b16 %v2135_v11  ;;  %v3370_v16 = vunpack.c.l.b16 %v2145_v28  ;;  %v3813_v33 = vsel %vm3781_vm1, %v3770_v32, %v3336_v26  ;;  %v2152_v36 = vrot.slane %v2150_v3, 5  ;;  %v5501_v24 = vld [vmem:[#allocation2 + $0xa4] sm:$0x1] }
 0x280   : > { %v4454_v17 = vpack.c.bf16 %v4424_v63, %v4423_v21  ;;  %v4176_v2 = vadd.f32 %v7352_v0, %v4175_v6  ;;  %v2158_v45 = vrot.slane %v2156_v1, 5  ;;  %v2162_v8 = vrot.slane %v2160_v20, 4 }
 0x281   : > { %v4174_v25 = vadd.f32 %v7352_v0, %v7394_v12  ;;  %v3390_v37 = vpack.c.b16 %v3370_v16, %v3369_v49  ;;  %v2153_v51 = vor.u32 %v2152_v36, %v2149_v4  ;;  %v2166_v56 = vshll.u32 %v5501_v24, 16 }
 0x282   : > { %v3562_v50 = vpop.permute.xlu1 %3561  ;;  %v4265_v19 = vadd.f32 %v4264_v58, %v4176_v2  ;;  %v2163_v30 = vor.u32 %v2162_v8, %v2158_v45  ;;  %v2184_v38 = vshrl.u32 %v5502_v42, 16  ;;  %v2171_v32 = vshrl.u32 %v1836_v52, 16 }
 0x283   : > { %v3642_v7 = vpop.permute.xlu2 %3641  ;;  %v3865_v18 = vsel %vm3699_vm15, %v3390_v37, %v3466_v60  ;;  %v4263_v14 = vadd.f32 %v7400_v61, %v4174_v25  ;;  %v2154_v48 = vrot.slane %v2153_v51, 4  ;;  %v2168_v27 = vrot.slane %v2166_v56, 5  ;;  %v5503_v25 = vld [vmem:[#allocation2 + $0xb0] sm:$0x1] }
 0x284   : > { %v7426_v44 = vpop.f32.mrf.mxu2  ;;  %v3901_v12 = vsel %vm3748_vm0, %v3865_v18, %v3562_v50  ;;  %v4354_v57 = vadd.f32 %v7403_v59, %v4265_v19  ;;  %v2164_v6 = vrot.slane %v2163_v30, 4  ;;  %v2174_v28 = vshll.u32 %v1836_v52, 16 }
 0x285   : > { %v4178_v31 = vpop.f32.mrf.mxu1  ;;  %v7430_v55 = vpop.f32.mrf.mxu0  ;;  %v4352_v5 = vadd.f32 %v7376_v9, %v4263_v14  ;;  %v3944_v26 = vsel %vm3781_vm1, %v3901_v12, %v3642_v7  ;;  %v2159_v61 = vsel %vm5899_vm14, %v2154_v48, %v2158_v45  ;;  %v2180_v63 = vshll.u32 %v5502_v42, 16 }
 0x286   : > { %v3162_v29 = vpop.permute.xlu0 %3161  ;;  %v4426_v35 = vmax.f32 %v4354_v57, 0.0  ;;  %v2169_v59 = vsel %vm5899_vm14, %v2164_v6, %v2168_v27  ;;  %v3371_v11 = vunpack.c.l.b16 %v2159_v61  ;;  %v4179_v1 = vadd.f32 %v7352_v0, %v4178_v31  ;;  %v5342_v6 = vld [vmem:[#allocation2 + $0x90] sm:$0xff] }
 0x287   : > { %v3735_v54 = vsel %vm3699_vm15, %v5341_v53, %v3162_v29  ;;  %v4425_v41 = vmax.f32 %v4352_v5, 0.0  ;;  %v3372_v40 = vunpack.c.l.b16 %v2169_v59  ;;  %v2173_v49 = vrot.slane %v2171_v32, 4  ;;  %v5504_v32 = vld [vmem:[#allocation2 + $0xb8] sm:$0xf] }
 0x288   : > { %v2176_v16 = vrot.slane %v2174_v28, 5  ;;  %v4268_v8 = vadd.f32 %v7426_v44, %v4179_v1  ;;  %v2190_v37 = vshll.u32 %v5503_v25, 16  ;;  %v2208_v28 = vshrl.u32 %v5504_v32, 16 }
 0x289   : > { %4301 = vmatmul.bf16.gmra.mxu2 %v3941_v43  ;;  %v7449_v43 = vpop.f32.mrf.mxu3  ;;  %v4455_v39 = vpack.c.bf16 %v4426_v35, %v4425_v41  ;;  %v3391_v4 = vpack.c.b16 %v3372_v40, %v3371_v11  ;;  %v1838_v35 = vld [vmem:[#allocation2 + $0xb4] sm:$0xf] }
 0x28a   : > { %v2177_v51 = vor.u32 %v2176_v16, %v2173_v49  ;;  %v4357_v18 = vadd.f32 %v7414_v62, %v4268_v8  ;;  %v2192_v57 = vrot.slane %v2190_v37, 5  ;;  %v2195_v41 = vshrl.u32 %v1838_v35, 16 }
 0x28b   : > { %v3338_v23 = vpop.permute.xlu2 %3337  ;;  %v2198_v40 = vshll.u32 %v1838_v35, 16 }
 0x28c   : > { %v4269_v58 = vpop.f32.mrf.mxu2  ;;  %v2178_v12 = vrot.slane %v2177_v51, 4  ;;  %v4427_v27 = vmax.f32 %v4357_v18, 0.0 }
 0x28d   : > { %v4180_v13 = vpop.f32.mrf.mxu1  ;;  %v7444_v34 = vpop.f32.mrf.mxu0 }
 0x28e   : > { %4212 = vmatmul.bf16.gmra.mxu1 %v3813_v33  ;;  %v4181_v20 = vadd.f32 %v7352_v0, %v4180_v13  ;;  %v3468_v60 = vpop.permute.xlu0 %3467  ;;  %v2182_v33 = vrot.slane %v2180_v63, 5 }
 0x28f   : > { %5285 = vmatmul.msk.bf16.gmra.mxu3 %vm3699_vm15, %v4454_v17  ;;  %v2186_v17 = vrot.slane %v2184_v38, 4  ;;  %v3868_v45 = vsel %vm3699_vm15, %v3391_v4, %v3468_v60 }
 0x290   : > { %v4270_v50 = vadd.f32 %v4269_v58, %v4181_v20  ;;  %v2183_v5 = vsel %vm5899_vm14, %v2178_v12, %v2182_v33 }
 0x291   : > { %v2187_v19 = vor.u32 %v2186_v17, %v2182_v33  ;;  %v7459_v30 = vpop.f32.mrf.mxu3  ;;  %v3373_v52 = vunpack.c.l.b16 %v2183_v5  ;;  %v2200_v17 = vrot.slane %v2198_v40, 5 }
 0x292   : > { %v4359_v56 = vadd.f32 %v7430_v55, %v4270_v50 }
 0x293   : > { %v3644_v2 = vpop.permute.xlu2 %3643  ;;  %v2188_v48 = vrot.slane %v2187_v19, 4 }
 0x294   : > { %v3242_v46 = vpop.permute.xlu1 %3241  ;;  %v4428_v44 = vmax.f32 %v4359_v56, 0.0 }
 0x295   : > { %v3772_v9 = vsel %vm3748_vm0, %v3735_v54, %v3242_v46  ;;  %v4363_v31 = vpop.f32.mrf.mxu0  ;;  %v2193_v55 = vsel %vm5899_vm14, %v2188_v48, %v2192_v57 }
 0x296   : > { %v3816_v3 = vsel %vm3781_vm1, %v3772_v9, %v3338_v23  ;;  %v3164_v29 = vpop.permute.xlu0 %3163  ;;  %v4456_v23 = vpack.c.bf16 %v4428_v44, %v4427_v27  ;;  %v3374_v59 = vunpack.c.l.b16 %v2193_v55  ;;  %v5343_v27 = vld [vmem:[#allocation2 + $0x9c] sm:$0xff] }
 0x297   : > { %v3738_v62 = vsel %vm3699_vm15, %v5342_v6, %v3164_v29 }
 0x299   : > { %4306 = vmatmul.bf16.gmra.mxu2 %v3944_v26  ;;  %v4272_v7 = vpop.f32.mrf.mxu2  ;;  %v7474_v38 = vpop.f32.mrf.mxu3 }
 0x29b   : > { %v3340_v53 = vpop.permute.xlu2 %3339 }
 0x29c   : > { %v4183_v21 = vpop.f32.mrf.mxu1  ;;  %v3564_v36 = vpop.permute.xlu1 %3563 }
 0x29d   : > { %v3903_v24 = vsel %vm3748_vm0, %v3868_v45, %v3564_v36  ;;  %v7469_v54 = vpop.f32.mrf.mxu0  ;;  %v4184_v9 = vadd.f32 %v7352_v0, %v4183_v21  ;;  %v2197_v21 = vrot.slane %v2195_v41, 4  ;;  %v2210_v36 = vrot.slane %v2208_v28, 4 }
 0x29e   : > { %4217 = vmatmul.bf16.gmra.mxu1 %v3816_v3  ;;  %v3947_v14 = vsel %vm3781_vm1, %v3903_v24, %v3644_v2  ;;  %v3470_v63 = vpop.permute.xlu0 %3469  ;;  %v2204_v3 = vshll.u32 %v5504_v32, 16  ;;  %v2232_v41 = vshrl.u32 %v7206_v10, 16 }
 0x29f   : > { %5286 = vmatmul.msk.bf16.gmra.mxu3 %vm3699_vm15, %v4455_v39  ;;  %v3392_v39 = vpack.c.b16 %v3374_v59, %v3373_v52  ;;  %v4273_v20 = vadd.f32 %v4272_v7, %v4184_v9  ;;  %v5505_v7 = vld [vmem:[#allocation2 + $0xbc] sm:$0x1]  ;;  %v2201_v24 = vor.u32 %v2200_v17, %v2197_v21 }
 0x2a0   : > { %v2206_v4 = vrot.slane %v2204_v3, 5  ;;  %v2214_v51 = vshll.u32 %v5505_v7, 16 }
 0x2a1   : > { %v4274_v26 = vpop.f32.mrf.mxu2  ;;  %v3871_v1 = vsel %vm3699_vm15, %v3392_v39, %v3470_v63  ;;  %v4362_v45 = vadd.f32 %v7444_v34, %v4273_v20  ;;  %v7481_v19 = vpop.f32.mrf.mxu3  ;;  %v2202_v48 = vrot.slane %v2201_v24, 4  ;;  %v2228_v63 = vshll.u32 %v7206_v10, 16 }
 0x2a2   : > { %v2211_v56 = vor.u32 %v2210_v36, %v2206_v4  ;;  %v2216_v34 = vrot.slane %v2214_v51, 5 }
 0x2a3   : > { %v3646_v33 = vpop.permute.xlu2 %3645  ;;  %v2207_v55 = vsel %vm5899_vm14, %v2202_v48, %v2206_v4  ;;  %v2230_v21 = vrot.slane %v2228_v63, 5  ;;  %v5344_v48 = vld [vmem:[#allocation2 + $0xa8] sm:$0xff] }
 0x2a4   : > { %v4185_v13 = vpop.f32.mrf.mxu1  ;;  %v2212_v57 = vrot.slane %v2211_v56, 4  ;;  %v3375_v52 = vunpack.c.l.b16 %v2207_v55 }
 0x2a5   : > { %v4186_v58 = vadd.f32 %v7352_v0, %v4185_v13  ;;  %v4368_v25 = vpop.f32.mrf.mxu0 }
 0x2a7   : > { %v4275_v11 = vadd.f32 %v4274_v26, %v4186_v58  ;;  %v2217_v26 = vsel %vm5899_vm14, %v2212_v57, %v2216_v34  ;;  %v1840_v58 = vld [vmem:[#allocation2 + $0xc0] sm:$0xf] }
 0x2a8   : > { %v3376_v59 = vunpack.c.l.b16 %v2217_v26  ;;  %v2219_v32 = vshrl.u32 %v1840_v58, 16  ;;  %v2222_v28 = vshll.u32 %v1840_v58, 16 }
 0x2a9   : > { %4311 = vmatmul.bf16.gmra.mxu2 %v3947_v14  ;;  %v4364_v16 = vadd.f32 %v4363_v31, %v4275_v11  ;;  %v4429_v31 = vmax.f32 %v4362_v45, 0.0 }
 0x2aa   : > { %v3393_v3 = vpack.c.b16 %v3376_v59, %v3375_v52 }
 0x2ab   : > { %v3244_v46 = vpop.permute.xlu1 %3243  ;;  %v4430_v37 = vmax.f32 %v4364_v16, 0.0  ;;  %v3342_v13 = vpop.permute.xlu2 %3341 }
 0x2ac   : > { %v3774_v61 = vsel %vm3748_vm0, %v3738_v62, %v3244_v46  ;;  %v3166_v14 = vpop.permute.xlu0 %3165 }
 0x2ad   : > { %v3819_v42 = vsel %vm3781_vm1, %v3774_v61, %v3340_v53  ;;  %v4457_v29 = vpack.c.bf16 %v4430_v37, %v4429_v31  ;;  %v4371_v5 = vpop.f32.mrf.mxu0  ;;  %v3741_v62 = vsel %vm3699_vm15, %v5343_v27, %v3166_v14  ;;  %v7491_v61 = vpop.f32.mrf.mxu3 }
 0x2ae   : > { %4222 = vmatmul.bf16.gmra.mxu1 %v3819_v42 }
 0x2af   : > { %5287 = vmatmul.msk.bf16.gmra.mxu3 %vm3699_vm15, %v4456_v23 }
 0x2b1   : > { %v4277_v2 = vpop.f32.mrf.mxu2 }
 0x2b2   : > { %v4188_v60 = vpop.f32.mrf.mxu1 }
 0x2b3   : > { %v3566_v49 = vpop.permute.xlu1 %3565  ;;  %v4189_v44 = vadd.f32 %v7352_v0, %v4188_v60  ;;  %v2221_v60 = vrot.slane %v2219_v32, 4 }
 0x2b4   : > { %v3905_v50 = vsel %vm3748_vm0, %v3871_v1, %v3566_v49  ;;  %v3472_v11 = vpop.permute.xlu0 %3471  ;;  %v2224_v1 = vrot.slane %v2222_v28, 5  ;;  %v2234_v49 = vrot.slane %v2232_v41, 4 }
 0x2b5   : > { %v3950_v8 = vsel %vm3781_vm1, %v3905_v50, %v3646_v33  ;;  %v4278_v23 = vadd.f32 %v4277_v2, %v4189_v44  ;;  %v3874_v33 = vsel %vm3699_vm15, %v3393_v3, %v3472_v11  ;;  %v4373_v36 = vpop.f32.mrf.mxu0 }
 0x2b6   : > { %v2235_v37 = vor.u32 %v2234_v49, %v2230_v21 }
 0x2b7   : > { %v4367_v40 = vadd.f32 %v7469_v54, %v4278_v23  ;;  %v3648_v20 = vpop.permute.xlu2 %3647  ;;  %v2238_v54 = vshll.u32 %v7217_v47, 16 }
 0x2b8   : > { %v2236_v56 = vrot.slane %v2235_v37, 4 }
 0x2b9   : > { %4316 = vmatmul.bf16.gmra.mxu2 %v3950_v8  ;;  %v4279_v6 = vpop.f32.mrf.mxu2  ;;  %v4431_v17 = vmax.f32 %v4367_v40, 0.0  ;;  %v7502_v8 = vpop.f32.mrf.mxu3  ;;  %v2240_v31 = vrot.slane %v2238_v54, 5 }
 0x2ba   : > { %v4190_v18 = vpop.f32.mrf.mxu1 }
 0x2bb   : > { %v4191_v12 = vadd.f32 %v7352_v0, %v4190_v18  ;;  %v2241_v44 = vsel %vm5899_vm14, %v2236_v56, %v2240_v31 }
 0x2bd   : > { %v4280_v53 = vadd.f32 %v4279_v6, %v4191_v12  ;;  %v4376_v57 = vpop.f32.mrf.mxu0 }
 0x2bf   : > { %5288 = vmatmul.msk.bf16.gmra.mxu3 %vm3699_vm15, %v4457_v29  ;;  %v4369_v42 = vadd.f32 %v4368_v25, %v4280_v53  ;;  %v2225_v25 = vor.u32 %v2224_v1, %v2221_v60  ;;  %v3344_v29 = vpop.permute.xlu2 %3343 }
 0x2c1   : > { %v3246_v46 = vpop.permute.xlu1 %3245  ;;  %v4432_v39 = vmax.f32 %v4369_v42, 0.0  ;;  %v2226_v24 = vrot.slane %v2225_v25, 4  ;;  %v7512_v55 = vpop.f32.mrf.mxu3 }
 0x2c2   : > { %v3776_v35 = vsel %vm3748_vm0, %v3741_v62, %v3246_v46  ;;  %v3378_v46 = vunpack.c.l.b16 %v2241_v44 }
 0x2c3   : > { %v3822_v9 = vsel %vm3781_vm1, %v3776_v35, %v3342_v13  ;;  %v4458_v45 = vpack.c.bf16 %v4432_v39, %v4431_v17  ;;  %v3168_v51 = vpop.permute.xlu0 %3167  ;;  %v2231_v34 = vsel %vm5899_vm14, %v2226_v24, %v2230_v21  ;;  %v5345_v21 = vld [vmem:[#allocation2 + $0xb4] sm:$0xff] }
 0x2c4   : > { %4227 = vmatmul.bf16.gmra.mxu1 %v3822_v9  ;;  %v3744_v13 = vsel %vm3699_vm15, %v5344_v48, %v3168_v51  ;;  %v3377_v62 = vunpack.c.l.b16 %v2231_v34 }
 0x2c5   : > { %v4378_v63 = vpop.f32.mrf.mxu0 }
 0x2c6   : > { %v3394_v9 = vpack.c.b16 %v3378_v46, %v3377_v62 }
 0x2c8   : > { %v4282_v16 = vpop.f32.mrf.mxu2  ;;  %v4193_v2 = vpop.f32.mrf.mxu1 }
 0x2c9   : > { %v3568_v4 = vpop.permute.xlu1 %3567  ;;  %v4194_v7 = vadd.f32 %v7352_v0, %v4193_v2  ;;  %v3650_v11 = vpop.permute.xlu2 %3649 }
 0x2ca   : > { %v3907_v50 = vsel %vm3748_vm0, %v3874_v33, %v3568_v4  ;;  %v7521_v39 = vpop.f32.mrf.mxu3 }
 0x2cb   : > { %v3953_v10 = vsel %vm3781_vm1, %v3907_v50, %v3648_v20  ;;  %v4283_v18 = vadd.f32 %v4282_v16, %v4194_v7  ;;  %v3474_v35 = vpop.permute.xlu0 %3473 }
 0x2cc   : > { %4321 = vmatmul.bf16.gmra.mxu2 %v3953_v10 }
 0x2cd   : > { %v4372_v27 = vadd.f32 %v4371_v5, %v4283_v18  ;;  %v3877_v5 = vsel %vm3699_vm15, %v3394_v9, %v3474_v35  ;;  %v4381_v54 = vpop.f32.mrf.mxu0  ;;  %v7542_v35 = vld [vmem:[%s7703_s6] ss:$0 sm:$0xff] }
 0x2cf   : > { %5289 = vmatmul.msk.bf16.gmra.mxu3 %vm3699_vm15, %v4458_v45  ;;  %v4433_v52 = vmax.f32 %v4372_v27, 0.0 }
 0x2d0   : > { %v4284_v14 = vpop.f32.mrf.mxu2  ;;  %v4195_v12 = vpop.f32.mrf.mxu1 }
 0x2d1   : > { %v4196_v47 = vadd.f32 %v7352_v0, %v4195_v12  ;;  %v3346_v50 = vpop.permute.xlu2 %3345 }
 0x2d2   : > { %v7527_v7 = vpop.f32.mrf.mxu3 }
 0x2d3   : > { %v4285_v53 = vadd.f32 %v4284_v14, %v4196_v47 }
 0x2d4   : > { %v3170_v60 = vpop.permute.xlu0 %3169 }
 0x2d5   : > { %v3248_v6 = vpop.permute.xlu1 %3247  ;;  %v4374_v58 = vadd.f32 %v4373_v36, %v4285_v53  ;;  %v3747_v33 = vsel %vm3699_vm15, %v5345_v21, %v3170_v60  ;;  %v4383_v18 = vpop.f32.mrf.mxu0 }
 0x2d6   : > { %v3778_v26 = vsel %vm3748_vm0, %v3744_v13, %v3248_v6 }
 0x2d7   : > { %v3825_v23 = vsel %vm3781_vm1, %v3778_v26, %v3344_v29  ;;  %v4434_v59 = vmax.f32 %v4374_v58, 0.0  ;;  %v300_v58 = vld [vmem:[%s5743_s16] sm:$0xff]  }
 0x2d8   : > { %4232 = vmatmul.bf16.gmra.mxu1 %v3825_v23 }
 0x2d9   : > { %v4459_v42 = vpack.c.bf16 %v4434_v59, %v4433_v52  ;;  %v4626_v52 = vunpack.c.l.bf16 %v300_v58 }
 0x2db   : > { %v4198_v22 = vpop.f32.mrf.mxu1 }
 0x2dc   : > { %v4287_v41 = vpop.f32.mrf.mxu2  ;;  %v4199_v28 = vadd.f32 %v7352_v0, %v4198_v22 }
 0x2dd   : > { %v3570_v32 = vpop.permute.xlu1 %3569  ;;  %v4386_v46 = vpop.f32.mrf.mxu0 }
 0x2de   : > { %v3909_v40 = vsel %vm3748_vm0, %v3877_v5, %v3570_v32  ;;  %v4288_v20 = vadd.f32 %v4287_v41, %v4199_v28 }
 0x2df   : > { %v3956_v3 = vsel %vm3781_vm1, %v3909_v40, %v3650_v11  ;;  %5290 = vmatmul.msk.bf16.gmra.mxu3 %vm3699_vm15, %v4459_v42 }
 0x2e0   : > { %4326 = vmatmul.bf16.gmra.mxu2 %v3956_v3  ;;  %v4377_v4 = vadd.f32 %v4376_v57, %v4288_v20  ;;  %v4627_v20 = vunpack.c.h.bf16 %v300_v58 }
 0x2e2   : > { %v4435_v25 = vmax.f32 %v4377_v4, 0.0 }
 0x2e3   : > { %v4200_v1 = vpop.f32.mrf.mxu1 }
 0x2e4   : > { %v4289_v49 = vpop.f32.mrf.mxu2  ;;  %v4201_v16 = vadd.f32 %v7352_v0, %v4200_v1 }
 0x2e5   : > { %v3250_v17 = vpop.permute.xlu1 %3249 }
 0x2e6   : > { %v4290_v36 = vadd.f32 %v4289_v49, %v4201_v16  ;;  %v3780_v2 = vsel %vm3748_vm0, %v3747_v33, %v3250_v17 }
 0x2e7   : > { %v3828_v10 = vsel %vm3781_vm1, %v3780_v2, %v3346_v50  ;;  %v302_v50 = vld [vmem:[%s5743_s16 + $0x8] sm:$0xff]  }
 0x2e8   : > { %v4379_v45 = vadd.f32 %v4378_v63, %v4290_v36  ;;  %4237 = vmatmul.bf16.gmra.mxu1 %v3828_v10  ;;  %v4388_v63 = vpop.f32.mrf.mxu0  ;;  %v4628_v10 = vunpack.c.l.bf16 %v302_v50 }
 0x2ea   : > { %v4436_v37 = vmax.f32 %v4379_v45, 0.0 }
 0x2eb   : > { %v4203_v56 = vpop.f32.mrf.mxu1 }
 0x2ec   : > { %v4460_v51 = vpack.c.bf16 %v4436_v37, %v4435_v25  ;;  %v4292_v24 = vpop.f32.mrf.mxu2  ;;  %v4204_v31 = vadd.f32 %v7352_v0, %v4203_v56 }
 0x2ee   : > { %v4293_v29 = vadd.f32 %v4292_v24, %v4204_v31 }
 0x2ef   : > { %5291 = vmatmul.msk.bf16.gmra.mxu3 %vm3699_vm15, %v4460_v51 }
 0x2f0   : > { %v4382_v57 = vadd.f32 %v4381_v54, %v4293_v29 }
 0x2f2   : > { %v7531_v14 = vpop.f32.mrf.mxu3  ;;  %v4437_v13 = vmax.f32 %v4382_v57, 0.0 }
 0x2f3   : > { %v4205_v48 = vpop.f32.mrf.mxu1 }
 0x2f4   : > { %v4294_v12 = vpop.f32.mrf.mxu2  ;;  %v4206_v47 = vadd.f32 %v7352_v0, %v4205_v48  ;;  %v4629_v48 = vunpack.c.h.bf16 %v302_v50 }
 0x2f6   : > { %v4295_v34 = vadd.f32 %v4294_v12, %v4206_v47 }
 0x2f8   : > { %v4384_v44 = vadd.f32 %v4383_v18, %v4295_v34 }
 0x2fa   : > { %v7534_v6 = vpop.f32.mrf.mxu3  ;;  %v4438_v27 = vmax.f32 %v4384_v44, 0.0 }
 0x2fb   : > { %v4208_v26 = vpop.f32.mrf.mxu1 }
 0x2fc   : > { %v4297_v53 = vpop.f32.mrf.mxu2  ;;  %v4461_v62 = vpack.c.bf16 %v4438_v27, %v4437_v13  ;;  %v4209_v23 = vadd.f32 %v7352_v0, %v4208_v26 }
 0x2fe   : > { %v4298_v59 = vadd.f32 %v4297_v53, %v4209_v23 }
 0x2ff   : > { %5292 = vmatmul.msk.bf16.gmra.mxu3 %vm3699_vm15, %v4461_v62 }
 0x300   : > { %v4387_v32 = vadd.f32 %v4386_v46, %v4298_v59  ;;  %v304_v46 = vld [vmem:[%s5743_s16 + $0x10] sm:$0xff]  }
 0x302   : > { %v4546_v22 = vpop.f32.mrf.mxu3  ;;  %v4439_v60 = vmax.f32 %v4387_v32, 0.0 }
 0x303   : > { %v4547_v42 = vadd.f32 %v7542_v35, %v4546_v22  ;;  %v4210_v41 = vpop.f32.mrf.mxu1 }
 0x304   : > { %v4299_v9 = vpop.f32.mrf.mxu2  ;;  %v4211_v11 = vadd.f32 %v7352_v0, %v4210_v41 }
 0x305   : > { %v4658_v5 = vadd.f32 %v4626_v52, %v4547_v42 }
 0x306   : > { %v4300_v28 = vadd.f32 %v4299_v9, %v4211_v11 }
 0x307   : > { %v4690_v40 = vmax.f32 %v4658_v5, 0.0 }
 0x308   : > { %v4389_v3 = vadd.f32 %v4388_v63, %v4300_v28  ;;  %v4631_v28 = vunpack.c.h.bf16 %v304_v46 }
 0x309   : > { %4722 = vst [vmem:[%s7547_s17] sm:$0xff] %v4690_v40 }
 0x30a   : > { %v4440_v1 = vmax.f32 %v4389_v3, 0.0  ;;  %v4548_v21 = vpop.f32.mrf.mxu3 }
 0x30b   : > { %v4549_v16 = vadd.f32 %v7542_v35, %v4548_v21  ;;  %v4213_v33 = vpop.f32.mrf.mxu1 }
 0x30c   : > { %v4302_v49 = vpop.f32.mrf.mxu2  ;;  %v4462_v17 = vpack.c.bf16 %v4440_v1, %v4439_v60  ;;  %v4214_v36 = vadd.f32 %v7352_v0, %v4213_v33  ;;  %v306_v33 = vld [vmem:[%s5743_s16 + $0x18] sm:$0xff]  }
 0x30d   : > { %v4659_v4 = vadd.f32 %v4627_v20, %v4549_v16 }
 0x30e   : > { %v4303_v45 = vadd.f32 %v4302_v49, %v4214_v36 }
 0x30f   : > { %v4691_v2 = vmax.f32 %v4659_v4, 0.0  ;;  %5293 = vmatmul.msk.bf16.gmra.mxu3 %vm3699_vm15, %v4462_v17 }
 0x310   : > { %v4392_v31 = vadd.f32 %v7433_v15, %v4303_v45 }
 0x311   : > { %4723 = vst [vmem:[%s7547_s17 + $0x8] sm:$0xff] %v4691_v2 }
 0x312   : > { %v4551_v54 = vpop.f32.mrf.mxu3  ;;  %v4441_v47 = vmax.f32 %v4392_v31, 0.0 }
 0x313   : > { %v4552_v37 = vadd.f32 %v7542_v35, %v4551_v54  ;;  %v4215_v51 = vpop.f32.mrf.mxu1 }
 0x314   : > { %v4304_v25 = vpop.f32.mrf.mxu2  ;;  %v4216_v24 = vadd.f32 %v7352_v0, %v4215_v51 }
 0x315   : > { %v4660_v56 = vadd.f32 %v4628_v10, %v4552_v37 }
 0x316   : > { %v4305_v18 = vadd.f32 %v4304_v25, %v4216_v24  ;;  %v4633_v24 = vunpack.c.h.bf16 %v306_v33 }
 0x317   : > { %v4692_v29 = vmax.f32 %v4660_v56, 0.0 }
 0x318   : > { %v4394_v12 = vadd.f32 %v7449_v43, %v4305_v18  ;;  %v4630_v43 = vunpack.c.l.bf16 %v304_v46 }
 0x319   : > { %4724 = vst [vmem:[%s7547_s17 + $0x10] sm:$0xff] %v4692_v29 }
 0x31a   : > { %v4442_v57 = vmax.f32 %v4394_v12, 0.0  ;;  %v4553_v34 = vpop.f32.mrf.mxu3 }
 0x31b   : > { %v4554_v13 = vadd.f32 %v7542_v35, %v4553_v34  ;;  %v4218_v27 = vpop.f32.mrf.mxu1 }
 0x31c   : > { %v4307_v44 = vpop.f32.mrf.mxu2  ;;  %v4463_v53 = vpack.c.bf16 %v4442_v57, %v4441_v47  ;;  %v4219_v62 = vadd.f32 %v7352_v0, %v4218_v27 }
 0x31d   : > { %v4661_v26 = vadd.f32 %v4629_v48, %v4554_v13  ;;  %v7588_v13 = vld [vmem:[%s7702_s5] ss:$0 sm:$0xff] }
 0x31e   : > { %v4308_v23 = vadd.f32 %v4307_v44, %v4219_v62 }
 0x31f   : > { %v4693_v15 = vmax.f32 %v4661_v26, 0.0  ;;  %5294 = vmatmul.msk.bf16.gmra.mxu3 %vm3699_vm15, %v4463_v53 }
 0x320   : > { %v4397_v41 = vadd.f32 %v7459_v30, %v4308_v23 }
 0x321   : > { %4725 = vst [vmem:[%s7547_s17 + $0x18] sm:$0xff] %v4693_v15 }
 0x322   : > { %v4556_v58 = vpop.f32.mrf.mxu3  ;;  %v4443_v63 = vmax.f32 %v4397_v41, 0.0  ;;  %v310_v41 = vld [vmem:[%s5743_s16 + $0x28] sm:$0xff]  }
 0x323   : > { %v4557_v59 = vadd.f32 %v7542_v35, %v4556_v58  ;;  %v4220_v22 = vpop.f32.mrf.mxu1 }
 0x324   : > { %v4309_v52 = vpop.f32.mrf.mxu2  ;;  %v4221_v9 = vadd.f32 %v7352_v0, %v4220_v22 }
 0x325   : > { %v4662_v42 = vadd.f32 %v4630_v43, %v4557_v59 }
 0x326   : > { %v4310_v11 = vadd.f32 %v4309_v52, %v4221_v9 }
 0x327   : > { %v4694_v5 = vmax.f32 %v4662_v42, 0.0 }
 0x328   : > { %v4399_v32 = vadd.f32 %v7474_v38, %v4310_v11  ;;  %v4632_v38 = vunpack.c.l.bf16 %v306_v33 }
 0x329   : > { %4726 = vst [vmem:[%s7547_s17 + $0x20] sm:$0xff] %v4694_v5 }
 0x32a   : > { %v4444_v40 = vmax.f32 %v4399_v32, 0.0  ;;  %v4558_v3 = vpop.f32.mrf.mxu3 }
 0x32b   : > { %v4559_v60 = vadd.f32 %v7542_v35, %v4558_v3  ;;  %v4223_v1 = vpop.f32.mrf.mxu1 }
 0x32c   : > { %v4312_v20 = vpop.f32.mrf.mxu2  ;;  %v4464_v21 = vpack.c.bf16 %v4444_v40, %v4443_v63  ;;  %v4224_v16 = vadd.f32 %v7352_v0, %v4223_v1  ;;  %v4636_v63 = vunpack.c.l.bf16 %v310_v41 }
 0x32d   : > { %v4663_v49 = vadd.f32 %v4631_v28, %v4559_v60 }
 0x32e   : > { %v4313_v17 = vadd.f32 %v4312_v20, %v4224_v16 }
 0x32f   : > { %v4695_v30 = vmax.f32 %v4663_v49, 0.0  ;;  %5295 = vmatmul.msk.bf16.gmra.mxu3 %vm3699_vm15, %v4464_v21  ;;  %v4637_v21 = vunpack.c.h.bf16 %v310_v41 }
 0x330   : > { %v4402_v54 = vadd.f32 %v7481_v19, %v4313_v17 }
 0x331   : > { %4727 = vst [vmem:[%s7547_s17 + $0x28] sm:$0xff] %v4695_v30 }
 0x332   : > { %v4561_v4 = vpop.f32.mrf.mxu3  ;;  %v4445_v56 = vmax.f32 %v4402_v54, 0.0 }
 0x333   : > { %v4562_v50 = vadd.f32 %v7542_v35, %v4561_v4  ;;  %v4225_v2 = vpop.f32.mrf.mxu1 }
 0x334   : > { %v4314_v36 = vpop.f32.mrf.mxu2  ;;  %v4226_v10 = vadd.f32 %v7352_v0, %v4225_v2  ;;  %v308_v0 = vld [vmem:[%s5743_s16 + $0x20] sm:$0xff]  }
 0x335   : > { %v4664_v45 = vadd.f32 %v4632_v38, %v4562_v50  ;;  %v4634_v34 = vunpack.c.l.bf16 %v308_v0  ;;  %v4635_v43 = vunpack.c.h.bf16 %v308_v0 }
 0x336   : > { %v4315_v25 = vadd.f32 %v4314_v36, %v4226_v10  ;;  %v312_v36 = vld [vmem:[%s5743_s16 + $0x30] sm:$0xff]  }
 0x337   : > { %v4696_v37 = vmax.f32 %v4664_v45, 0.0  ;;  %v4638_v45 = vunpack.c.l.bf16 %v312_v36 }
 0x338   : > { %v4404_v51 = vadd.f32 %v7491_v61, %v4315_v25 }
 0x339   : > { %4728 = vst [vmem:[%s7547_s17 + $0x30] sm:$0xff] %v4696_v37 }
 0x33a   : > { %v4446_v31 = vmax.f32 %v4404_v51, 0.0  ;;  %v4563_v18 = vpop.f32.mrf.mxu3 }
 0x33b   : > { %v4564_v29 = vadd.f32 %v7542_v35, %v4563_v18 }
 0x33c   : > { %v4465_v12 = vpack.c.bf16 %v4446_v31, %v4445_v56  ;;  %v4317_v48 = vpop.f32.mrf.mxu2 }
 0x33d   : > { %v4665_v47 = vadd.f32 %v4633_v24, %v4564_v29 }
 0x33f   : > { %v4697_v57 = vmax.f32 %v4665_v47, 0.0  ;;  %5296 = vmatmul.msk.bf16.gmra.mxu3 %vm3699_vm15, %v4465_v12 }
 0x341   : > { %4729 = vst [vmem:[%s7547_s17 + $0x38] sm:$0xff] %v4697_v57  ;;  %v4228_v19 = vpop.f32.mrf.mxu1 }
 0x342   : > { %v4566_v44 = vpop.f32.mrf.mxu3  ;;  %v4229_v27 = vadd.f32 %v7588_v13, %v4228_v19 }
 0x343   : > { %v4567_v61 = vadd.f32 %v7542_v35, %v4566_v44  ;;  %v314_v44 = vld [vmem:[%s5743_s16 + $0x38] sm:$0xff]  }
 0x344   : > { %v4319_v26 = vpop.f32.mrf.mxu2  ;;  %v4318_v46 = vadd.f32 %v4317_v48, %v4229_v27  ;;  %v4639_v48 = vunpack.c.h.bf16 %v312_v36  ;;  %v320_v36 = vld [vmem:[%s5743_s16 + $0x50] sm:$0xff]  }
 0x345   : > { %v4666_v53 = vadd.f32 %v4634_v34, %v4567_v61 }
 0x346   : > { %v4407_v59 = vadd.f32 %v7502_v8, %v4318_v46 }
 0x347   : > { %v4698_v62 = vmax.f32 %v4666_v53, 0.0 }
 0x348   : > { %v4447_v5 = vmax.f32 %v4407_v59, 0.0 }
 0x349   : > { %4730 = vst [vmem:[%s7547_s17 + $0x40] sm:$0xff] %v4698_v62  ;;  %v4230_v15 = vpop.f32.mrf.mxu1  ;;  %v4640_v62 = vunpack.c.l.bf16 %v314_v44 }
 0x34a   : > { %v4231_v23 = vadd.f32 %v7588_v13, %v4230_v15  ;;  %v4568_v58 = vpop.f32.mrf.mxu3 }
 0x34b   : > { %v4569_v52 = vadd.f32 %v7542_v35, %v4568_v58 }
 0x34c   : > { %v4320_v22 = vadd.f32 %v4319_v26, %v4231_v23 }
 0x34d   : > { %v4667_v9 = vadd.f32 %v4635_v43, %v4569_v52 }
 0x34e   : > { %v4409_v42 = vadd.f32 %v7512_v55, %v4320_v22 }
 0x34f   : > { %v4699_v11 = vmax.f32 %v4667_v9, 0.0  ;;  %v4322_v28 = vpop.f32.mrf.mxu2 }
 0x350   : > { %v4448_v32 = vmax.f32 %v4409_v42, 0.0 }
 0x351   : > { %4731 = vst [vmem:[%s7547_s17 + $0x48] sm:$0xff] %v4699_v11 }
 0x352   : > { %v4466_v40 = vpack.c.bf16 %v4448_v32, %v4447_v5  ;;  %v4571_v3 = vpop.f32.mrf.mxu3 }
 0x353   : > { %v4572_v20 = vadd.f32 %v7542_v35, %v4571_v3 }
 0x354   : > { %5297 = vmatmul.msk.bf16.gmra.mxu3 %vm3699_vm15, %v4466_v40 }
 0x355   : > { %v4233_v8 = vpop.f32.mrf.mxu1  ;;  %v4668_v60 = vadd.f32 %v4636_v63, %v4572_v20 }
 0x356   : > { %v4234_v55 = vadd.f32 %v7588_v13, %v4233_v8 }
 0x357   : > { %v4700_v1 = vmax.f32 %v4668_v60, 0.0  ;;  %v4324_v16 = vpop.f32.mrf.mxu2  ;;  %v318_v60 = vld [vmem:[%s5743_s16 + $0x48] sm:$0xff]  }
 0x358   : > { %v4323_v30 = vadd.f32 %v4322_v28, %v4234_v55  ;;  %v4644_v55 = vunpack.c.l.bf16 %v318_v60 }
 0x359   : > { %4732 = vst [vmem:[%s7547_s17 + $0x50] sm:$0xff] %v4700_v1 }
 0x35a   : > { %v4573_v49 = vpop.f32.mrf.mxu3  ;;  %v4412_v2 = vadd.f32 %v7521_v39, %v4323_v30  ;;  %v4645_v30 = vunpack.c.h.bf16 %v318_v60 }
 0x35b   : > { %v4574_v33 = vadd.f32 %v7542_v35, %v4573_v49 }
 0x35c   : > { %v4449_v51 = vmax.f32 %v4412_v2, 0.0  ;;  %v4646_v2 = vunpack.c.l.bf16 %v320_v36 }
 0x35d   : > { %v4235_v38 = vpop.f32.mrf.mxu1  ;;  %v4669_v17 = vadd.f32 %v4637_v21, %v4574_v33 }
 0x35e   : > { %v4236_v4 = vadd.f32 %v7588_v13, %v4235_v38 }
 0x35f   : > { %v4701_v50 = vmax.f32 %v4669_v17, 0.0 }
 0x360   : > { %v4325_v10 = vadd.f32 %v4324_v16, %v4236_v4 }
 0x361   : > { %4733 = vst [vmem:[%s7547_s17 + $0x58] sm:$0xff] %v4701_v50 }
 0x362   : > { %v4414_v54 = vadd.f32 %v7527_v7, %v4325_v10  ;;  %v4576_v25 = vpop.f32.mrf.mxu3 }
 0x363   : > { %v4577_v37 = vadd.f32 %v7542_v35, %v4576_v25  ;;  %v4327_v56 = vpop.f32.mrf.mxu2 }
 0x364   : > { %v4450_v24 = vmax.f32 %v4414_v54, 0.0 }
 0x365   : > { %v4238_v31 = vpop.f32.mrf.mxu1  ;;  %v4670_v18 = vadd.f32 %v4638_v45, %v4577_v37  ;;  %v4647_v37 = vunpack.c.h.bf16 %v320_v36 }
 0x366   : > { %v4467_v29 = vpack.c.bf16 %v4450_v24, %v4449_v51  ;;  %v4239_v39 = vadd.f32 %v7588_v13, %v4238_v31  ;;  %v322_v31 = vld [vmem:[%s5743_s16 + $0x58] sm:$0xff]  }
 0x367   : > { %v4702_v12 = vmax.f32 %v4670_v18, 0.0 }
 0x368   : > { %5298 = vmatmul.msk.bf16.gmra.mxu3 %vm3699_vm15, %v4467_v29  ;;  %v4328_v0 = vadd.f32 %v4327_v56, %v4239_v39  ;;  %v4648_v29 = vunpack.c.l.bf16 %v322_v31 }
 0x369   : > { %4734 = vst [vmem:[%s7547_s17 + $0x60] sm:$0xff] %v4702_v12 }
 0x36a   : > { %v4578_v47 = vpop.f32.mrf.mxu3  ;;  %v4417_v53 = vadd.f32 %v7531_v14, %v4328_v0  ;;  %v4641_v14 = vunpack.c.h.bf16 %v314_v44 }
 0x36b   : > { %v4579_v7 = vadd.f32 %v7542_v35, %v4578_v47  ;;  %v4329_v61 = vpop.f32.mrf.mxu2 }
 0x36c   : > { %v4451_v23 = vmax.f32 %v4417_v53, 0.0 }
 0x36d   : > { %v4240_v57 = vpop.f32.mrf.mxu1  ;;  %v4671_v19 = vadd.f32 %v4639_v48, %v4579_v7  ;;  %v4649_v7 = vunpack.c.h.bf16 %v322_v31 }
 0x36e   : > { %v4241_v34 = vadd.f32 %v7588_v13, %v4240_v57 }
 0x36f   : > { %v4703_v27 = vmax.f32 %v4671_v19, 0.0 }
 0x370   : > { %v4330_v26 = vadd.f32 %v4329_v61, %v4241_v34  ;;  %v324_v34 = vld [vmem:[%s5743_s16 + $0x60] sm:$0xff]  }
 0x371   : > { %4735 = vst [vmem:[%s7547_s17 + $0x68] sm:$0xff] %v4703_v27  ;;  %v4650_v61 = vunpack.c.l.bf16 %v324_v34 }
 0x372   : > { %v4419_v46 = vadd.f32 %v7534_v6, %v4330_v26  ;;  %v4581_v15 = vpop.f32.mrf.mxu3  ;;  %v316_v6 = vld [vmem:[%s5743_s16 + $0x40] sm:$0xff]  }
 0x373   : > { %v4582_v43 = vadd.f32 %v7542_v35, %v4581_v15  ;;  %v4642_v11 = vunpack.c.l.bf16 %v316_v6  ;;  %v4643_v40 = vunpack.c.h.bf16 %v316_v6 }
 0x374   : > { %v4452_v58 = vmax.f32 %v4419_v46, 0.0  ;;  %v4651_v46 = vunpack.c.h.bf16 %v324_v34 }
 0x375   : > { %v4672_v52 = vadd.f32 %v4640_v62, %v4582_v43 }
 0x376   : > { %v4468_v13 = vpack.c.bf16 %v4452_v58, %v4451_v23 }
 0x377   : > { %v4704_v59 = vmax.f32 %v4672_v52, 0.0  ;;  %v326_v52 = vld [vmem:[%s5743_s16 + $0x68] sm:$0xff]  }
 0x378   : > { %5299 = vmatmul.msk.bf16.gmra.mxu3 %vm3699_vm15, %v4468_v13  ;;  %v4652_v13 = vunpack.c.l.bf16 %v326_v52 }
 0x379   : > { %4736 = vst [vmem:[%s7547_s17 + $0x70] sm:$0xff] %v4704_v59 }
 0x37a   : > { %v4583_v22 = vpop.f32.mrf.mxu3 }
 0x37b   : > { %v4584_v9 = vadd.f32 %v7542_v35, %v4583_v22 }
 0x37d   : > { %v4673_v42 = vadd.f32 %v4641_v14, %v4584_v9 }
 0x37f   : > { %v4705_v41 = vmax.f32 %v4673_v42, 0.0  ;;  %v4653_v42 = vunpack.c.h.bf16 %v326_v52 }
 0x381   : > { %4737 = vst [vmem:[%s7547_s17 + $0x78] sm:$0xff] %v4705_v41 }
 0x382   : > { %v4586_v5 = vpop.f32.mrf.mxu3 }
 0x383   : > { %v4587_v32 = vadd.f32 %v7542_v35, %v4586_v5 }
 0x385   : > { %v4674_v28 = vadd.f32 %v4642_v11, %v4587_v32  ;;  %v328_v32 = vld [vmem:[%s5743_s16 + $0x70] sm:$0xff]  }
 0x387   : > { %v4706_v63 = vmax.f32 %v4674_v28, 0.0  ;;  %v4654_v28 = vunpack.c.l.bf16 %v328_v32 }
 0x389   : > { %4738 = vst [vmem:[%s7547_s17 + $0x80] sm:$0xff] %v4706_v63 }
 0x38a   : > { %v4588_v3 = vpop.f32.mrf.mxu3 }
 0x38b   : > { %v4589_v20 = vadd.f32 %v7542_v35, %v4588_v3 }
 0x38d   : > { %v4675_v8 = vadd.f32 %v4643_v40, %v4589_v20 }
 0x38f   : > { %v4707_v1 = vmax.f32 %v4675_v8, 0.0  ;;  %v4655_v8 = vunpack.c.h.bf16 %v328_v32 }
 0x391   : > { %4739 = vst [vmem:[%s7547_s17 + $0x88] sm:$0xff] %v4707_v1 }
 0x392   : > { %v4591_v21 = vpop.f32.mrf.mxu3 }
 0x393   : > { %v4592_v49 = vadd.f32 %v7542_v35, %v4591_v21  ;;  %v330_v21 = vld [vmem:[%s5743_s16 + $0x78] sm:$0xff]   ;;  %s4767_s16 = sshll.u32 %s7547_s17, 4  ;;  %s4768_s16 = int_to_ptr.vmem [resolvable:$true] %s4767_s16 }
 0x395   : > { %v4676_v16 = vadd.f32 %v4644_v55, %v4592_v49 }
 0x397   : > { %v4708_v33 = vmax.f32 %v4676_v16, 0.0  ;;  %v4656_v16 = vunpack.c.l.bf16 %v330_v21 }
 0x399   : > { %4740 = vst [vmem:[%s7547_s17 + $0x90] sm:$0xff] %v4708_v33 }
 0x39a   : > { %v4593_v38 = vpop.f32.mrf.mxu3 }
 0x39b   : > { %v4594_v17 = vadd.f32 %v7542_v35, %v4593_v38 }
 0x39d   : > { %v4677_v4 = vadd.f32 %v4645_v30, %v4594_v17 }
 0x39f   : > { %v4709_v50 = vmax.f32 %v4677_v4, 0.0  ;;  %v4657_v4 = vunpack.c.h.bf16 %v330_v21 }
 0x3a1   : > { %4741 = vst [vmem:[%s7547_s17 + $0x98] sm:$0xff] %v4709_v50 }
 0x3a2   : > { %v4596_v10 = vpop.f32.mrf.mxu3 }
 0x3a3   : > { %v4597_v45 = vadd.f32 %v7542_v35, %v4596_v10 }
 0x3a5   : > { %v4678_v54 = vadd.f32 %v4646_v2, %v4597_v45 }
 0x3a7   : > { %v4710_v25 = vmax.f32 %v4678_v54, 0.0 }
 0x3a9   : > { %4742 = vst [vmem:[%s7547_s17 + $0xa0] sm:$0xff] %v4710_v25 }
 0x3aa   : > { %v4598_v51 = vpop.f32.mrf.mxu3 }
 0x3ab   : > { %v4599_v24 = vadd.f32 %v7542_v35, %v4598_v51 }
 0x3ad   : > { %v4679_v56 = vadd.f32 %v4647_v37, %v4599_v24 }
 0x3af   : > { %v4711_v18 = vmax.f32 %v4679_v56, 0.0 }
 0x3b1   : > { %4743 = vst [vmem:[%s7547_s17 + $0xa8] sm:$0xff] %v4711_v18 }
 0x3b2   : > { %v4601_v12 = vpop.f32.mrf.mxu3 }
 0x3b3   : > { %v4602_v39 = vadd.f32 %v7542_v35, %v4601_v12 }
 0x3b5   : > { %v4680_v48 = vadd.f32 %v4648_v29, %v4602_v39 }
 0x3b7   : > { %v4712_v47 = vmax.f32 %v4680_v48, 0.0 }
 0x3b9   : > { %4744 = vst [vmem:[%s7547_s17 + $0xb0] sm:$0xff] %v4712_v47 }
 0x3ba   : > { %v4603_v0 = vpop.f32.mrf.mxu3 }
 0x3bb   : > { %v4604_v57 = vadd.f32 %v7542_v35, %v4603_v0 }
 0x3bd   : > { %v4681_v19 = vadd.f32 %v4649_v7, %v4604_v57 }
 0x3bf   : > { %v4713_v44 = vmax.f32 %v4681_v19, 0.0 }
 0x3c1   : > { %4745 = vst [vmem:[%s7547_s17 + $0xb8] sm:$0xff] %v4713_v44 }
 0x3c2   : > { %v4606_v27 = vpop.f32.mrf.mxu3 }
 0x3c3   : > { %v4607_v53 = vadd.f32 %v7542_v35, %v4606_v27 }
 0x3c5   : > { %v4682_v26 = vadd.f32 %v4650_v61, %v4607_v53 }
 0x3c7   : > { %v4714_v62 = vmax.f32 %v4682_v26, 0.0 }
 0x3c9   : > { %4746 = vst [vmem:[%s7547_s17 + $0xc0] sm:$0xff] %v4714_v62 }
 0x3ca   : > { %v4608_v15 = vpop.f32.mrf.mxu3 }
 0x3cb   : > { %v4609_v43 = vadd.f32 %v7542_v35, %v4608_v15 }
 0x3cd   : > { %v4683_v23 = vadd.f32 %v4651_v46, %v4609_v43 }
 0x3cf   : > { %v4715_v58 = vmax.f32 %v4683_v23, 0.0 }
 0x3d1   : > { %4747 = vst [vmem:[%s7547_s17 + $0xc8] sm:$0xff] %v4715_v58 }
 0x3d7   : > { %v4611_v59 = vpop.f32.mrf.mxu3 }
 0x3d8   : > { %v4612_v14 = vadd.f32 %v7542_v35, %v4611_v59 }
 0x3da   : > { %v4684_v22 = vadd.f32 %v4652_v13, %v4612_v14 }
 0x3dc   : > { %v4716_v9 = vmax.f32 %v4684_v22, 0.0 }
 0x3de   : > { %4748 = vst [vmem:[%s7547_s17 + $0xd0] sm:$0xff] %v4716_v9 }
 0x3df   : > { %v4613_v6 = vpop.f32.mrf.mxu3 }
 0x3e0   : > { %v4614_v41 = vadd.f32 %v7542_v35, %v4613_v6 }
 0x3e2   : > { %v4685_v11 = vadd.f32 %v4653_v42, %v4614_v41 }
 0x3e4   : > { %v4717_v5 = vmax.f32 %v4685_v11, 0.0 }
 0x3e6   : > { %4749 = vst [vmem:[%s7547_s17 + $0xd8] sm:$0xff] %v4717_v5 }
 0x3eb   : > { %v4616_v63 = vpop.f32.mrf.mxu3 }
 0x3ec   : > { %v4617_v40 = vadd.f32 %v7542_v35, %v4616_v63 }
 0x3ee   : > { %v4686_v3 = vadd.f32 %v4654_v28, %v4617_v40 }
 0x3f0   : > { %v4718_v20 = vmax.f32 %v4686_v3, 0.0 }
 0x3f2   : > { %4750 = vst [vmem:[%s7547_s17 + $0xe0] sm:$0xff] %v4718_v20 }
 0x3f3   : > { %v4618_v60 = vpop.f32.mrf.mxu3 }
 0x3f4   : > { %v4619_v1 = vadd.f32 %v7542_v35, %v4618_v60 }
 0x3f6   : > { %v4687_v55 = vadd.f32 %v4655_v8, %v4619_v1 }
 0x3f8   : > { %v4719_v49 = vmax.f32 %v4687_v55, 0.0 }
 0x3fa   : > { %4751 = vst [vmem:[%s7547_s17 + $0xe8] sm:$0xff] %v4719_v49 }
 0x3fb   : > { %v4621_v33 = vpop.f32.mrf.mxu3 }
 0x3fc   : > { %v4622_v30 = vadd.f32 %v7542_v35, %v4621_v33 }
 0x3fe   : > { %v4688_v38 = vadd.f32 %v4656_v16, %v4622_v30 }
 0x400   : > { %v4720_v17 = vmax.f32 %v4688_v38, 0.0 }
 0x402   : > { %4752 = vst [vmem:[%s7547_s17 + $0xf0] sm:$0xff] %v4720_v17 }
 0x403   : > { %v4623_v36 = vpop.f32.mrf.mxu3 }
 0x404   : > { %v4624_v50 = vadd.f32 %v7542_v35, %v4623_v36 }
 0x406   : > { %v4689_v2 = vadd.f32 %v4657_v4, %v4624_v50 }
 0x408   : > { %v4721_v10 = vmax.f32 %v4689_v2, 0.0 }
 0x40a   : > { %4753 = vst [vmem:[%s7547_s17 + $0xf8] sm:$0xff] %v4721_v10 }
 0x40b   : > { %5564 = shalt.err (!%p5561_p4)
}
 0x40c   : > { %s5611_s22 = smov 128   ;;  %s5612_s17 = smov 8  }
 0x40d   : > { %5419 = dma.vmem_to_hbm [thread:$0]  (%p5703_p11), %s4768_s16, 4096, %s4770_s21, %s4755_s10, %s5611_s22, %s5611_s22, %s5612_s17  }
 0x40e PF: > { %s4784_s18 = sand.u32 1, %s5591_s24   ;;  %p7723_p7 = scmp.ge.s32.totalorder %s5603_s27, 2 }
 0x40f   : > { %s4785_s19 = scalar_lea.sflag [#allocation5], %s4784_s18 }
 0x410   : > { %p5426_p5 = pnand %p7723_p7, %p5707_p12 }
 0x412   : > { %p5427_p8 = pneg %p5426_p5 }
 0x414   : > { %5586 = dma.done.wait (%p5427_p8), %s4785_s19, 4096  }
 0x415   : > { %5588 = vsyncadd (%p5427_p8), %s4785_s19, 4294963200  ;;  %s7724_s15 = sld [smem:[#allocation9_spill]]  ;;  %p20_p10 = scmp.ge.s32.totalorder %s5678_s30, 4  }
 0x416   : > { %s7725_s24 = smov %s5595_s25  ;;  %s7726_s25 = smov %s5599_s26 }
 0x417   : > { %s7728_s27 = smov %s5678_s30  ;;  %22 = sbr.rel (!%p20_p10) target bundleno = 5 (0x5), region = 96 }
 0x41b   : > { %s7727_s26 = smov %s7724_s15 }
 0x41c   :  { %4791 = vsyncpa [#allocation4], 1 }
 0x41d   :  { %4793 = vsyncpa [#allocation4 + $0x1], 1 }
 0x41e   :  { %4794 = vsyncpa [#allocation5], 1 }
 0x41f   :  { %4796 = vsyncpa [#allocation5 + $0x1], 1 }

</bundles_post_ra>
